<compile_context>
chip_gen: v6e
topology: v6e:2x2x1
jax: 0.10.0
libtpu: 0.0.40
codegen_flags: <defaults>
</compile_context>

<pallas_src>
import functools

import jax
import jax.numpy as jnp
from jax.experimental import pallas as pl
from jax.experimental.pallas import tpu as pltpu

_BN_EPS = 1e-5
_LANE = 128


# ------------------------------ small helpers -------------------------------

def _cdiv(a, b):
    return -(-a // b)


def _round_up(x, m):
    return _cdiv(x, m) * m


def _pad_rows(a, m_pad):
    m = a.shape[0]
    return a if m_pad == m else jnp.pad(a, ((0, m_pad - m), (0, 0)))


def _pad_cols(a, n_pad):
    n = a.shape[-1]
    if n_pad == n:
        return a
    pads = [(0, 0)] * (a.ndim - 1) + [(0, n_pad - n)]
    return jnp.pad(a, pads)


def _pad_vec(v, n_pad):
    n = v.shape[0]
    return v if n_pad == n else jnp.pad(v, (0, n_pad - n))


def _fold_bn(bn_params):
    gamma, beta, mean, var = bn_params
    scale = gamma / jnp.sqrt(var + _BN_EPS)
    bias = beta - mean * scale
    return scale, bias


@functools.lru_cache(maxsize=None)
def _vmem_budget_bytes():
    """3/4 of per-core VMEM (48 MiB on v7x, 96 MiB cap on v5e/v6e)."""
    try:
        cap = int(pltpu.get_tpu_info().vmem_capacity_bytes)
    except Exception:
        cap = 64 << 20  # conservative (v7x-sized) fallback
    return max(min(cap * 3 // 4, 96 << 20), 16 << 20)


def _balanced_tm(m, tm_cap):
    """M tile: multiple of 16, <= tm_cap, minimal row padding, and >=2 tiles
    (so both v7x TensorCores get work) when the problem is big enough."""
    tm_cap = max(16, (int(tm_cap) // 16) * 16)
    num = _cdiv(m, tm_cap)
    if num == 1 and m > 256:
        num = 2
    return max(16, min(_round_up(_cdiv(m, num), 16), tm_cap))


def _pick_tk(k):
    # Only used when the whole folded weight does not fit the 8 MiB residency
    # threshold (does not happen for ResNet shapes).
    for cand in (1024, 768, 512, 384, 256, 128):
        if k % cand == 0:
            return cand
    return k


# ----------------------------- Pallas kernels ------------------------------

def _mm_bias_kernel(x_ref, w_ref, b_ref, o_ref, *, relu):
    """out = maybe_relu(x @ w + b); whole K resident, no scratch needed."""
    acc = jnp.dot(x_ref[...], w_ref[...], preferred_element_type=jnp.float32)
    acc = acc + b_ref[...]
    if relu:
        acc = jnp.maximum(acc, 0.0)
    o_ref[...] = acc.astype(o_ref.dtype)


def _mm_bias_kblocked_kernel(x_ref, w_ref, b_ref, o_ref, acc_ref, *, relu):
    """K-blocked fallback with an f32 accumulator scratch."""
    @pl.when(pl.program_id(1) == 0)
    def _():
        acc_ref[...] = jnp.zeros_like(acc_ref)

    acc_ref[...] += jnp.dot(x_ref[...], w_ref[...],
                            preferred_element_type=jnp.float32)

    @pl.when(pl.program_id(1) == pl.num_programs(1) - 1)
    def _():
        y = acc_ref[...] + b_ref[...]
        if relu:
            y = jnp.maximum(y, 0.0)
        o_ref[...] = y.astype(o_ref.dtype)


def _conv3x3_s1_kernel(x_ref, w_ref, b_ref, o_ref, acc_ref, *, ho, wo):
    """3x3 stride-1 conv + BN + ReLU for one image, no HBM im2col.

    x_ref: (1, ho+2, wo+2, C) spatially padded bf16 activations.
    w_ref: (9, C, C) bf16, BN scale folded in (tap index = kh*3 + kw).
    acc_ref: (ho*wo, C) f32 scratch; 9 shifted-window matmuls accumulate here.
    """
    acc_ref[...] = jnp.zeros_like(acc_ref)
    for kh in range(3):
        for kw in range(3):
            win = x_ref[0, kh:kh + ho, kw:kw + wo, :]
            win = win.reshape(ho * wo, win.shape[-1])
            acc_ref[...] += jnp.dot(win, w_ref[kh * 3 + kw],
                                    preferred_element_type=jnp.float32)
    y = jnp.maximum(acc_ref[...] + b_ref[...], 0.0)
    o_ref[0] = y.astype(o_ref.dtype)


def _mm_bias_ds_res_kernel(y_ref, w3_ref, xs_ref, wd_ref, b_ref, o_ref):
    """conv3 + bn3 + downsample(1x1 conv + bn) residual + ReLU, fully fused."""
    acc = jnp.dot(y_ref[...], w3_ref[...], preferred_element_type=jnp.float32)
    acc = acc + jnp.dot(xs_ref[...], wd_ref[...],
                        preferred_element_type=jnp.float32)
    acc = acc + b_ref[...]
    o_ref[...] = jnp.maximum(acc, 0.0).astype(o_ref.dtype)


def _mm_bias_id_res_kernel(y_ref, w3_ref, res_ref, b_ref, o_ref):
    """conv3 + bn3 + identity residual + ReLU."""
    acc = jnp.dot(y_ref[...], w3_ref[...], preferred_element_type=jnp.float32)
    acc = acc + res_ref[...].astype(jnp.float32) + b_ref[...]
    o_ref[...] = jnp.maximum(acc, 0.0).astype(o_ref.dtype)


# ------------------------------ Pallas wrappers ------------------------------

def fused_matmul_bias(x2d, w2d, bias, *, relu=True, out_dtype=jnp.bfloat16):
    """maybe_relu(x2d @ w2d + bias); bf16 MXU operands, f32 accumulate.

    w2d must already have the BN scale folded in; bias is f32 per column and
    the caller pads the N (output-channel) dim to a lane multiple.
    """
    m, k = x2d.shape
    k2, n = w2d.shape
    assert k == k2, (k, k2)

    x2d = x2d.astype(jnp.bfloat16)
    w2d = w2d.astype(jnp.bfloat16)
    bias = bias.reshape(1, n).astype(jnp.float32)
    out_b = jnp.dtype(out_dtype).itemsize
    budget = _vmem_budget_bytes()

    # Keep the whole weight VMEM-resident (single K step) unless it is huge.
    tk = k if (k * n * 2) <= (8 << 20) else _pick_tk(k)
    single_k = (tk == k)

    # VMEM accounting: streams double-buffered; constant blocks too (default).
    fixed = 2 * tk * n * 2 + 2 * n * 4
    row_bytes = 2 * (tk * 2 + n * out_b) + (0 if single_k else n * 4)
    tm_cap = 1024 if n <= 256 else 512
    tm_fit = (budget - fixed - (4 << 20)) // max(row_bytes, 1)
    tm = _balanced_tm(m, min(tm_cap, max(int(tm_fit), 16)))
    m_pad = _round_up(m, tm)
    x2d = _pad_rows(x2d, m_pad)

    est = fixed + tm * row_bytes
    vmem_limit = int(min(max(est + (8 << 20), 16 << 20), budget))

    if single_k:
        grid = (m_pad // tm,)
        in_specs = [
            pl.BlockSpec((tm, k), lambda i: (i, 0)),
            pl.BlockSpec((k, n), lambda i: (0, 0)),
            pl.BlockSpec((1, n), lambda i: (0, 0)),
        ]
        out_specs = pl.BlockSpec((tm, n), lambda i: (i, 0))
        kernel = functools.partial(_mm_bias_kernel, relu=relu)
        scratch = []
        dims = ("parallel",)
    else:
        grid = (m_pad // tm, k // tk)
        in_specs = [
            pl.BlockSpec((tm, tk), lambda i, kk: (i, kk)),
            pl.BlockSpec((tk, n), lambda i, kk: (kk, 0)),
            pl.BlockSpec((1, n), lambda i, kk: (0, 0)),
        ]
        out_specs = pl.BlockSpec((tm, n), lambda i, kk: (i, 0))
        kernel = functools.partial(_mm_bias_kblocked_kernel, relu=relu)
        scratch = [pltpu.VMEM((tm, n), jnp.float32)]
        dims = ("parallel", "arbitrary")

    out = pl.pallas_call(
        kernel,
        out_shape=jax.ShapeDtypeStruct((m_pad, n), out_dtype),
        grid_spec=pltpu.PrefetchScalarGridSpec(
            num_scalar_prefetch=0,
            grid=grid,
            in_specs=in_specs,
            out_specs=out_specs,
            scratch_shapes=scratch,
        ),
        compiler_params=pltpu.CompilerParams(
            dimension_semantics=dims,
            vmem_limit_bytes=vmem_limit,
        ),
    )(x2d, w2d, bias)
    return out[:m] if m_pad != m else out


def _conv2_vmem_est(h, w, c):
    return (2 * (h + 2) * (w + 2) * c * 2   # padded image block, double-buffered
            + 2 * 9 * c * c * 2             # folded weights (double-buffered)
            + 2 * h * w * c * 2             # bf16 output block, double-buffered
            + h * w * c * 4                 # f32 accumulator scratch
            + h * w * c * 6                 # in-kernel window temporaries
            + 2 * c * 4)


def _conv2_fused_fits(h, w, c):
    return _conv2_vmem_est(h, w, c) + (8 << 20) <= _vmem_budget_bytes()


def fused_conv2_3x3_s1(y_nhwc, w_taps, bias):
    """3x3 stride-1 conv + BN + ReLU; per-image grid, no HBM im2col.

    y_nhwc: (N, H, W, C) bf16 (C already lane-padded); w_taps: (9, C, C);
    returns (N, H*W, C) bf16.
    """
    n, h, w, c = y_nhwc.shape
    yp = jnp.pad(y_nhwc.astype(jnp.bfloat16), ((0, 0), (1, 1), (1, 1), (0, 0)))
    w_taps = w_taps.astype(jnp.bfloat16)
    bias = bias.reshape(1, c).astype(jnp.float32)

    budget = _vmem_budget_bytes()
    est = _conv2_vmem_est(h, w, c)
    vmem_limit = int(min(max(est + (8 << 20), 16 << 20), budget))

    return pl.pallas_call(
        functools.partial(_conv3x3_s1_kernel, ho=h, wo=w),
        out_shape=jax.ShapeDtypeStruct((n, h * w, c), jnp.bfloat16),
        grid_spec=pltpu.PrefetchScalarGridSpec(
            num_scalar_prefetch=0,
            grid=(n,),
            in_specs=[
                pl.BlockSpec((1, h + 2, w + 2, c), lambda i: (i, 0, 0, 0)),
                pl.BlockSpec((9, c, c), lambda i: (0, 0, 0)),
                pl.BlockSpec((1, c), lambda i: (0, 0)),
            ],
            out_specs=pl.BlockSpec((1, h * w, c), lambda i: (i, 0, 0)),
            scratch_shapes=[pltpu.VMEM((h * w, c), jnp.float32)],
        ),
        compiler_params=pltpu.CompilerParams(
            dimension_semantics=("parallel",),
            vmem_limit_bytes=vmem_limit,
        ),
    )(yp, w_taps, bias)


def fused_conv3_residual(y2d, w3, b3, *, xs=None, wd=None, bd=None, res=None,
                         out_dtype=jnp.bfloat16):
    """relu(y2d @ w3 + b3 + residual); residual either computed in-kernel from
    (xs, wd, bd) (projection shortcut) or taken from `res` (identity)."""
    m, k3 = y2d.shape
    n = w3.shape[1]
    out_b = jnp.dtype(out_dtype).itemsize
    budget = _vmem_budget_bytes()

    y2d = y2d.astype(jnp.bfloat16)
    w3 = w3.astype(jnp.bfloat16)

    if xs is not None:
        kd = xs.shape[1]
        xs = xs.astype(jnp.bfloat16)
        wd = wd.astype(jnp.bfloat16)
        bias = (b3 + bd).reshape(1, n).astype(jnp.float32)
        fixed = 2 * (k3 * n * 2 + kd * n * 2 + n * 4)
        row_bytes = 2 * (k3 * 2 + kd * 2 + n * out_b)
    else:
        res = res.astype(jnp.bfloat16)
        bias = b3.reshape(1, n).astype(jnp.float32)
        fixed = 2 * (k3 * n * 2 + n * 4)
        row_bytes = 2 * (k3 * 2 + n * 2 + n * out_b)

    tm_cap = 1024 if n <= 256 else 512
    tm_fit = (budget - fixed - (4 << 20)) // max(row_bytes, 1)
    tm = _balanced_tm(m, min(tm_cap, max(int(tm_fit), 16)))
    m_pad = _round_up(m, tm)
    est = fixed + tm * row_bytes
    vmem_limit = int(min(max(est + (8 << 20), 16 << 20), budget))

    y2d = _pad_rows(y2d, m_pad)
    if xs is not None:
        xs = _pad_rows(xs, m_pad)
        args = (y2d, w3, xs, wd, bias)
        in_specs = [
            pl.BlockSpec((tm, k3), lambda i: (i, 0)),
            pl.BlockSpec((k3, n), lambda i: (0, 0)),
            pl.BlockSpec((tm, kd), lambda i: (i, 0)),
            pl.BlockSpec((kd, n), lambda i: (0, 0)),
            pl.BlockSpec((1, n), lambda i: (0, 0)),
        ]
        kernel = _mm_bias_ds_res_kernel
    else:
        res = _pad_rows(res, m_pad)
        args = (y2d, w3, res, bias)
        in_specs = [
            pl.BlockSpec((tm, k3), lambda i: (i, 0)),
            pl.BlockSpec((k3, n), lambda i: (0, 0)),
            pl.BlockSpec((tm, n), lambda i: (i, 0)),
            pl.BlockSpec((1, n), lambda i: (0, 0)),
        ]
        kernel = _mm_bias_id_res_kernel

    out = pl.pallas_call(
        kernel,
        out_shape=jax.ShapeDtypeStruct((m_pad, n), out_dtype),
        grid_spec=pltpu.PrefetchScalarGridSpec(
            num_scalar_prefetch=0,
            grid=(m_pad // tm,),
            in_specs=in_specs,
            out_specs=pl.BlockSpec((tm, n), lambda i: (i, 0)),
        ),
        compiler_params=pltpu.CompilerParams(
            dimension_semantics=("parallel",),
            vmem_limit_bytes=vmem_limit,
        ),
    )(*args)
    return out[:m] if m_pad != m else out


# ------------------------------- JAX glue -----------------------------------

def _im2col_3x3(x_nhwc, stride):
    """3x3 padded patches -> [N, Ho, Wo, 9*C] in (kh, kw, ci) order."""
    n, h, w, c = x_nhwc.shape
    xp = jnp.pad(x_nhwc, ((0, 0), (1, 1), (1, 1), (0, 0)))
    ho = (h - 1) // stride + 1
    wo = (w - 1) // stride + 1
    cols = []
    for kh in range(3):
        for kw in range(3):
            patch = xp[:, kh:kh + stride * (ho - 1) + 1:stride,
                          kw:kw + stride * (wo - 1) + 1:stride, :]
            cols.append(patch)
    return jnp.concatenate(cols, axis=-1), ho, wo


def bottleneck_deep_forward(x_nchw, params, stride=1, if_downsample=True):
    """Pallas implementation of BottleNeckDeep.forward (se_block=None, eval BN)."""
    # bf16 NHWC activations end-to-end; all kernels accumulate in f32.
    x = jnp.transpose(x_nchw, (0, 2, 3, 1)).astype(jnp.bfloat16)
    n, h, w, cin = x.shape
    cmid = params["w1"].shape[0]          # torch weight layout [Cout, Cin, kh, kw]
    cout = params["w3"].shape[0]          # = 4 * cmid
    cmid_p = _round_up(cmid, _LANE)       # lane-dense intermediate channels
    cout_p = _round_up(cout, _LANE)

    # conv1 (1x1) + bn1 + relu (BN scale folded into weights, bf16 output)
    s1, b1 = _fold_bn(params["bn1"])
    w1 = params["w1"][:, :, 0, 0].T * s1[None, :]              # [cin, cmid]
    w1 = _pad_cols(w1, cmid_p)
    b1 = _pad_vec(b1, cmid_p)
    y = fused_matmul_bias(x.reshape(n * h * w, cin), w1, b1, relu=True,
                          out_dtype=jnp.bfloat16)
    y = y.reshape(n, h, w, cmid_p)

    # conv2 (3x3, stride, pad=1) + bn2 + relu
    s2, b2 = _fold_bn(params["bn2"])
    w2 = jnp.transpose(params["w2"], (2, 3, 1, 0)) * s2[None, None, None, :]
    w2 = jnp.pad(w2, ((0, 0), (0, 0), (0, cmid_p - cmid), (0, cmid_p - cmid)))
    b2 = _pad_vec(b2, cmid_p)
    ho = (h - 1) // stride + 1
    wo = (w - 1) // stride + 1
    if stride == 1 and _conv2_fused_fits(h, w, cmid_p):
        y = fused_conv2_3x3_s1(y, w2.reshape(9, cmid_p, cmid_p), b2)
        y = y.reshape(n * ho * wo, cmid_p)
    else:
        # TODO(synk): strided (stride>1) conv2 still materializes im2col in
        # HBM (bf16); a polyphase split of the padded activation would bring
        # its HBM traffic down to ~1x like the stride-1 path.
        cols, ho, wo = _im2col_3x3(y, stride)
        y = fused_matmul_bias(cols.reshape(n * ho * wo, 9 * cmid_p),
                              w2.reshape(9 * cmid_p, cmid_p), b2,
                              relu=True, out_dtype=jnp.bfloat16)

    # conv3 (1x1) + bn3 + residual add + relu, fused in a single kernel
    s3, b3 = _fold_bn(params["bn3"])
    w3 = params["w3"][:, :, 0, 0].T * s3[None, :]               # [cmid, cout]
    w3 = jnp.pad(w3, ((0, cmid_p - cmid), (0, cout_p - cout)))
    b3 = _pad_vec(b3, cout_p)

    if if_downsample:
        sd, bd = _fold_bn(params["bnd"])
        wd = params["wd"][:, :, 0, 0].T * sd[None, :]           # [cin, cout]
        wd = _pad_cols(wd, cout_p)
        bd = _pad_vec(bd, cout_p)
        # TODO(synk): the strided shortcut gather is still a (cheap, bf16) XLA
        # slice; folding it into the conv3 kernel index_map would save one pass.
        xs = x[:, ::stride, ::stride, :].reshape(n * ho * wo, cin)
        out = fused_conv3_residual(y, w3, b3, xs=xs, wd=wd, bd=bd,
                                   out_dtype=jnp.bfloat16)
    else:
        if cin != cout or stride != 1:
            raise ValueError(
                "identity residual requires in_channels == 4*out_channels "
                "and stride == 1")
        res = _pad_cols(x.reshape(n * h * w, cin), cout_p)
        out = fused_conv3_residual(y, w3, b3, res=res, out_dtype=jnp.bfloat16)

    out = out[:, :cout].reshape(n, ho, wo, cout)
    # back to NCHW; the f32 cast fuses with the transpose in XLA
    return jnp.transpose(out, (0, 3, 1, 2)).astype(jnp.float32)


# ------------------------- pure-JAX reference check -------------------------

def _reference_forward(x_nchw, params, stride=1, if_downsample=True):
    x = x_nchw.astype(jnp.float32)

    def conv(v, w, s, p):
        return jax.lax.conv_general_dilated(
            v, w, (s, s), [(p, p), (p, p)],
            dimension_numbers=("NCHW", "OIHW", "NCHW"))

    def bn(v, bn_p):
        sc, bi = _fold_bn(bn_p)
        return v * sc[None, :, None, None] + bi[None, :, None, None]

    y = jnp.maximum(bn(conv(x, params["w1"], 1, 0), params["bn1"]), 0.0)
    y = jnp.maximum(bn(conv(y, params["w2"], stride, 1), params["bn2"]), 0.0)
    y = bn(conv(y, params["w3"], 1, 0), params["bn3"])
    if if_downsample:
        x = bn(conv(x, params["wd"], stride, 0), params["bnd"])
    return jnp.maximum(y + x, 0.0)


# --------------------------------- main --------------------------------------

def _make_params(key, in_channels, out_channels):
    cmid, cout = out_channels, out_channels * 4
    ks = jax.random.split(key, 8)

    def bn_params(k, c):
        k1, k2, k3, k4 = jax.random.split(k, 4)
        gamma = jax.random.uniform(k1, (c,), jnp.float32, 0.5, 1.5)
        beta = 0.1 * jax.random.normal(k2, (c,), jnp.float32)
        mean = 0.1 * jax.random.normal(k3, (c,), jnp.float32)
        var = jax.random.uniform(k4, (c,), jnp.float32, 0.5, 1.5)
        return (gamma, beta, mean, var)

    return {
        "w1": 0.1 * jax.random.normal(ks[0], (cmid, in_channels, 1, 1), jnp.float32),
        "bn1": bn_params(ks[1], cmid),
        "w2": 0.1 * jax.random.normal(ks[2], (cmid, cmid, 3, 3), jnp.float32),
        "bn2": bn_params(ks[3], cmid),
        "w3": 0.1 * jax.random.normal(ks[4], (cout, cmid, 1, 1), jnp.float32),
        "bn3": bn_params(ks[5], cout),
        "wd": 0.1 * jax.random.normal(ks[6], (cout, in_channels, 1, 1), jnp.float32),
        "bnd": bn_params(ks[7], cout),
    }


_fwd = jax.jit(bottleneck_deep_forward, static_argnames=("stride", "if_downsample"))


def _run_case(name, key, batch, in_channels, out_channels, spatial, stride,
              if_downsample):
    k_x, k_p = jax.random.split(key)
    x = jax.random.normal(k_x, (batch, in_channels, spatial, spatial), jnp.float32)
    params = _make_params(k_p, in_channels, out_channels)

    y = _fwd(x, params, stride=stride, if_downsample=if_downsample)
    y = jax.block_until_ready(y)

    y_ref = _reference_forward(x, params, stride=stride,
                               if_downsample=if_downsample)
    ho = (spatial - 1) // stride + 1
    assert y.shape == (batch, out_channels * 4, ho, ho), (name, y.shape)
    max_err = float(jnp.max(jnp.abs(y - y_ref)))
    # bf16 operands / intermediates -> tolerance relaxed vs. pure-f32 reference
    assert jnp.allclose(y, y_ref, rtol=2e-2, atol=2e-2), (name, max_err)


if __name__ == "__main__":
    key = jax.random.PRNGKey(0)
    keys = jax.random.split(key, 3)

    # projection (downsample) residual, stride 1 -> exercises fused no-im2col conv2
    _run_case("downsample_s1", keys[0], 2, 4, 4, 16, 1, True)
    # projection residual with stride 2 (strided im2col fallback + strided shortcut)
    _run_case("downsample_s2", keys[1], 2, 4, 4, 16, 2, True)
    # identity residual path (in_channels == 4*out_channels, stride 1)
    _run_case("identity_s1", keys[2], 2, 16, 4, 16, 1, False)

    print("KERNEL_OK")
</pallas_src>

<mosaic_0001>
module attributes {stable_mosaic.version = 11 : i64} {
  func.func @_mm_bias_kernel(%arg0: i32, %arg1: memref<256x4xbf16, #tpu.memory_space<vmem>>, %arg2: memref<4x128xbf16, #tpu.memory_space<vmem>>, %arg3: memref<1x128xf32, #tpu.memory_space<vmem>>, %arg4: memref<256x128xbf16, #tpu.memory_space<vmem>>) attributes {dimension_semantics = [#tpu.dimension_semantics<parallel>], iteration_bounds = array<i64: 2>, scalar_prefetch = 0 : i64, scratch_operands = 0 : i64, tpu.core_type = #tpu.core_type<tc>, window_params = [{transform_indices = @transform_0, window_bounds = array<i64: 256, 4>}, {pipeline_mode = #tpu.pipeline_mode<synchronous>, transform_indices = @transform_1, window_bounds = array<i64: 4, 128>}, {pipeline_mode = #tpu.pipeline_mode<synchronous>, transform_indices = @transform_2, window_bounds = array<i64: 1, 128>}, {transform_indices = @transform_3, window_bounds = array<i64: 256, 128>}]} {
    %c0 = arith.constant 0 : index
    %c0_0 = arith.constant 0 : index
    %0 = vector.load %arg1[%c0, %c0_0] : memref<256x4xbf16, #tpu.memory_space<vmem>>, vector<256x4xbf16>
    %c0_1 = arith.constant 0 : index
    %c0_2 = arith.constant 0 : index
    %1 = vector.load %arg2[%c0_1, %c0_2] : memref<4x128xbf16, #tpu.memory_space<vmem>>, vector<4x128xbf16>
    %cst = arith.constant dense<0.000000e+00> : vector<256x128xf32>
    %2 = tpu.matmul %0, %1, %cst {dimension_numbers = #tpu.dot_dimension_numbers<[1], [0], [0], [1], [0, 0, 1, 1], [], []>} : vector<256x4xbf16>, vector<4x128xbf16>, vector<256x128xf32> -> vector<256x128xf32>
    %c0_3 = arith.constant 0 : index
    %c0_4 = arith.constant 0 : index
    %3 = vector.load %arg3[%c0_3, %c0_4] : memref<1x128xf32, #tpu.memory_space<vmem>>, vector<1x128xf32>
    %4 = vector.broadcast %3 : vector<1x128xf32> to vector<256x128xf32>
    %5 = arith.addf %2, %4 : vector<256x128xf32>
    %cst_5 = arith.constant 0.000000e+00 : f32
    %6 = vector.broadcast %cst_5 : f32 to vector<256x128xf32>
    %7 = arith.maximumf %5, %6 : vector<256x128xf32>
    %8 = arith.truncf %7 : vector<256x128xf32> to vector<256x128xbf16>
    %c0_6 = arith.constant 0 : index
    %c0_7 = arith.constant 0 : index
    %9 = vector.load %arg4[%c0_6, %c0_7] : memref<256x128xbf16, #tpu.memory_space<vmem>>, vector<256x128xbf16>
    tpu.vector_store %arg4[%c0_6, %c0_7], %8 {strides = array<i32>} : memref<256x128xbf16, #tpu.memory_space<vmem>>, vector<256x128xbf16>,
    return
  }
  func.func @transform_0(%arg0: i32) -> (i32, i32) {
    %c0_i32 = arith.constant 0 : i32
    %c0_i32_0 = arith.constant 0 : i32
    return %arg0, %c0_i32 : i32, i32
  }
  func.func @transform_1(%arg0: i32) -> (i32, i32) {
    %c0_i32 = arith.constant 0 : i32
    %c0_i32_0 = arith.constant 0 : i32
    %c0_i32_1 = arith.constant 0 : i32
    return %c0_i32, %c0_i32_0 : i32, i32
  }
  func.func @transform_2(%arg0: i32) -> (i32, i32) {
    %c0_i32 = arith.constant 0 : i32
    %c0_i32_0 = arith.constant 0 : i32
    %c0_i32_1 = arith.constant 0 : i32
    return %c0_i32, %c0_i32_0 : i32, i32
  }
  func.func @transform_3(%arg0: i32) -> (i32, i32) {
    %c0_i32 = arith.constant 0 : i32
    %c0_i32_0 = arith.constant 0 : i32
    return %arg0, %c0_i32 : i32, i32
  }
}

module attributes {stable_mosaic.version = 11 : i64} {
  func.func @_conv3x3_s1_kernel(%arg0: i32, %arg1: memref<1x18x18x128xbf16, #tpu.memory_space<vmem>>, %arg2: memref<9x128x128xbf16, #tpu.memory_space<vmem>>, %arg3: memref<1x128xf32, #tpu.memory_space<vmem>>, %arg4: memref<1x256x128xbf16, #tpu.memory_space<vmem>>, %arg5: memref<256x128xf32, #tpu.memory_space<vmem>>) attributes {dimension_semantics = [#tpu.dimension_semantics<parallel>], iteration_bounds = array<i64: 2>, scalar_prefetch = 0 : i64, scratch_operands = 1 : i64, tpu.core_type = #tpu.core_type<tc>, window_params = [{transform_indices = @transform_0, window_bounds = array<i64: 1, 18, 18, 128>}, {pipeline_mode = #tpu.pipeline_mode<synchronous>, transform_indices = @transform_1, window_bounds = array<i64: 9, 128, 128>}, {pipeline_mode = #tpu.pipeline_mode<synchronous>, transform_indices = @transform_2, window_bounds = array<i64: 1, 128>}, {transform_indices = @transform_3, window_bounds = array<i64: 1, 256, 128>}]} {
    %cst = arith.constant 0.000000e+00 : f32
    %0 = vector.broadcast %cst : f32 to vector<256x128xf32>
    %c0 = arith.constant 0 : index
    %c0_0 = arith.constant 0 : index
    %1 = vector.load %arg5[%c0, %c0_0] : memref<256x128xf32, #tpu.memory_space<vmem>>, vector<256x128xf32>
    tpu.vector_store %arg5[%c0, %c0_0], %0 {strides = array<i32>} : memref<256x128xf32, #tpu.memory_space<vmem>>, vector<256x128xf32>,
    %c0_1 = arith.constant 0 : index
    %c0_2 = arith.constant 0 : index
    %c0_3 = arith.constant 0 : index
    %c0_4 = arith.constant 0 : index
    %2 = vector.load %arg1[%c0_1, %c0_2, %c0_3, %c0_4] : memref<1x18x18x128xbf16, #tpu.memory_space<vmem>>, vector<1x16x16x128xbf16>
    %3 = vector.shape_cast %2 : vector<1x16x16x128xbf16> to vector<16x16x128xbf16>
    %4 = vector.shape_cast %3 : vector<16x16x128xbf16> to vector<256x128xbf16>
    %c0_5 = arith.constant 0 : index
    %c0_6 = arith.constant 0 : index
    %5 = vector.load %arg5[%c0_5, %c0_6] : memref<256x128xf32, #tpu.memory_space<vmem>>, vector<256x128xf32>
    %c0_7 = arith.constant 0 : index
    %c0_8 = arith.constant 0 : index
    %c0_9 = arith.constant 0 : index
    %6 = vector.load %arg2[%c0_7, %c0_8, %c0_9] : memref<9x128x128xbf16, #tpu.memory_space<vmem>>, vector<1x128x128xbf16>
    %7 = vector.shape_cast %6 : vector<1x128x128xbf16> to vector<128x128xbf16>
    %cst_10 = arith.constant dense<0.000000e+00> : vector<256x128xf32>
    %8 = tpu.matmul %4, %7, %cst_10 {dimension_numbers = #tpu.dot_dimension_numbers<[1], [0], [0], [1], [0, 0, 1, 1], [], []>} : vector<256x128xbf16>, vector<128x128xbf16>, vector<256x128xf32> -> vector<256x128xf32>
    %9 = arith.addf %5, %8 : vector<256x128xf32>
    %c0_11 = arith.constant 0 : index
    %c0_12 = arith.constant 0 : index
    %10 = vector.load %arg5[%c0_11, %c0_12] : memref<256x128xf32, #tpu.memory_space<vmem>>, vector<256x128xf32>
    tpu.vector_store %arg5[%c0_11, %c0_12], %9 {strides = array<i32>} : memref<256x128xf32, #tpu.memory_space<vmem>>, vector<256x128xf32>,
    %c0_13 = arith.constant 0 : index
    %c0_14 = arith.constant 0 : index
    %c1 = arith.constant 1 : index
    %c0_15 = arith.constant 0 : index
    %11 = vector.load %arg1[%c0_13, %c0_14, %c1, %c0_15] : memref<1x18x18x128xbf16, #tpu.memory_space<vmem>>, vector<1x16x16x128xbf16>
    %12 = vector.shape_cast %11 : vector<1x16x16x128xbf16> to vector<16x16x128xbf16>
    %13 = vector.shape_cast %12 : vector<16x16x128xbf16> to vector<256x128xbf16>
    %c0_16 = arith.constant 0 : index
    %c0_17 = arith.constant 0 : index
    %14 = vector.load %arg5[%c0_16, %c0_17] : memref<256x128xf32, #tpu.memory_space<vmem>>, vector<256x128xf32>
    %c1_18 = arith.constant 1 : index
    %c0_19 = arith.constant 0 : index
    %c0_20 = arith.constant 0 : index
    %15 = vector.load %arg2[%c1_18, %c0_19, %c0_20] : memref<9x128x128xbf16, #tpu.memory_space<vmem>>, vector<1x128x128xbf16>
    %16 = vector.shape_cast %15 : vector<1x128x128xbf16> to vector<128x128xbf16>
    %cst_21 = arith.constant dense<0.000000e+00> : vector<256x128xf32>
    %17 = tpu.matmul %13, %16, %cst_21 {dimension_numbers = #tpu.dot_dimension_numbers<[1], [0], [0], [1], [0, 0, 1, 1], [], []>} : vector<256x128xbf16>, vector<128x128xbf16>, vector<256x128xf32> -> vector<256x128xf32>
    %18 = arith.addf %14, %17 : vector<256x128xf32>
    %c0_22 = arith.constant 0 : index
    %c0_23 = arith.constant 0 : index
    %19 = vector.load %arg5[%c0_22, %c0_23] : memref<256x128xf32, #tpu.memory_space<vmem>>, vector<256x128xf32>
    tpu.vector_store %arg5[%c0_22, %c0_23], %18 {strides = array<i32>} : memref<256x128xf32, #tpu.memory_space<vmem>>, vector<256x128xf32>,
    %c0_24 = arith.constant 0 : index
    %c0_25 = arith.constant 0 : index
    %c2 = arith.constant 2 : index
    %c0_26 = arith.constant 0 : index
    %20 = vector.load %arg1[%c0_24, %c0_25, %c2, %c0_26] : memref<1x18x18x128xbf16, #tpu.memory_space<vmem>>, vector<1x16x16x128xbf16>
    %21 = vector.shape_cast %20 : vector<1x16x16x128xbf16> to vector<16x16x128xbf16>
    %22 = vector.shape_cast %21 : vector<16x16x128xbf16> to vector<256x128xbf16>
    %c0_27 = arith.constant 0 : index
    %c0_28 = arith.constant 0 : index
    %23 = vector.load %arg5[%c0_27, %c0_28] : memref<256x128xf32, #tpu.memory_space<vmem>>, vector<256x128xf32>
    %c2_29 = arith.constant 2 : index
    %c0_30 = arith.constant 0 : index
    %c0_31 = arith.constant 0 : index
    %24 = vector.load %arg2[%c2_29, %c0_30, %c0_31] : memref<9x128x128xbf16, #tpu.memory_space<vmem>>, vector<1x128x128xbf16>
    %25 = vector.shape_cast %24 : vector<1x128x128xbf16> to vector<128x128xbf16>
    %cst_32 = arith.constant dense<0.000000e+00> : vector<256x128xf32>
    %26 = tpu.matmul %22, %25, %cst_32 {dimension_numbers = #tpu.dot_dimension_numbers<[1], [0], [0], [1], [0, 0, 1, 1], [], []>} : vector<256x128xbf16>, vector<128x128xbf16>, vector<256x128xf32> -> vector<256x128xf32>
    %27 = arith.addf %23, %26 : vector<256x128xf32>
    %c0_33 = arith.constant 0 : index
    %c0_34 = arith.constant 0 : index
    %28 = vector.load %arg5[%c0_33, %c0_34] : memref<256x128xf32, #tpu.memory_space<vmem>>, vector<256x128xf32>
    tpu.vector_store %arg5[%c0_33, %c0_34], %27 {strides = array<i32>} : memref<256x128xf32, #tpu.memory_space<vmem>>, vector<256x128xf32>,
    %c0_35 = arith.constant 0 : index
    %c1_36 = arith.constant 1 : index
    %c0_37 = arith.constant 0 : index
    %c0_38 = arith.constant 0 : index
    %29 = vector.load %arg1[%c0_35, %c1_36, %c0_37, %c0_38] : memref<1x18x18x128xbf16, #tpu.memory_space<vmem>>, vector<1x16x16x128xbf16>
    %30 = vector.shape_cast %29 : vector<1x16x16x128xbf16> to vector<16x16x128xbf16>
    %31 = vector.shape_cast %30 : vector<16x16x128xbf16> to vector<256x128xbf16>
    %c0_39 = arith.constant 0 : index
    %c0_40 = arith.constant 0 : index
    %32 = vector.load %arg5[%c0_39, %c0_40] : memref<256x128xf32, #tpu.memory_space<vmem>>, vector<256x128xf32>
    %c3 = arith.constant 3 : index
    %c0_41 = arith.constant 0 : index
    %c0_42 = arith.constant 0 : index
    %33 = vector.load %arg2[%c3, %c0_41, %c0_42] : memref<9x128x128xbf16, #tpu.memory_space<vmem>>, vector<1x128x128xbf16>
    %34 = vector.shape_cast %33 : vector<1x128x128xbf16> to vector<128x128xbf16>
    %cst_43 = arith.constant dense<0.000000e+00> : vector<256x128xf32>
    %35 = tpu.matmul %31, %34, %cst_43 {dimension_numbers = #tpu.dot_dimension_numbers<[1], [0], [0], [1], [0, 0, 1, 1], [], []>} : vector<256x128xbf16>, vector<128x128xbf16>, vector<256x128xf32> -> vector<256x128xf32>
    %36 = arith.addf %32, %35 : vector<256x128xf32>
    %c0_44 = arith.constant 0 : index
    %c0_45 = arith.constant 0 : index
    %37 = vector.load %arg5[%c0_44, %c0_45] : memref<256x128xf32, #tpu.memory_space<vmem>>, vector<256x128xf32>
    tpu.vector_store %arg5[%c0_44, %c0_45], %36 {strides = array<i32>} : memref<256x128xf32, #tpu.memory_space<vmem>>, vector<256x128xf32>,
    %c0_46 = arith.constant 0 : index
    %c1_47 = arith.constant 1 : index
    %c1_48 = arith.constant 1 : index
    %c0_49 = arith.constant 0 : index
    %38 = vector.load %arg1[%c0_46, %c1_47, %c1_48, %c0_49] : memref<1x18x18x128xbf16, #tpu.memory_space<vmem>>, vector<1x16x16x128xbf16>
    %39 = vector.shape_cast %38 : vector<1x16x16x128xbf16> to vector<16x16x128xbf16>
    %40 = vector.shape_cast %39 : vector<16x16x128xbf16> to vector<256x128xbf16>
    %c0_50 = arith.constant 0 : index
    %c0_51 = arith.constant 0 : index
    %41 = vector.load %arg5[%c0_50, %c0_51] : memref<256x128xf32, #tpu.memory_space<vmem>>, vector<256x128xf32>
    %c4 = arith.constant 4 : index
    %c0_52 = arith.constant 0 : index
    %c0_53 = arith.constant 0 : index
    %42 = vector.load %arg2[%c4, %c0_52, %c0_53] : memref<9x128x128xbf16, #tpu.memory_space<vmem>>, vector<1x128x128xbf16>
    %43 = vector.shape_cast %42 : vector<1x128x128xbf16> to vector<128x128xbf16>
    %cst_54 = arith.constant dense<0.000000e+00> : vector<256x128xf32>
    %44 = tpu.matmul %40, %43, %cst_54 {dimension_numbers = #tpu.dot_dimension_numbers<[1], [0], [0], [1], [0, 0, 1, 1], [], []>} : vector<256x128xbf16>, vector<128x128xbf16>, vector<256x128xf32> -> vector<256x128xf32>
    %45 = arith.addf %41, %44 : vector<256x128xf32>
    %c0_55 = arith.constant 0 : index
    %c0_56 = arith.constant 0 : index
    %46 = vector.load %arg5[%c0_55, %c0_56] : memref<256x128xf32, #tpu.memory_space<vmem>>, vector<256x128xf32>
    tpu.vector_store %arg5[%c0_55, %c0_56], %45 {strides = array<i32>} : memref<256x128xf32, #tpu.memory_space<vmem>>, vector<256x128xf32>,
    %c0_57 = arith.constant 0 : index
    %c1_58 = arith.constant 1 : index
    %c2_59 = arith.constant 2 : index
    %c0_60 = arith.constant 0 : index
    %47 = vector.load %arg1[%c0_57, %c1_58, %c2_59, %c0_60] : memref<1x18x18x128xbf16, #tpu.memory_space<vmem>>, vector<1x16x16x128xbf16>
    %48 = vector.shape_cast %47 : vector<1x16x16x128xbf16> to vector<16x16x128xbf16>
    %49 = vector.shape_cast %48 : vector<16x16x128xbf16> to vector<256x128xbf16>
    %c0_61 = arith.constant 0 : index
    %c0_62 = arith.constant 0 : index
    %50 = vector.load %arg5[%c0_61, %c0_62] : memref<256x128xf32, #tpu.memory_space<vmem>>, vector<256x128xf32>
    %c5 = arith.constant 5 : index
    %c0_63 = arith.constant 0 : index
    %c0_64 = arith.constant 0 : index
    %51 = vector.load %arg2[%c5, %c0_63, %c0_64] : memref<9x128x128xbf16, #tpu.memory_space<vmem>>, vector<1x128x128xbf16>
    %52 = vector.shape_cast %51 : vector<1x128x128xbf16> to vector<128x128xbf16>
    %cst_65 = arith.constant dense<0.000000e+00> : vector<256x128xf32>
    %53 = tpu.matmul %49, %52, %cst_65 {dimension_numbers = #tpu.dot_dimension_numbers<[1], [0], [0], [1], [0, 0, 1, 1], [], []>} : vector<256x128xbf16>, vector<128x128xbf16>, vector<256x128xf32> -> vector<256x128xf32>
    %54 = arith.addf %50, %53 : vector<256x128xf32>
    %c0_66 = arith.constant 0 : index
    %c0_67 = arith.constant 0 : index
    %55 = vector.load %arg5[%c0_66, %c0_67] : memref<256x128xf32, #tpu.memory_space<vmem>>, vector<256x128xf32>
    tpu.vector_store %arg5[%c0_66, %c0_67], %54 {strides = array<i32>} : memref<256x128xf32, #tpu.memory_space<vmem>>, vector<256x128xf32>,
    %c0_68 = arith.constant 0 : index
    %c2_69 = arith.constant 2 : index
    %c0_70 = arith.constant 0 : index
    %c0_71 = arith.constant 0 : index
    %56 = vector.load %arg1[%c0_68, %c2_69, %c0_70, %c0_71] : memref<1x18x18x128xbf16, #tpu.memory_space<vmem>>, vector<1x16x16x128xbf16>
    %57 = vector.shape_cast %56 : vector<1x16x16x128xbf16> to vector<16x16x128xbf16>
    %58 = vector.shape_cast %57 : vector<16x16x128xbf16> to vector<256x128xbf16>
    %c0_72 = arith.constant 0 : index
    %c0_73 = arith.constant 0 : index
    %59 = vector.load %arg5[%c0_72, %c0_73] : memref<256x128xf32, #tpu.memory_space<vmem>>, vector<256x128xf32>
    %c6 = arith.constant 6 : index
    %c0_74 = arith.constant 0 : index
    %c0_75 = arith.constant 0 : index
    %60 = vector.load %arg2[%c6, %c0_74, %c0_75] : memref<9x128x128xbf16, #tpu.memory_space<vmem>>, vector<1x128x128xbf16>
    %61 = vector.shape_cast %60 : vector<1x128x128xbf16> to vector<128x128xbf16>
    %cst_76 = arith.constant dense<0.000000e+00> : vector<256x128xf32>
    %62 = tpu.matmul %58, %61, %cst_76 {dimension_numbers = #tpu.dot_dimension_numbers<[1], [0], [0], [1], [0, 0, 1, 1], [], []>} : vector<256x128xbf16>, vector<128x128xbf16>, vector<256x128xf32> -> vector<256x128xf32>
    %63 = arith.addf %59, %62 : vector<256x128xf32>
    %c0_77 = arith.constant 0 : index
    %c0_78 = arith.constant 0 : index
    %64 = vector.load %arg5[%c0_77, %c0_78] : memref<256x128xf32, #tpu.memory_space<vmem>>, vector<256x128xf32>
    tpu.vector_store %arg5[%c0_77, %c0_78], %63 {strides = array<i32>} : memref<256x128xf32, #tpu.memory_space<vmem>>, vector<256x128xf32>,
    %c0_79 = arith.constant 0 : index
    %c2_80 = arith.constant 2 : index
    %c1_81 = arith.constant 1 : index
    %c0_82 = arith.constant 0 : index
    %65 = vector.load %arg1[%c0_79, %c2_80, %c1_81, %c0_82] : memref<1x18x18x128xbf16, #tpu.memory_space<vmem>>, vector<1x16x16x128xbf16>
    %66 = vector.shape_cast %65 : vector<1x16x16x128xbf16> to vector<16x16x128xbf16>
    %67 = vector.shape_cast %66 : vector<16x16x128xbf16> to vector<256x128xbf16>
    %c0_83 = arith.constant 0 : index
    %c0_84 = arith.constant 0 : index
    %68 = vector.load %arg5[%c0_83, %c0_84] : memref<256x128xf32, #tpu.memory_space<vmem>>, vector<256x128xf32>
    %c7 = arith.constant 7 : index
    %c0_85 = arith.constant 0 : index
    %c0_86 = arith.constant 0 : index
    %69 = vector.load %arg2[%c7, %c0_85, %c0_86] : memref<9x128x128xbf16, #tpu.memory_space<vmem>>, vector<1x128x128xbf16>
    %70 = vector.shape_cast %69 : vector<1x128x128xbf16> to vector<128x128xbf16>
    %cst_87 = arith.constant dense<0.000000e+00> : vector<256x128xf32>
    %71 = tpu.matmul %67, %70, %cst_87 {dimension_numbers = #tpu.dot_dimension_numbers<[1], [0], [0], [1], [0, 0, 1, 1], [], []>} : vector<256x128xbf16>, vector<128x128xbf16>, vector<256x128xf32> -> vector<256x128xf32>
    %72 = arith.addf %68, %71 : vector<256x128xf32>
    %c0_88 = arith.constant 0 : index
    %c0_89 = arith.constant 0 : index
    %73 = vector.load %arg5[%c0_88, %c0_89] : memref<256x128xf32, #tpu.memory_space<vmem>>, vector<256x128xf32>
    tpu.vector_store %arg5[%c0_88, %c0_89], %72 {strides = array<i32>} : memref<256x128xf32, #tpu.memory_space<vmem>>, vector<256x128xf32>,
    %c0_90 = arith.constant 0 : index
    %c2_91 = arith.constant 2 : index
    %c2_92 = arith.constant 2 : index
    %c0_93 = arith.constant 0 : index
    %74 = vector.load %arg1[%c0_90, %c2_91, %c2_92, %c0_93] : memref<1x18x18x128xbf16, #tpu.memory_space<vmem>>, vector<1x16x16x128xbf16>
    %75 = vector.shape_cast %74 : vector<1x16x16x128xbf16> to vector<16x16x128xbf16>
    %76 = vector.shape_cast %75 : vector<16x16x128xbf16> to vector<256x128xbf16>
    %c0_94 = arith.constant 0 : index
    %c0_95 = arith.constant 0 : index
    %77 = vector.load %arg5[%c0_94, %c0_95] : memref<256x128xf32, #tpu.memory_space<vmem>>, vector<256x128xf32>
    %c8 = arith.constant 8 : index
    %c0_96 = arith.constant 0 : index
    %c0_97 = arith.constant 0 : index
    %78 = vector.load %arg2[%c8, %c0_96, %c0_97] : memref<9x128x128xbf16, #tpu.memory_space<vmem>>, vector<1x128x128xbf16>
    %79 = vector.shape_cast %78 : vector<1x128x128xbf16> to vector<128x128xbf16>
    %cst_98 = arith.constant dense<0.000000e+00> : vector<256x128xf32>
    %80 = tpu.matmul %76, %79, %cst_98 {dimension_numbers = #tpu.dot_dimension_numbers<[1], [0], [0], [1], [0, 0, 1, 1], [], []>} : vector<256x128xbf16>, vector<128x128xbf16>, vector<256x128xf32> -> vector<256x128xf32>
    %81 = arith.addf %77, %80 : vector<256x128xf32>
    %c0_99 = arith.constant 0 : index
    %c0_100 = arith.constant 0 : index
    %82 = vector.load %arg5[%c0_99, %c0_100] : memref<256x128xf32, #tpu.memory_space<vmem>>, vector<256x128xf32>
    tpu.vector_store %arg5[%c0_99, %c0_100], %81 {strides = array<i32>} : memref<256x128xf32, #tpu.memory_space<vmem>>, vector<256x128xf32>,
    %c0_101 = arith.constant 0 : index
    %c0_102 = arith.constant 0 : index
    %83 = vector.load %arg5[%c0_101, %c0_102] : memref<256x128xf32, #tpu.memory_space<vmem>>, vector<256x128xf32>
    %c0_103 = arith.constant 0 : index
    %c0_104 = arith.constant 0 : index
    %84 = vector.load %arg3[%c0_103, %c0_104] : memref<1x128xf32, #tpu.memory_space<vmem>>, vector<1x128xf32>
    %85 = vector.broadcast %84 : vector<1x128xf32> to vector<256x128xf32>
    %86 = arith.addf %83, %85 : vector<256x128xf32>
    %cst_105 = arith.constant 0.000000e+00 : f32
    %87 = vector.broadcast %cst_105 : f32 to vector<256x128xf32>
    %88 = arith.maximumf %86, %87 : vector<256x128xf32>
    %89 = arith.truncf %88 : vector<256x128xf32> to vector<256x128xbf16>
    %c0_106 = arith.constant 0 : index
    %c0_107 = arith.constant 0 : index
    %c0_108 = arith.constant 0 : index
    %90 = vector.load %arg4[%c0_106, %c0_107, %c0_108] : memref<1x256x128xbf16, #tpu.memory_space<vmem>>, vector<1x256x128xbf16>
    %91 = vector.shape_cast %90 : vector<1x256x128xbf16> to vector<256x128xbf16>
    %92 = vector.shape_cast %89 : vector<256x128xbf16> to vector<1x256x128xbf16>
    tpu.vector_store %arg4[%c0_106, %c0_107, %c0_108], %92 {strides = array<i32>} : memref<1x256x128xbf16, #tpu.memory_space<vmem>>, vector<1x256x128xbf16>,
    return
  }
  func.func @transform_0(%arg0: i32) -> (i32, i32, i32, i32) {
    %c0_i32 = arith.constant 0 : i32
    %c0_i32_0 = arith.constant 0 : i32
    %c0_i32_1 = arith.constant 0 : i32
    %c0_i32_2 = arith.constant 0 : i32
    return %arg0, %c0_i32, %c0_i32_0, %c0_i32_1 : i32, i32, i32, i32
  }
  func.func @transform_1(%arg0: i32) -> (i32, i32, i32) {
    %c0_i32 = arith.constant 0 : i32
    %c0_i32_0 = arith.constant 0 : i32
    %c0_i32_1 = arith.constant 0 : i32
    %c0_i32_2 = arith.constant 0 : i32
    return %c0_i32, %c0_i32_0, %c0_i32_1 : i32, i32, i32
  }
  func.func @transform_2(%arg0: i32) -> (i32, i32) {
    %c0_i32 = arith.constant 0 : i32
    %c0_i32_0 = arith.constant 0 : i32
    %c0_i32_1 = arith.constant 0 : i32
    return %c0_i32, %c0_i32_0 : i32, i32
  }
  func.func @transform_3(%arg0: i32) -> (i32, i32, i32) {
    %c0_i32 = arith.constant 0 : i32
    %c0_i32_0 = arith.constant 0 : i32
    %c0_i32_1 = arith.constant 0 : i32
    return %arg0, %c0_i32, %c0_i32_0 : i32, i32, i32
  }
}

module attributes {stable_mosaic.version = 11 : i64} {
  func.func @_mm_bias_ds_res_kernel(%arg0: i32, %arg1: memref<256x128xbf16, #tpu.memory_space<vmem>>, %arg2: memref<128x128xbf16, #tpu.memory_space<vmem>>, %arg3: memref<256x4xbf16, #tpu.memory_space<vmem>>, %arg4: memref<4x128xbf16, #tpu.memory_space<vmem>>, %arg5: memref<1x128xf32, #tpu.memory_space<vmem>>, %arg6: memref<256x128xbf16, #tpu.memory_space<vmem>>) attributes {dimension_semantics = [#tpu.dimension_semantics<parallel>], iteration_bounds = array<i64: 2>, scalar_prefetch = 0 : i64, scratch_operands = 0 : i64, tpu.core_type = #tpu.core_type<tc>, window_params = [{transform_indices = @transform_0, window_bounds = array<i64: 256, 128>}, {pipeline_mode = #tpu.pipeline_mode<synchronous>, transform_indices = @transform_1, window_bounds = array<i64: 128, 128>}, {transform_indices = @transform_2, window_bounds = array<i64: 256, 4>}, {pipeline_mode = #tpu.pipeline_mode<synchronous>, transform_indices = @transform_3, window_bounds = array<i64: 4, 128>}, {pipeline_mode = #tpu.pipeline_mode<synchronous>, transform_indices = @transform_4, window_bounds = array<i64: 1, 128>}, {transform_indices = @transform_5, window_bounds = array<i64: 256, 128>}]} {
    %c0 = arith.constant 0 : index
    %c0_0 = arith.constant 0 : index
    %0 = vector.load %arg1[%c0, %c0_0] : memref<256x128xbf16, #tpu.memory_space<vmem>>, vector<256x128xbf16>
    %c0_1 = arith.constant 0 : index
    %c0_2 = arith.constant 0 : index
    %1 = vector.load %arg2[%c0_1, %c0_2] : memref<128x128xbf16, #tpu.memory_space<vmem>>, vector<128x128xbf16>
    %cst = arith.constant dense<0.000000e+00> : vector<256x128xf32>
    %2 = tpu.matmul %0, %1, %cst {dimension_numbers = #tpu.dot_dimension_numbers<[1], [0], [0], [1], [0, 0, 1, 1], [], []>} : vector<256x128xbf16>, vector<128x128xbf16>, vector<256x128xf32> -> vector<256x128xf32>
    %c0_3 = arith.constant 0 : index
    %c0_4 = arith.constant 0 : index
    %3 = vector.load %arg3[%c0_3, %c0_4] : memref<256x4xbf16, #tpu.memory_space<vmem>>, vector<256x4xbf16>
    %c0_5 = arith.constant 0 : index
    %c0_6 = arith.constant 0 : index
    %4 = vector.load %arg4[%c0_5, %c0_6] : memref<4x128xbf16, #tpu.memory_space<vmem>>, vector<4x128xbf16>
    %cst_7 = arith.constant dense<0.000000e+00> : vector<256x128xf32>
    %5 = tpu.matmul %3, %4, %cst_7 {dimension_numbers = #tpu.dot_dimension_numbers<[1], [0], [0], [1], [0, 0, 1, 1], [], []>} : vector<256x4xbf16>, vector<4x128xbf16>, vector<256x128xf32> -> vector<256x128xf32>
    %6 = arith.addf %2, %5 : vector<256x128xf32>
    %c0_8 = arith.constant 0 : index
    %c0_9 = arith.constant 0 : index
    %7 = vector.load %arg5[%c0_8, %c0_9] : memref<1x128xf32, #tpu.memory_space<vmem>>, vector<1x128xf32>
    %8 = vector.broadcast %7 : vector<1x128xf32> to vector<256x128xf32>
    %9 = arith.addf %6, %8 : vector<256x128xf32>
    %cst_10 = arith.constant 0.000000e+00 : f32
    %10 = vector.broadcast %cst_10 : f32 to vector<256x128xf32>
    %11 = arith.maximumf %9, %10 : vector<256x128xf32>
    %12 = arith.truncf %11 : vector<256x128xf32> to vector<256x128xbf16>
    %c0_11 = arith.constant 0 : index
    %c0_12 = arith.constant 0 : index
    %13 = vector.load %arg6[%c0_11, %c0_12] : memref<256x128xbf16, #tpu.memory_space<vmem>>, vector<256x128xbf16>
    tpu.vector_store %arg6[%c0_11, %c0_12], %12 {strides = array<i32>} : memref<256x128xbf16, #tpu.memory_space<vmem>>, vector<256x128xbf16>,
    return
  }
  func.func @transform_0(%arg0: i32) -> (i32, i32) {
    %c0_i32 = arith.constant 0 : i32
    %c0_i32_0 = arith.constant 0 : i32
    return %arg0, %c0_i32 : i32, i32
  }
  func.func @transform_1(%arg0: i32) -> (i32, i32) {
    %c0_i32 = arith.constant 0 : i32
    %c0_i32_0 = arith.constant 0 : i32
    %c0_i32_1 = arith.constant 0 : i32
    return %c0_i32, %c0_i32_0 : i32, i32
  }
  func.func @transform_2(%arg0: i32) -> (i32, i32) {
    %c0_i32 = arith.constant 0 : i32
    %c0_i32_0 = arith.constant 0 : i32
    return %arg0, %c0_i32 : i32, i32
  }
  func.func @transform_3(%arg0: i32) -> (i32, i32) {
    %c0_i32 = arith.constant 0 : i32
    %c0_i32_0 = arith.constant 0 : i32
    %c0_i32_1 = arith.constant 0 : i32
    return %c0_i32, %c0_i32_0 : i32, i32
  }
  func.func @transform_4(%arg0: i32) -> (i32, i32) {
    %c0_i32 = arith.constant 0 : i32
    %c0_i32_0 = arith.constant 0 : i32
    %c0_i32_1 = arith.constant 0 : i32
    return %c0_i32, %c0_i32_0 : i32, i32
  }
  func.func @transform_5(%arg0: i32) -> (i32, i32) {
    %c0_i32 = arith.constant 0 : i32
    %c0_i32_0 = arith.constant 0 : i32
    return %arg0, %c0_i32 : i32, i32
  }
}

</mosaic_0001>

<bundles_post_ra>
// kernel: bottleneck_deep_forward.3
= control target key start
LH: loop header
LB: loop body
LE: loop exit
PB: predicated region body
PF: predicated region fallthrough
CT: control target
= control target key end

     0   :  { %s1067_s12 = smov 0   ;;  %s1183_s0 = inlined_call_operand.vmem [shape: bf16[512,4], index: 0, kind: input, shape index: {}]   ;;  %s1184_s1 = inlined_call_operand.vmem [shape: bf16[4,128], index: 1, kind: input, shape index: {}]   ;;  %s1185_s2 = inlined_call_operand.vmem [shape: f32[1,128], index: 2, kind: input, shape index: {}]   ;;  %s1186_s3 = inlined_call_operand.vmem [shape: bf16[512,128], index: 3, kind: output, shape index: {}]  }
   0x1 LB: > { %s757_s13 = sadd.s32 4294967295, %s1045_s12   ;;  %p761_p0 = scmp.ge.s32.totalorder %s1045_s12, 1  ;;  %s1045_s12 = sphi %s1067_s12, %s13_s12  }
   0x2   : > { %p138_p1 = scmp.lt.s32.totalorder %s1045_s12, 3 }
   0x4   : > { %p139_p2 = pnand %p761_p0, %p138_p1 }
   0x5   : > { %s762_s16 = sshll.u32 (!%p139_p2), %s757_s13, 5 }
   0x6   : > { %142 = sbr.rel (%p139_p2) target bundleno = 247 (0xf7), region = 32  ;;  %p163_p3 = scmp.lt.s32.totalorder (!%p139_p2), %s762_s16, 63 }
   0xb   : > { %v207_v0 = vld [vmem:[%s1184_s1] sm:$0x3]  ;;  %vm344_vm0 = vcmask 1041408   ;;  %s1188_s16 = smov (!%p163_p3, %s762_s16), 63  ;;  %vm295_vm1 = vcmask 31744  }
   0xc   : > { %1013 = vmatprep.subr.msk.bf16.mxu0 %vm344_vm0, %v207_v0  ;;  %1014 = vmatprep.subr.msk.bf16.mxu1 %vm344_vm0, %v207_v0  ;;  %v346_v1 = vsel %vm344_vm0, %v207_v0, 0  ;;  %s763_s17 = sshll.u32 %s1188_s16, 2  ;;  %v1123_v19 = vld [vmem:[%s1185_s2] ss:$0 sm:$0xff] }
   0xd   : > { %978 = vmatpush3.bf16.msra.mxu0 %v346_v1  ;;  %1012 = vmatpush3.bf16.msra.mxu1 %v346_v1  ;;  %s1086_s20 = scalar_lea.vmem %s1183_s0, %s763_s17  ;;  %s1137_s25 = scalar_lea.vmem %s1186_s3, %s763_s17 }
   0xe   : > { %v1023_v2 = vld [vmem:[%s1086_s20] sm:$0xff]   ;;  %v1025_v4 = vld [vmem:[%s1086_s20 + $0x8] sm:$0xff]   ;;  %v1027_v6 = vld [vmem:[%s1086_s20 + $0x10] sm:$0xff]  }
   0xf   : > { %v1024_v3 = vld [vmem:[%s1086_s20 + $0x40] sm:$0xff]   ;;  %979 = vmatprep.mubr.msk.bf16.mxu0 %vm295_vm1, %v1023_v2  ;;  %v1026_v5 = vld [vmem:[%s1086_s20 + $0x48] sm:$0xff]   ;;  %v1028_v7 = vld [vmem:[%s1086_s20 + $0x50] sm:$0xff]  }
  0x10   : > { %995 = vmatprep.mubr.msk.bf16.mxu1 %vm295_vm1, %v1024_v3  ;;  %980 = vmatmul.mubr.msk.bf16.vlgmr.msra.gmra.mxu0 %vm295_vm1, %v1025_v4  ;;  %v1029_v8 = vld [vmem:[%s1086_s20 + $0x18] sm:$0xff]   ;;  %v1031_v10 = vld [vmem:[%s1086_s20 + $0x20] sm:$0xff]   ;;  %v1033_v12 = vld [vmem:[%s1086_s20 + $0x28] sm:$0xff]  }
  0x11   : > { %996 = vmatmul.mubr.msk.bf16.vlgmr.msra.gmra.mxu1 %vm295_vm1, %v1026_v5  ;;  %983 = vmatprep.mubr.msk.bf16.mxu0 %vm295_vm1, %v1027_v6  ;;  %v1030_v9 = vld [vmem:[%s1086_s20 + $0x58] sm:$0xff]   ;;  %v1032_v11 = vld [vmem:[%s1086_s20 + $0x60] sm:$0xff]   ;;  %v1034_v13 = vld [vmem:[%s1086_s20 + $0x68] sm:$0xff]  }
  0x12   : > { %999 = vmatprep.mubr.msk.bf16.mxu1 %vm295_vm1, %v1028_v7  ;;  %v1035_v14 = vld [vmem:[%s1086_s20 + $0x30] sm:$0xff]   ;;  %v1037_v16 = vld [vmem:[%s1086_s20 + $0x38] sm:$0xff]  }
  0x13   : > { %v1036_v15 = vld [vmem:[%s1086_s20 + $0x70] sm:$0xff]   ;;  %v1038_v17 = vld [vmem:[%s1086_s20 + $0x78] sm:$0xff]  }
  0x18   : > { %984 = vmatmul.mubr.msk.bf16.gmra.mxu0 %vm295_vm1, %v1029_v8 }
  0x19   : > { %1000 = vmatmul.mubr.msk.bf16.gmra.mxu1 %vm295_vm1, %v1030_v9  ;;  %987 = vmatprep.mubr.msk.bf16.mxu0 %vm295_vm1, %v1031_v10 }
  0x1a   : > { %1003 = vmatprep.mubr.msk.bf16.mxu1 %vm295_vm1, %v1032_v11 }
  0x20   : > { %988 = vmatmul.mubr.msk.bf16.gmra.mxu0 %vm295_vm1, %v1033_v12 }
  0x21   : > { %1004 = vmatmul.mubr.msk.bf16.gmra.mxu1 %vm295_vm1, %v1034_v13  ;;  %991 = vmatprep.mubr.msk.bf16.mxu0 %vm295_vm1, %v1035_v14 }
  0x22   : > { %1007 = vmatprep.mubr.msk.bf16.mxu1 %vm295_vm1, %v1036_v15 }
  0x28   : > { %992 = vmatmul.mubr.msk.bf16.gmra.mxu0 %vm295_vm1, %v1037_v16 }
  0x29   : > { %1008 = vmatmul.mubr.msk.bf16.gmra.mxu1 %vm295_vm1, %v1038_v17 }
  0xd0   : > { %v981_v18 = vpop.f32.mrf.mxu0 }
  0xd1   : > { %v997_v20 = vpop.f32.mrf.mxu1  ;;  %v391_v22 = vadd.f32 %v981_v18, %v1123_v19 }
  0xd2   : > { %v382_v21 = vpop.f32.mrf.mxu0  ;;  %v455_v24 = vadd.f32 %v997_v20, %v1123_v19 }
  0xd3   : > { %v446_v23 = vpop.f32.mrf.mxu1  ;;  %v383_v26 = vadd.f32 %v1123_v19, %v382_v21  ;;  %v511_v32 = vmax.f32 %v391_v22, 0.0 }
  0xd4   : > { %v982_v25 = vpop.f32.mrf.mxu0  ;;  %v447_v29 = vadd.f32 %v1123_v19, %v446_v23  ;;  %v527_v36 = vmax.f32 %v455_v24, 0.0 }
  0xd5   : > { %v394_v27 = vadd.f32 %v982_v25, %v1123_v19  ;;  %v998_v28 = vpop.f32.mrf.mxu1  ;;  %v509_v40 = vmax.f32 %v383_v26, 0.0 }
  0xd6   : > { %v458_v30 = vadd.f32 %v998_v28, %v1123_v19  ;;  %v385_v31 = vpop.f32.mrf.mxu0  ;;  %v525_v44 = vmax.f32 %v447_v29, 0.0 }
  0xd7   : > { %v512_v33 = vmax.f32 %v394_v27, 0.0  ;;  %v386_v34 = vadd.f32 %v1123_v19, %v385_v31  ;;  %v449_v35 = vpop.f32.mrf.mxu1 }
  0xd8   : > { %v528_v37 = vmax.f32 %v458_v30, 0.0  ;;  %v450_v38 = vadd.f32 %v1123_v19, %v449_v35  ;;  %v985_v39 = vpop.f32.mrf.mxu0 }
  0xd9   : > { %v873_v41 = vpack.c.bf16 %v512_v33, %v511_v32  ;;  %v510_v42 = vmax.f32 %v386_v34, 0.0  ;;  %v1001_v43 = vpop.f32.mrf.mxu1  ;;  %v407_v49 = vadd.f32 %v985_v39, %v1123_v19 }
  0xda   : > { %v913_v45 = vpack.c.bf16 %v528_v37, %v527_v36  ;;  %v526_v46 = vmax.f32 %v450_v38, 0.0  ;;  %v398_v47 = vpop.f32.mrf.mxu0  ;;  %v471_v52 = vadd.f32 %v1001_v43, %v1123_v19 }
  0xdb   : > { %945 = vst [vmem:[%s1137_s25 + $0x8] sm:$0xff] %v873_v41   ;;  %v868_v48 = vpack.c.bf16 %v510_v42, %v509_v40  ;;  %v462_v50 = vpop.f32.mrf.mxu1  ;;  %v399_v54 = vadd.f32 %v1123_v19, %v398_v47  ;;  %v515_v60 = vmax.f32 %v407_v49, 0.0 }
  0xdc   : > { %953 = vst [vmem:[%s1137_s25 + $0x48] sm:$0xff] %v913_v45   ;;  %v908_v51 = vpack.c.bf16 %v526_v46, %v525_v44  ;;  %v986_v53 = vpop.f32.mrf.mxu0  ;;  %v463_v57 = vadd.f32 %v1123_v19, %v462_v50  ;;  %v531_v0 = vmax.f32 %v471_v52, 0.0 }
  0xdd   : > { %869 = vst [vmem:[%s1137_s25] sm:$0xff] %v868_v48   ;;  %v410_v55 = vadd.f32 %v986_v53, %v1123_v19  ;;  %v1002_v56 = vpop.f32.mrf.mxu1  ;;  %v513_v4 = vmax.f32 %v399_v54, 0.0 }
  0xde   : > { %952 = vst [vmem:[%s1137_s25 + $0x40] sm:$0xff] %v908_v51   ;;  %v474_v58 = vadd.f32 %v1002_v56, %v1123_v19  ;;  %v401_v59 = vpop.f32.mrf.mxu0  ;;  %v529_v8 = vmax.f32 %v463_v57, 0.0 }
  0xdf   : > { %v516_v61 = vmax.f32 %v410_v55, 0.0  ;;  %v402_v62 = vadd.f32 %v1123_v19, %v401_v59  ;;  %v465_v63 = vpop.f32.mrf.mxu1 }
  0xe0   : > { %v532_v1 = vmax.f32 %v474_v58, 0.0  ;;  %v466_v2 = vadd.f32 %v1123_v19, %v465_v63  ;;  %v989_v3 = vpop.f32.mrf.mxu0 }
  0xe1   : > { %v883_v5 = vpack.c.bf16 %v516_v61, %v515_v60  ;;  %v514_v6 = vmax.f32 %v402_v62, 0.0  ;;  %v1005_v7 = vpop.f32.mrf.mxu1  ;;  %v423_v13 = vadd.f32 %v989_v3, %v1123_v19 }
  0xe2   : > { %v923_v9 = vpack.c.bf16 %v532_v1, %v531_v0  ;;  %v530_v10 = vmax.f32 %v466_v2, 0.0  ;;  %v414_v11 = vpop.f32.mrf.mxu0  ;;  %v487_v16 = vadd.f32 %v1005_v7, %v1123_v19 }
  0xe3   : > { %947 = vst [vmem:[%s1137_s25 + $0x18] sm:$0xff] %v883_v5   ;;  %v878_v12 = vpack.c.bf16 %v514_v6, %v513_v4  ;;  %v478_v14 = vpop.f32.mrf.mxu1  ;;  %v415_v18 = vadd.f32 %v1123_v19, %v414_v11  ;;  %v519_v25 = vmax.f32 %v423_v13, 0.0 }
  0xe4   : > { %955 = vst [vmem:[%s1137_s25 + $0x58] sm:$0xff] %v923_v9   ;;  %v918_v15 = vpack.c.bf16 %v530_v10, %v529_v8  ;;  %v990_v17 = vpop.f32.mrf.mxu0  ;;  %v479_v22 = vadd.f32 %v1123_v19, %v478_v14  ;;  %v535_v29 = vmax.f32 %v487_v16, 0.0 }
  0xe5   : > { %946 = vst [vmem:[%s1137_s25 + $0x10] sm:$0xff] %v878_v12   ;;  %v426_v20 = vadd.f32 %v990_v17, %v1123_v19  ;;  %v1006_v21 = vpop.f32.mrf.mxu1  ;;  %v517_v33 = vmax.f32 %v415_v18, 0.0 }
  0xe6   : > { %954 = vst [vmem:[%s1137_s25 + $0x50] sm:$0xff] %v918_v15   ;;  %v490_v23 = vadd.f32 %v1006_v21, %v1123_v19  ;;  %v417_v24 = vpop.f32.mrf.mxu0  ;;  %v533_v37 = vmax.f32 %v479_v22, 0.0 }
  0xe7   : > { %v520_v26 = vmax.f32 %v426_v20, 0.0  ;;  %v418_v27 = vadd.f32 %v1123_v19, %v417_v24  ;;  %v481_v28 = vpop.f32.mrf.mxu1 }
  0xe8   : > { %v536_v30 = vmax.f32 %v490_v23, 0.0  ;;  %v482_v31 = vadd.f32 %v1123_v19, %v481_v28  ;;  %v993_v32 = vpop.f32.mrf.mxu0 }
  0xe9   : > { %v893_v34 = vpack.c.bf16 %v520_v26, %v519_v25  ;;  %v518_v35 = vmax.f32 %v418_v27, 0.0  ;;  %v1009_v36 = vpop.f32.mrf.mxu1  ;;  %v439_v42 = vadd.f32 %v993_v32, %v1123_v19 }
  0xea   : > { %v933_v38 = vpack.c.bf16 %v536_v30, %v535_v29  ;;  %v534_v39 = vmax.f32 %v482_v31, 0.0  ;;  %v430_v40 = vpop.f32.mrf.mxu0  ;;  %v503_v45 = vadd.f32 %v1009_v36, %v1123_v19 }
  0xeb   : > { %949 = vst [vmem:[%s1137_s25 + $0x28] sm:$0xff] %v893_v34   ;;  %v888_v41 = vpack.c.bf16 %v518_v35, %v517_v33  ;;  %v494_v43 = vpop.f32.mrf.mxu1  ;;  %v431_v47 = vadd.f32 %v1123_v19, %v430_v40  ;;  %v523_v53 = vmax.f32 %v439_v42, 0.0 }
  0xec   : > { %957 = vst [vmem:[%s1137_s25 + $0x68] sm:$0xff] %v933_v38   ;;  %v928_v44 = vpack.c.bf16 %v534_v39, %v533_v37  ;;  %v994_v46 = vpop.f32.mrf.mxu0  ;;  %v495_v50 = vadd.f32 %v1123_v19, %v494_v43  ;;  %v539_v57 = vmax.f32 %v503_v45, 0.0 }
  0xed   : > { %948 = vst [vmem:[%s1137_s25 + $0x20] sm:$0xff] %v888_v41   ;;  %v442_v48 = vadd.f32 %v994_v46, %v1123_v19  ;;  %v1010_v49 = vpop.f32.mrf.mxu1  ;;  %v521_v60 = vmax.f32 %v431_v47, 0.0 }
  0xee   : > { %956 = vst [vmem:[%s1137_s25 + $0x60] sm:$0xff] %v928_v44   ;;  %v506_v51 = vadd.f32 %v1010_v49, %v1123_v19  ;;  %v433_v52 = vpop.f32.mrf.mxu0  ;;  %v537_v63 = vmax.f32 %v495_v50, 0.0 }
  0xef   : > { %v524_v54 = vmax.f32 %v442_v48, 0.0  ;;  %v434_v55 = vadd.f32 %v1123_v19, %v433_v52  ;;  %v497_v56 = vpop.f32.mrf.mxu1 }
  0xf0   : > { %v540_v58 = vmax.f32 %v506_v51, 0.0  ;;  %v498_v59 = vadd.f32 %v1123_v19, %v497_v56 }
  0xf1   : > { %v903_v61 = vpack.c.bf16 %v524_v54, %v523_v53  ;;  %v522_v62 = vmax.f32 %v434_v55, 0.0 }
  0xf2   : > { %v943_v0 = vpack.c.bf16 %v540_v58, %v539_v57  ;;  %v538_v1 = vmax.f32 %v498_v59, 0.0 }
  0xf3   : > { %951 = vst [vmem:[%s1137_s25 + $0x38] sm:$0xff] %v903_v61   ;;  %v898_v2 = vpack.c.bf16 %v522_v62, %v521_v60 }
  0xf4   : > { %959 = vst [vmem:[%s1137_s25 + $0x78] sm:$0xff] %v943_v0   ;;  %v938_v3 = vpack.c.bf16 %v538_v1, %v537_v63 }
  0xf5   : > { %950 = vst [vmem:[%s1137_s25 + $0x30] sm:$0xff] %v898_v2  }
  0xf6   : > { %958 = vst [vmem:[%s1137_s25 + $0x70] sm:$0xff] %v938_v3  }
  0xf7 PF: > { %s13_s12 = sadd.s32 1, %s1045_s12  }
  0xf8   : > { %p10_p4 = scmp.ge.s32.totalorder %s13_s12, 4  }
  0xfa   :  { %12 = sbr.rel (!%p10_p4) target bundleno = 1 (0x1), region = 62 }

// kernel: bottleneck_deep_forward.5
= control target key start
LH: loop header
LB: loop body
LE: loop exit
PB: predicated region body
PF: predicated region fallthrough
CT: control target
= control target key end

     0   :  { %s1685_s18 = smov 0   ;;  %s1856_s0 = inlined_call_operand.vmem [shape: bf16[512,128], index: 0, kind: input, shape index: {}]   ;;  %s1857_s1 = inlined_call_operand.vmem [shape: bf16[128,128], index: 1, kind: input, shape index: {}]   ;;  %s1858_s2 = inlined_call_operand.vmem [shape: bf16[512,4], index: 2, kind: input, shape index: {}]   ;;  %s1859_s3 = inlined_call_operand.vmem [shape: bf16[4,128], index: 3, kind: input, shape index: {}]   ;;  %s1860_s4 = inlined_call_operand.vmem [shape: f32[1,128], index: 4, kind: input, shape index: {}]   ;;  %s1861_s5 = inlined_call_operand.vmem [shape: bf16[512,128], index: 5, kind: output, shape index: {}]  }
   0x1 LB: > { %s1230_s19 = sadd.s32 4294967295, %s1653_s18   ;;  %p1234_p0 = scmp.ge.s32.totalorder %s1653_s18, 1  ;;  %s1653_s18 = sphi %s1685_s18, %s15_s18  }
   0x2   : > { %p199_p1 = scmp.lt.s32.totalorder %s1653_s18, 3 }
   0x4   : > { %p200_p2 = pnand %p1234_p0, %p199_p1 }
   0x5   : > { %s1235_s26 = sshll.u32 (!%p200_p2), %s1230_s19, 5 }
   0x6   : > { %203 = sbr.rel (%p200_p2) target bundleno = 300 (0x12c), region = 40  ;;  %p233_p3 = scmp.lt.s32.totalorder (!%p200_p2), %s1235_s26, 63 }
   0xb   : > { %v1607_v0 = vld [vmem:[%s1857_s1 + $0x38] sm:$0xff]   ;;  %vm461_vm0 = vcmask 1041408   ;;  %v331_v1 = vld [vmem:[%s1859_s3] sm:$0x3]  ;;  %v1608_v2 = vld [vmem:[%s1857_s1 + $0x30] sm:$0xff]   ;;  %s1863_s26 = smov (!%p233_p3, %s1235_s26), 63 }
   0xc   : > { %1582 = vmatprep.subr.bf16.mxu1 %v1607_v0  ;;  %1598 = vmatprep.subr.msk.bf16.mxu0 %vm461_vm0, %v331_v1  ;;  %v463_v3 = vsel %vm461_vm0, %v331_v1, 0  ;;  %v1611_v4 = vld [vmem:[%s1857_s1 + $0x28] sm:$0xff]   ;;  %s1705_s29 = sshll.u32 %s1863_s26, 2  ;;  %vm412_vm1 = vcmask 31744   ;;  %v1612_v5 = vld [vmem:[%s1857_s1 + $0x20] sm:$0xff]   ;;  %v1615_v9 = vld [vmem:[%s1857_s1 + $0x18] sm:$0xff]  }
   0xd   : > { %1590 = vmatpush3.bf16.msra.mxu1 %v1607_v0  ;;  %1501 = vmatpush3.bf16.msra.mxu0 %v463_v3  ;;  %s1711_s7 = scalar_lea.vmem %s1858_s2, %s1705_s29  ;;  %s1729_s14 = scalar_lea.vmem %s1856_s0, %s1705_s29  ;;  %v1616_v10 = vld [vmem:[%s1857_s1 + $0x10] sm:$0xff]   ;;  %v1619_v14 = vld [vmem:[%s1857_s1 + $0x8] sm:$0xff]   ;;  %v1620_v15 = vld [vmem:[%s1857_s1] sm:$0xff]  }
   0xe   : > { %1583 = vmatprep.subr.bf16.mxu1 %v1608_v2  ;;  %1534 = vmatprep.subr.bf16.mxu0 %v1607_v0  ;;  %v1609_v6 = vld [vmem:[%s1711_s7] sm:$0xff]   ;;  %v1610_v7 = vld [vmem:[%s1711_s7 + $0x8] sm:$0xff]   ;;  %v1613_v8 = vld [vmem:[%s1711_s7 + $0x10] sm:$0xff]   ;;  %s1803_s26 = scalar_lea.vmem %s1861_s5, %s1705_s29 }
   0xf   : > { %1502 = vmatprep.mubr.msk.bf16.mxu0 %vm412_vm1, %v1609_v6  ;;  %v1614_v11 = vld [vmem:[%s1711_s7 + $0x18] sm:$0xff]   ;;  %v1622_v12 = vld [vmem:[%s1729_s14 + $0x10] sm:$0xff]   ;;  %v1617_v13 = vld [vmem:[%s1711_s7 + $0x20] sm:$0xff]  }
  0x10   : > { %1503 = vmatmul.mubr.msk.bf16.vlgmr.msra.gmra.mxu0 %vm412_vm1, %v1610_v7  ;;  %1554 = vmatprep.mubr.bf16.mxu1 %v1622_v12  ;;  %v1618_v16 = vld [vmem:[%s1711_s7 + $0x28] sm:$0xff]   ;;  %v1621_v17 = vld [vmem:[%s1711_s7 + $0x30] sm:$0xff]   ;;  %v1624_v18 = vld [vmem:[%s1729_s14 + $0x18] sm:$0xff]  }
  0x11   : > { %1591 = vmatpush3.bf16.msra.mxu1 %v1608_v2  ;;  %1506 = vmatprep.mubr.msk.bf16.mxu0 %vm412_vm1, %v1613_v8  ;;  %v1626_v19 = vld [vmem:[%s1729_s14 + $0x20] sm:$0xff]   ;;  %v1623_v20 = vld [vmem:[%s1711_s7 + $0x38] sm:$0xff]   ;;  %v1628_v22 = vld [vmem:[%s1729_s14 + $0x28] sm:$0xff]  }
  0x12   : > { %1584 = vmatprep.subr.bf16.mxu1 %v1611_v4  ;;  %1535 = vmatpush3.bf16.msra.mxu0 %v1607_v0  ;;  %v1625_v21 = vld [vmem:[%s1711_s7 + $0x40] sm:$0xff]   ;;  %v1630_v23 = vld [vmem:[%s1729_s14 + $0x30] sm:$0xff]   ;;  %v1627_v24 = vld [vmem:[%s1711_s7 + $0x48] sm:$0xff]  }
  0x13   : > { %1536 = vmatprep.subr.bf16.mxu0 %v1608_v2  ;;  %v1629_v25 = vld [vmem:[%s1711_s7 + $0x50] sm:$0xff]   ;;  %v1632_v26 = vld [vmem:[%s1729_s14 + $0x38] sm:$0xff]   ;;  %v1634_v27 = vld [vmem:[%s1729_s14 + $0x40] sm:$0xff]  }
  0x14   : > { %v1631_v28 = vld [vmem:[%s1711_s7 + $0x58] sm:$0xff]   ;;  %v1633_v29 = vld [vmem:[%s1711_s7 + $0x60] sm:$0xff]   ;;  %v1636_v30 = vld [vmem:[%s1729_s14 + $0x48] sm:$0xff]  }
  0x15   : > { %1592 = vmatpush3.bf16.msra.mxu1 %v1611_v4  ;;  %v1638_v31 = vld [vmem:[%s1729_s14 + $0x50] sm:$0xff]   ;;  %v1635_v32 = vld [vmem:[%s1711_s7 + $0x68] sm:$0xff]   ;;  %v1640_v34 = vld [vmem:[%s1729_s14 + $0x58] sm:$0xff]  }
  0x16   : > { %1585 = vmatprep.subr.bf16.mxu1 %v1612_v5  ;;  %1537 = vmatpush3.bf16.msra.mxu0 %v1608_v2  ;;  %v1637_v33 = vld [vmem:[%s1711_s7 + $0x70] sm:$0xff]   ;;  %v1642_v35 = vld [vmem:[%s1729_s14 + $0x60] sm:$0xff]   ;;  %v1639_v36 = vld [vmem:[%s1711_s7 + $0x78] sm:$0xff]  }
  0x17   : > { %1538 = vmatprep.subr.bf16.mxu0 %v1611_v4  ;;  %v1641_v37 = vld [vmem:[%s1729_s14] sm:$0xff]   ;;  %v1644_v38 = vld [vmem:[%s1729_s14 + $0x68] sm:$0xff]   ;;  %v1645_v39 = vld [vmem:[%s1729_s14 + $0x70] sm:$0xff]  }
  0x18   : > { %1507 = vmatmul.mubr.msk.bf16.gmra.mxu0 %vm412_vm1, %v1614_v11  ;;  %v1643_v40 = vld [vmem:[%s1729_s14 + $0x8] sm:$0xff]   ;;  %v1646_v41 = vld [vmem:[%s1729_s14 + $0x78] sm:$0xff]   ;;  %v1793_v57 = vld [vmem:[%s1860_s4] ss:$0 sm:$0xff] }
  0x19   : > { %1593 = vmatpush3.bf16.msra.mxu1 %v1612_v5  ;;  %1510 = vmatprep.mubr.msk.bf16.mxu0 %vm412_vm1, %v1617_v13 }
  0x1a   : > { %1586 = vmatprep.subr.bf16.mxu1 %v1615_v9  ;;  %1539 = vmatpush3.bf16.msra.mxu0 %v1611_v4 }
  0x1b   : > { %1540 = vmatprep.subr.bf16.mxu0 %v1612_v5 }
  0x1d   : > { %1594 = vmatpush3.bf16.msra.mxu1 %v1615_v9 }
  0x1e   : > { %1587 = vmatprep.subr.bf16.mxu1 %v1616_v10  ;;  %1541 = vmatpush3.bf16.msra.mxu0 %v1612_v5 }
  0x1f   : > { %1542 = vmatprep.subr.bf16.mxu0 %v1615_v9 }
  0x20   : > { %1511 = vmatmul.mubr.msk.bf16.gmra.mxu0 %vm412_vm1, %v1618_v16 }
  0x21   : > { %1595 = vmatpush3.bf16.msra.mxu1 %v1616_v10  ;;  %1514 = vmatprep.mubr.msk.bf16.mxu0 %vm412_vm1, %v1621_v17 }
  0x22   : > { %1588 = vmatprep.subr.bf16.mxu1 %v1619_v14  ;;  %1543 = vmatpush3.bf16.msra.mxu0 %v1615_v9 }
  0x23   : > { %1544 = vmatprep.subr.bf16.mxu0 %v1616_v10 }
  0x25   : > { %1596 = vmatpush3.bf16.msra.mxu1 %v1619_v14 }
  0x26   : > { %1589 = vmatprep.subr.bf16.mxu1 %v1620_v15  ;;  %1545 = vmatpush3.bf16.msra.mxu0 %v1616_v10 }
  0x27   : > { %1546 = vmatprep.subr.bf16.mxu0 %v1619_v14 }
  0x28   : > { %1515 = vmatmul.mubr.msk.bf16.gmra.mxu0 %vm412_vm1, %v1623_v20 }
  0x29   : > { %1597 = vmatpush3.bf16.msra.mxu1 %v1620_v15  ;;  %1518 = vmatprep.mubr.msk.bf16.mxu0 %vm412_vm1, %v1625_v21 }
  0x2a   : > { %1547 = vmatpush3.bf16.msra.mxu0 %v1619_v14 }
  0x2b   : > { %1548 = vmatprep.subr.bf16.mxu0 %v1620_v15 }
  0x2c   : > { %1555 = vmatmul.mubr.bf16.vlgmr.msra.gmra.mxu1 %v1624_v18 }
  0x2d   : > { %1558 = vmatprep.mubr.bf16.mxu1 %v1626_v19 }
  0x2e   : > { %1549 = vmatpush3.bf16.msra.mxu0 %v1620_v15 }
  0x30   : > { %1519 = vmatmul.mubr.msk.bf16.gmra.mxu0 %vm412_vm1, %v1627_v24 }
  0x31   : > { %1522 = vmatprep.mubr.msk.bf16.mxu0 %vm412_vm1, %v1629_v25 }
  0x34   : > { %1559 = vmatmul.mubr.bf16.gmra.mxu1 %v1628_v22 }
  0x35   : > { %1562 = vmatprep.mubr.bf16.mxu1 %v1630_v23 }
  0x38   : > { %1523 = vmatmul.mubr.msk.bf16.gmra.mxu0 %vm412_vm1, %v1631_v28 }
  0x39   : > { %1526 = vmatprep.mubr.msk.bf16.mxu0 %vm412_vm1, %v1633_v29 }
  0x3c   : > { %1563 = vmatmul.mubr.bf16.gmra.mxu1 %v1632_v26 }
  0x3d   : > { %1566 = vmatprep.mubr.bf16.mxu1 %v1634_v27 }
  0x40   : > { %1527 = vmatmul.mubr.msk.bf16.gmra.mxu0 %vm412_vm1, %v1635_v32 }
  0x41   : > { %1530 = vmatprep.mubr.msk.bf16.mxu0 %vm412_vm1, %v1637_v33 }
  0x44   : > { %1567 = vmatmul.mubr.bf16.gmra.mxu1 %v1636_v30 }
  0x45   : > { %1570 = vmatprep.mubr.bf16.mxu1 %v1638_v31 }
  0x48   : > { %1531 = vmatmul.mubr.msk.bf16.gmra.mxu0 %vm412_vm1, %v1639_v36 }
  0x49   : > { %1550 = vmatprep.mubr.bf16.mxu0 %v1641_v37 }
  0x4c   : > { %1571 = vmatmul.mubr.bf16.gmra.mxu1 %v1640_v34 }
  0x4d   : > { %1574 = vmatprep.mubr.bf16.mxu1 %v1642_v35 }
  0x50   : > { %1551 = vmatmul.mubr.bf16.vlgmr.msra.gmra.mxu0 %v1643_v40 }
  0x54   : > { %1575 = vmatmul.mubr.bf16.gmra.mxu1 %v1644_v38 }
  0x55   : > { %1578 = vmatprep.mubr.bf16.mxu1 %v1645_v39 }
  0x5c   : > { %1579 = vmatmul.mubr.bf16.gmra.mxu1 %v1646_v41 }
  0xd0   : > { %v1782_v42 = vpop.f32.mrf.mxu0 }
  0xd2   : > { %v1784_v43 = vpop.f32.mrf.mxu0 }
  0xd4   : > { %v1786_v44 = vpop.f32.mrf.mxu0 }
  0xd6   : > { %v1788_v45 = vpop.f32.mrf.mxu0 }
  0xd8   : > { %v1508_v46 = vpop.f32.mrf.mxu0 }
  0xda   : > { %v515_v47 = vpop.f32.mrf.mxu0 }
  0xdc   : > { %v1509_v48 = vpop.f32.mrf.mxu0 }
  0xde   : > { %v518_v49 = vpop.f32.mrf.mxu0 }
  0xe0   : > { %v1512_v50 = vpop.f32.mrf.mxu0 }
  0xe2   : > { %v531_v51 = vpop.f32.mrf.mxu0 }
  0xe4   : > { %v1513_v52 = vpop.f32.mrf.mxu0 }
  0xe6   : > { %v534_v53 = vpop.f32.mrf.mxu0 }
  0xe8   : > { %v1516_v56 = vpop.f32.mrf.mxu0 }
  0xea   : > { %v547_v60 = vpop.f32.mrf.mxu0 }
  0xec   : > { %v1556_v54 = vpop.f32.mrf.mxu1  ;;  %v1517_v0 = vpop.f32.mrf.mxu0 }
  0xed   : > { %v829_v55 = vadd.f32 %v1556_v54, %v1508_v46 }
  0xee   : > { %v820_v58 = vpop.f32.mrf.mxu1  ;;  %v550_v5 = vpop.f32.mrf.mxu0 }
  0xef   : > { %v821_v59 = vadd.f32 %v820_v58, %v515_v47  ;;  %v944_v62 = vadd.f32 %v1793_v57, %v829_v55 }
  0xf0   : > { %v1557_v61 = vpop.f32.mrf.mxu1  ;;  %v1520_v11 = vpop.f32.mrf.mxu0 }
  0xf1   : > { %v832_v63 = vadd.f32 %v1557_v61, %v1509_v48  ;;  %v942_v2 = vadd.f32 %v1793_v57, %v821_v59  ;;  %v976_v7 = vmax.f32 %v944_v62, 0.0 }
  0xf2   : > { %v823_v1 = vpop.f32.mrf.mxu1  ;;  %v563_v17 = vpop.f32.mrf.mxu0 }
  0xf3   : > { %v945_v3 = vadd.f32 %v1793_v57, %v832_v63  ;;  %v824_v4 = vadd.f32 %v823_v1, %v518_v49  ;;  %v974_v13 = vmax.f32 %v942_v2, 0.0 }
  0xf4   : > { %v1560_v6 = vpop.f32.mrf.mxu1  ;;  %v1521_v22 = vpop.f32.mrf.mxu0 }
  0xf5   : > { %v977_v8 = vmax.f32 %v945_v3, 0.0  ;;  %v943_v9 = vadd.f32 %v1793_v57, %v824_v4  ;;  %v845_v10 = vadd.f32 %v1560_v6, %v1512_v50 }
  0xf6   : > { %v836_v12 = vpop.f32.mrf.mxu1  ;;  %v566_v27 = vpop.f32.mrf.mxu0 }
  0xf7   : > { %v1382_v14 = vpack.c.bf16 %v977_v8, %v976_v7  ;;  %v975_v15 = vmax.f32 %v943_v9, 0.0  ;;  %v837_v16 = vadd.f32 %v836_v12, %v531_v51  ;;  %v948_v20 = vadd.f32 %v1793_v57, %v845_v10 }
  0xf8   : > { %v1561_v18 = vpop.f32.mrf.mxu1  ;;  %v1524_v33 = vpop.f32.mrf.mxu0 }
  0xf9   : > { %1446 = vst [vmem:[%s1803_s26 + $0x18] sm:$0xff] %v1382_v14   ;;  %v1377_v19 = vpack.c.bf16 %v975_v15, %v974_v13  ;;  %v848_v21 = vadd.f32 %v1561_v18, %v1513_v52  ;;  %v946_v24 = vadd.f32 %v1793_v57, %v837_v16  ;;  %v980_v29 = vmax.f32 %v948_v20, 0.0 }
  0xfa   : > { %v839_v23 = vpop.f32.mrf.mxu1  ;;  %v579_v39 = vpop.f32.mrf.mxu0 }
  0xfb   : > { %1445 = vst [vmem:[%s1803_s26 + $0x10] sm:$0xff] %v1377_v19   ;;  %v949_v25 = vadd.f32 %v1793_v57, %v848_v21  ;;  %v840_v26 = vadd.f32 %v839_v23, %v534_v53  ;;  %v978_v35 = vmax.f32 %v946_v24, 0.0 }
  0xfc   : > { %v1564_v28 = vpop.f32.mrf.mxu1  ;;  %v1525_v48 = vpop.f32.mrf.mxu0 }
  0xfd   : > { %v981_v30 = vmax.f32 %v949_v25, 0.0  ;;  %v947_v31 = vadd.f32 %v1793_v57, %v840_v26  ;;  %v861_v32 = vadd.f32 %v1564_v28, %v1516_v56 }
  0xfe   : > { %v852_v34 = vpop.f32.mrf.mxu1  ;;  %v582_v53 = vpop.f32.mrf.mxu0 }
  0xff   : > { %v1392_v36 = vpack.c.bf16 %v981_v30, %v980_v29  ;;  %v979_v37 = vmax.f32 %v947_v31, 0.0  ;;  %v853_v38 = vadd.f32 %v852_v34, %v547_v60  ;;  %v952_v46 = vadd.f32 %v1793_v57, %v861_v32 }
 0x100   : > { %v1565_v40 = vpop.f32.mrf.mxu1  ;;  %v1528_v60 = vpop.f32.mrf.mxu0 }
 0x101   : > { %1448 = vst [vmem:[%s1803_s26 + $0x28] sm:$0xff] %v1392_v36   ;;  %v1387_v41 = vpack.c.bf16 %v979_v37, %v978_v35  ;;  %v864_v47 = vadd.f32 %v1565_v40, %v1517_v0  ;;  %v950_v50 = vadd.f32 %v1793_v57, %v853_v38  ;;  %v984_v55 = vmax.f32 %v952_v46, 0.0 }
 0x102   : > { %v855_v49 = vpop.f32.mrf.mxu1  ;;  %v595_v2 = vpop.f32.mrf.mxu0 }
 0x103   : > { %1447 = vst [vmem:[%s1803_s26 + $0x20] sm:$0xff] %v1387_v41   ;;  %v953_v51 = vadd.f32 %v1793_v57, %v864_v47  ;;  %v856_v52 = vadd.f32 %v855_v49, %v550_v5  ;;  %v982_v62 = vmax.f32 %v950_v50, 0.0 }
 0x104   : > { %v1568_v54 = vpop.f32.mrf.mxu1  ;;  %v1529_v7 = vpop.f32.mrf.mxu0 }
 0x105   : > { %v985_v56 = vmax.f32 %v953_v51, 0.0  ;;  %v951_v58 = vadd.f32 %v1793_v57, %v856_v52  ;;  %v877_v59 = vadd.f32 %v1568_v54, %v1520_v11 }
 0x106   : > { %v868_v61 = vpop.f32.mrf.mxu1  ;;  %v598_v12 = vpop.f32.mrf.mxu0 }
 0x107   : > { %v1402_v63 = vpack.c.bf16 %v985_v56, %v984_v55  ;;  %v983_v0 = vmax.f32 %v951_v58, 0.0  ;;  %v869_v1 = vadd.f32 %v868_v61, %v563_v17  ;;  %v956_v5 = vadd.f32 %v1793_v57, %v877_v59 }
 0x108   : > { %v1569_v3 = vpop.f32.mrf.mxu1  ;;  %v1532_v18 = vpop.f32.mrf.mxu0 }
 0x109   : > { %1450 = vst [vmem:[%s1803_s26 + $0x38] sm:$0xff] %v1402_v63   ;;  %v1397_v4 = vpack.c.bf16 %v983_v0, %v982_v62  ;;  %v880_v6 = vadd.f32 %v1569_v3, %v1521_v22  ;;  %v954_v9 = vadd.f32 %v1793_v57, %v869_v1  ;;  %v988_v14 = vmax.f32 %v956_v5, 0.0 }
 0x10a   : > { %v871_v8 = vpop.f32.mrf.mxu1  ;;  %v611_v24 = vpop.f32.mrf.mxu0 }
 0x10b   : > { %1449 = vst [vmem:[%s1803_s26 + $0x30] sm:$0xff] %v1397_v4   ;;  %v957_v10 = vadd.f32 %v1793_v57, %v880_v6  ;;  %v872_v11 = vadd.f32 %v871_v8, %v566_v27  ;;  %v986_v20 = vmax.f32 %v954_v9, 0.0 }
 0x10c   : > { %v1572_v13 = vpop.f32.mrf.mxu1  ;;  %v1533_v29 = vpop.f32.mrf.mxu0 }
 0x10d   : > { %v989_v15 = vmax.f32 %v957_v10, 0.0  ;;  %v955_v16 = vadd.f32 %v1793_v57, %v872_v11  ;;  %v893_v17 = vadd.f32 %v1572_v13, %v1524_v33 }
 0x10e   : > { %v884_v19 = vpop.f32.mrf.mxu1  ;;  %v614_v34 = vpop.f32.mrf.mxu0 }
 0x10f   : > { %v1412_v21 = vpack.c.bf16 %v989_v15, %v988_v14  ;;  %v987_v22 = vmax.f32 %v955_v16, 0.0  ;;  %v885_v23 = vadd.f32 %v884_v19, %v579_v39  ;;  %v960_v27 = vadd.f32 %v1793_v57, %v893_v17 }
 0x110   : > { %v1573_v25 = vpop.f32.mrf.mxu1  ;;  %v1552_v40 = vpop.f32.mrf.mxu0 }
 0x111   : > { %1452 = vst [vmem:[%s1803_s26 + $0x48] sm:$0xff] %v1412_v21   ;;  %v1407_v26 = vpack.c.bf16 %v987_v22, %v986_v20  ;;  %v896_v28 = vadd.f32 %v1573_v25, %v1525_v48  ;;  %v958_v31 = vadd.f32 %v1793_v57, %v885_v23  ;;  %v992_v36 = vmax.f32 %v960_v27, 0.0 }
 0x112   : > { %v887_v30 = vpop.f32.mrf.mxu1  ;;  %v813_v49 = vadd.f32 %v1552_v40, %v1782_v42  ;;  %v804_v51 = vpop.f32.mrf.mxu0 }
 0x113   : > { %1451 = vst [vmem:[%s1803_s26 + $0x40] sm:$0xff] %v1407_v26   ;;  %v961_v32 = vadd.f32 %v1793_v57, %v896_v28  ;;  %v888_v33 = vadd.f32 %v887_v30, %v582_v53  ;;  %v990_v46 = vmax.f32 %v958_v31, 0.0  ;;  %v805_v55 = vadd.f32 %v804_v51, %v1784_v43 }
 0x114   : > { %v1576_v35 = vpop.f32.mrf.mxu1  ;;  %v940_v56 = vadd.f32 %v1793_v57, %v813_v49  ;;  %v1553_v59 = vpop.f32.mrf.mxu0 }
 0x115   : > { %v993_v37 = vmax.f32 %v961_v32, 0.0  ;;  %v959_v38 = vadd.f32 %v1793_v57, %v888_v33  ;;  %v909_v39 = vadd.f32 %v1576_v35, %v1528_v60  ;;  %v816_v62 = vadd.f32 %v1553_v59, %v1786_v44 }
 0x116   : > { %v900_v41 = vpop.f32.mrf.mxu1  ;;  %v807_v1 = vpop.f32.mrf.mxu0  ;;  %v938_v3 = vadd.f32 %v1793_v57, %v805_v55  ;;  %v972_v6 = vmax.f32 %v940_v56, 0.0 }
 0x117   : > { %v1422_v47 = vpack.c.bf16 %v993_v37, %v992_v36  ;;  %v991_v48 = vmax.f32 %v959_v38, 0.0  ;;  %v964_v50 = vadd.f32 %v1793_v57, %v909_v39  ;;  %v901_v52 = vadd.f32 %v900_v41, %v595_v2 }
 0x118   : > { %v1577_v53 = vpop.f32.mrf.mxu1  ;;  %v941_v43 = vadd.f32 %v1793_v57, %v816_v62  ;;  %v808_v4 = vadd.f32 %v807_v1, %v1788_v45  ;;  %v970_v16 = vmax.f32 %v938_v3, 0.0 }
 0x119   : > { %1454 = vst [vmem:[%s1803_s26 + $0x58] sm:$0xff] %v1422_v47   ;;  %v1417_v54 = vpack.c.bf16 %v991_v48, %v990_v46  ;;  %v962_v58 = vadd.f32 %v1793_v57, %v901_v52  ;;  %v912_v60 = vadd.f32 %v1577_v53, %v1529_v7  ;;  %v996_v63 = vmax.f32 %v964_v50, 0.0 }
 0x11a   : > { %v903_v61 = vpop.f32.mrf.mxu1  ;;  %v973_v10 = vmax.f32 %v941_v43, 0.0  ;;  %v939_v11 = vadd.f32 %v1793_v57, %v808_v4 }
 0x11b   : > { %1453 = vst [vmem:[%s1803_s26 + $0x50] sm:$0xff] %v1417_v54   ;;  %v904_v42 = vadd.f32 %v903_v61, %v598_v12  ;;  %v965_v0 = vadd.f32 %v1793_v57, %v912_v60  ;;  %v994_v7 = vmax.f32 %v962_v58, 0.0 }
 0x11c   : > { %v1580_v2 = vpop.f32.mrf.mxu1  ;;  %v1372_v45 = vpack.c.bf16 %v973_v10, %v972_v6  ;;  %v971_v17 = vmax.f32 %v939_v11, 0.0 }
 0x11d   : > { %v963_v5 = vadd.f32 %v1793_v57, %v904_v42  ;;  %v997_v8 = vmax.f32 %v965_v0, 0.0  ;;  %v925_v9 = vadd.f32 %v1580_v2, %v1532_v18 }
 0x11e   : > { %v916_v44 = vpop.f32.mrf.mxu1  ;;  %1444 = vst [vmem:[%s1803_s26 + $0x8] sm:$0xff] %v1372_v45   ;;  %v1367_v22 = vpack.c.bf16 %v971_v17, %v970_v16 }
 0x11f   : > { %v995_v12 = vmax.f32 %v963_v5, 0.0  ;;  %v917_v13 = vadd.f32 %v916_v44, %v611_v24  ;;  %v1432_v14 = vpack.c.bf16 %v997_v8, %v996_v63  ;;  %v968_v20 = vadd.f32 %v1793_v57, %v925_v9 }
 0x120   : > { %v1581_v15 = vpop.f32.mrf.mxu1  ;;  %1368 = vst [vmem:[%s1803_s26] sm:$0xff] %v1367_v22  }
 0x121   : > { %v1427_v19 = vpack.c.bf16 %v995_v12, %v994_v7  ;;  %1456 = vst [vmem:[%s1803_s26 + $0x68] sm:$0xff] %v1432_v14   ;;  %v928_v21 = vadd.f32 %v1581_v15, %v1533_v29  ;;  %v966_v23 = vadd.f32 %v1793_v57, %v917_v13  ;;  %v1000_v27 = vmax.f32 %v968_v20, 0.0 }
 0x122   : > { %v919_v18 = vpop.f32.mrf.mxu1 }
 0x123   : > { %1455 = vst [vmem:[%s1803_s26 + $0x60] sm:$0xff] %v1427_v19   ;;  %v920_v24 = vadd.f32 %v919_v18, %v614_v34  ;;  %v969_v25 = vadd.f32 %v1793_v57, %v928_v21  ;;  %v998_v30 = vmax.f32 %v966_v23, 0.0 }
 0x125   : > { %v967_v26 = vadd.f32 %v1793_v57, %v920_v24  ;;  %v1001_v28 = vmax.f32 %v969_v25, 0.0 }
 0x127   : > { %v999_v31 = vmax.f32 %v967_v26, 0.0  ;;  %v1442_v32 = vpack.c.bf16 %v1001_v28, %v1000_v27 }
 0x129   : > { %v1437_v29 = vpack.c.bf16 %v999_v31, %v998_v30  ;;  %1458 = vst [vmem:[%s1803_s26 + $0x78] sm:$0xff] %v1442_v32  }
 0x12b   : > { %1457 = vst [vmem:[%s1803_s26 + $0x70] sm:$0xff] %v1437_v29  }
 0x12c PF: > { %s15_s18 = sadd.s32 1, %s1653_s18  }
 0x12d   : > { %p12_p4 = scmp.ge.s32.totalorder %s15_s18, 4  }
 0x12f   :  { %14 = sbr.rel (!%p12_p4) target bundleno = 1 (0x1), region = 73 }

// kernel: bottleneck_deep_forward.4
= control target key start
LH: loop header
LB: loop body
LE: loop exit
PB: predicated region body
PF: predicated region fallthrough
CT: control target
= control target key end

     0   :  { %s7755_s12 = smov 0   ;;  %s9557_s0 = inlined_call_operand.vmem [shape: bf16[2,18,18,128], index: 0, kind: input, shape index: {}]   ;;  %s9558_s1 = inlined_call_operand.vmem [shape: bf16[9,128,128], index: 1, kind: input, shape index: {}]   ;;  %s9559_s2 = inlined_call_operand.vmem [shape: f32[1,128], index: 2, kind: input, shape index: {}]   ;;  %s9560_s3 = inlined_call_operand.vmem [shape: bf16[2,256,128], index: 3, kind: output, shape index: {}]  }
   0x1 LB: > { %s6115_s13 = sadd.s32 4294967295, %s7733_s12   ;;  %p6119_p0 = scmp.ge.s32.totalorder %s7733_s12, 1  ;;  %s7733_s12 = sphi %s7755_s12, %s13_s12  }
   0x2   : > { %p137_p1 = scmp.lt.s32.totalorder %s7733_s12, 3 }
   0x4   : > { %p138_p2 = pnand %p6119_p0, %p137_p1 }
   0x6   : > { %141 = sbr.rel (%p138_p2) target bundleno = 594 (0x252), region = 32 }
   0xb   : > { %v7607_v0 = vld [vmem:[%s9558_s1 + $0x38] sm:$0xff]   ;;  %p161_p3 = scmp.lt.s32.totalorder %s6115_s13, 1  ;;  %v7608_v1 = vld [vmem:[%s9558_s1 + $0x30] sm:$0xff]   ;;  %v7609_v2 = vld [vmem:[%s9558_s1 + $0x28] sm:$0xff]   ;;  %vm1570_vm0 = vcmask 1042432   ;;  %vm1571_vm1 = vcmask 1046532  }
   0xc   : > { %7150 = vmatprep.subr.bf16.mxu0 %v7607_v0  ;;  %7582 = vmatprep.subr.bf16.mxu1 %v7607_v0  ;;  %v7610_v3 = vld [vmem:[%s9558_s1 + $0x20] sm:$0xff]   ;;  %v7611_v6 = vld [vmem:[%s9558_s1 + $0x18] sm:$0xff]   ;;  %v7612_v7 = vld [vmem:[%s9558_s1 + $0x10] sm:$0xff]   ;;  %vm701_vm2 = vsmask.f32 3328 }
   0xd   : > { %s9641_s13 = smov (!%p161_p3, %s6115_s13), 1  ;;  %7151 = vmatpush3.bf16.msra.mxu0 %v7607_v0  ;;  %7590 = vmatpush3.bf16.msra.mxu1 %v7607_v0  ;;  %v7613_v8 = vld [vmem:[%s9558_s1 + $0x8] sm:$0xff]   ;;  %v7614_v9 = vld [vmem:[%s9558_s1] sm:$0xff]   ;;  %v7619_v10 = vld [vmem:[%s9558_s1 + $0x78] sm:$0xff]   ;;  %vm702_vm3 = vsmask.f32 7440 }
   0xe   : > { %7152 = vmatprep.subr.bf16.mxu0 %v7608_v1  ;;  %7583 = vmatprep.subr.bf16.mxu1 %v7608_v1  ;;  %s7598_s20 = smul.u32 216, %s9641_s13  ;;  %v7620_v12 = vld [vmem:[%s9558_s1 + $0xb8] sm:$0xff]   ;;  %v7621_v14 = vld [vmem:[%s9558_s1 + $0x70] sm:$0xff]   ;;  %v7627_v18 = vld [vmem:[%s9558_s1 + $0x68] sm:$0xff]   ;;  %s6806_s18 = sshll.u32 %s9641_s13, 7 }
   0xf   : > { %v7622_v15 = vld [vmem:[%s9558_s1 + $0xb0] sm:$0xff]   ;;  %v7628_v20 = vld [vmem:[%s9558_s1 + $0xa8] sm:$0xff]   ;;  %v7629_v22 = vld [vmem:[%s9558_s1 + $0x60] sm:$0xff]   ;;  %s9480_s13 = scalar_lea.vmem %s9560_s3, %s6806_s18 }
  0x10   : > { %s7778_s23 = scalar_lea.vmem %s9557_s0, %s7598_s20  ;;  %v7630_v23 = vld [vmem:[%s9558_s1 + $0xa0] sm:$0xff]   ;;  %v7835_v31 = vld [vmem:[%s9558_s1 + $0x58] sm:$0xff]   ;;  %vm7849_vm4 = vmor %vm1570_vm0, %vm1571_vm1 }
  0x11   : > { %7153 = vmatpush3.bf16.msra.mxu0 %v7608_v1  ;;  %7591 = vmatpush3.bf16.msra.mxu1 %v7608_v1  ;;  %v7615_v4 = vld [vmem:[%s7778_s23] sm:$0xff]   ;;  %v7617_v11 = vld [vmem:[%s7778_s23 + $0xc] sm:$0xff]   ;;  %v7623_v16 = vld [vmem:[%s7778_s23 + $0x18] sm:$0xff]  }
  0x12   : > { %7154 = vmatprep.subr.bf16.mxu0 %v7609_v2  ;;  %7584 = vmatprep.subr.bf16.mxu1 %v7609_v2  ;;  %v7616_v5 = vld [vmem:[%s7778_s23 + $0x60] sm:$0xff]   ;;  %v7618_v13 = vld [vmem:[%s7778_s23 + $0x6c] sm:$0xff]   ;;  %v7624_v17 = vld [vmem:[%s7778_s23 + $0x78] sm:$0xff]  }
  0x13   : > { %7166 = vmatprep.mubr.bf16.mxu0 %v7615_v4  ;;  %7182 = vmatprep.mubr.bf16.mxu1 %v7616_v5  ;;  %v7625_v19 = vld [vmem:[%s7778_s23 + $0x24] sm:$0xff]   ;;  %v7631_v24 = vld [vmem:[%s7778_s23 + $0x30] sm:$0xff]   ;;  %v653_v26 = vld [vmem:[%s7778_s23] sm:$0xf] }
  0x14   : > { %v7626_v21 = vld [vmem:[%s7778_s23 + $0x84] sm:$0xff]   ;;  %v7632_v25 = vld [vmem:[%s7778_s23 + $0x90] sm:$0xff]   ;;  %v705_v29 = vshrl.u32 %v653_v26, 16  ;;  %v708_v30 = vshll.u32 %v653_v26, 16  ;;  %v7840_v32 = vld [vmem:[%s9558_s1 + $0x98] sm:$0xff]  }
  0x15   : > { %7155 = vmatpush3.bf16.msra.mxu0 %v7609_v2  ;;  %7592 = vmatpush3.bf16.msra.mxu1 %v7609_v2  ;;  %v654_v27 = vld [vmem:[%s7778_s23 + $0x4] sm:$0xf]  ;;  %v655_v28 = vld [vmem:[%s7778_s23 + $0x8] sm:$0x1]  ;;  %v1474_v36 = vld [vmem:[%s7778_s23] sm:$0xe] }
  0x16   : > { %7156 = vmatprep.subr.bf16.mxu0 %v7610_v3  ;;  %7585 = vmatprep.subr.bf16.mxu1 %v7610_v3  ;;  %v714_v33 = vshll.u32 %v654_v27, 16  ;;  %v718_v34 = vshrl.u32 %v654_v27, 16  ;;  %v724_v35 = vshll.u32 %v655_v28, 16  ;;  %v707_v37 = vrot.slane %v705_v29, 4  ;;  %v1475_v39 = vld [vmem:[%s7778_s23 + $0x4] sm:$0xf]  ;;  %vm7868_vm5 = vmor %vm701_vm2, %vm702_vm3 }
  0x17   : > { %v710_v38 = vrot.slane %v708_v30, 5  ;;  %v1476_v40 = vld [vmem:[%s7778_s23 + $0x8] sm:$0x1]  ;;  %v7633_v41 = vld [vmem:[%s7778_s23 + $0x3c] sm:$0xff]   ;;  %v6187_v47 = vrot.slane %v1474_v36, 9  ;;  %v1575_v50 = vrot.slane %v1475_v39, 5 }
  0x18   : > { %v7634_v42 = vld [vmem:[%s7778_s23 + $0x9c] sm:$0xff]   ;;  %v716_v43 = vrot.slane %v714_v33, 5  ;;  %v720_v44 = vrot.slane %v718_v34, 4  ;;  %v726_v45 = vrot.slane %v724_v35, 5  ;;  %v656_v48 = vld [vmem:[%s7778_s23 + $0xc] sm:$0xf] }
  0x19   : > { %7157 = vmatpush3.bf16.msra.mxu0 %v7610_v3  ;;  %7593 = vmatpush3.bf16.msra.mxu1 %v7610_v3  ;;  %v711_v49 = vor.u32 %v710_v38, %v707_v37  ;;  %v1578_v51 = vrot.slane %v1476_v40, 5  ;;  %v657_v52 = vld [vmem:[%s7778_s23 + $0x10] sm:$0xf]  ;;  %v658_v53 = vld [vmem:[%s7778_s23 + $0x14] sm:$0x1]  ;;  %v729_v58 = vshrl.u32 %v656_v48, 16  ;;  %v7877_v1 = vsel %vm7849_vm4, %v6187_v47, %v1575_v50 }
  0x1a   : > { %7158 = vmatprep.subr.bf16.mxu0 %v7611_v6  ;;  %7586 = vmatprep.subr.bf16.mxu1 %v7611_v6  ;;  %v7859_v54 = vld [vmem:[%s9558_s1 + $0x50] sm:$0xff]   ;;  %v721_v57 = vor.u32 %v720_v44, %v716_v43  ;;  %v732_v59 = vshll.u32 %v656_v48, 16  ;;  %v738_v60 = vshll.u32 %v657_v52, 16  ;;  %v1477_v61 = vld [vmem:[%s7778_s23 + $0xc] sm:$0xe]  ;;  %v1577_v2 = vrot.slane %v1575_v50, 4 }
  0x1b   : > { %v7864_v55 = vld [vmem:[%s9558_s1 + $0x90] sm:$0xff]   ;;  %v7639_v62 = vld [vmem:[%s7778_s23 + $0x48] sm:$0xff]   ;;  %v712_v0 = vrot.slane %v711_v49, 4  ;;  %v742_v3 = vshrl.u32 %v657_v52, 16  ;;  %v661_v29 = vld [vmem:[%s7778_s23 + $0x20] sm:$0x1] }
  0x1c   : > { %v7640_v63 = vld [vmem:[%s7778_s23 + $0xa8] sm:$0xff]   ;;  %v1478_v4 = vld [vmem:[%s7778_s23 + $0x10] sm:$0xf]  ;;  %v722_v5 = vrot.slane %v721_v57, 4  ;;  %v7641_v26 = vld [vmem:[%s7778_s23 + $0x54] sm:$0xff]   ;;  %v772_v48 = vshll.u32 %v661_v29, 16 }
  0x1d   : > { %7159 = vmatpush3.bf16.msra.mxu0 %v7611_v6  ;;  %7594 = vmatpush3.bf16.msra.mxu1 %v7611_v6  ;;  %v731_v6 = vrot.slane %v729_v58, 4  ;;  %v1480_v37 = vld [vmem:[%s7778_s23 + $0x18] sm:$0xe]  ;;  %v7645_v38 = vld [vmem:[%s9558_s1 + $0x40] sm:$0xff]   ;;  %v663_v57 = vld [vmem:[%s7778_s23 + $0x28] sm:$0xf] }
  0x1e   : > { %7160 = vmatprep.subr.bf16.mxu0 %v7612_v7  ;;  %7587 = vmatprep.subr.bf16.mxu1 %v7612_v7  ;;  %v1482_v49 = vld [vmem:[%s7778_s23 + $0x20] sm:$0x1]  ;;  %v662_v50 = vld [vmem:[%s7778_s23 + $0x24] sm:$0xf]  ;;  %v664_v58 = vld [vmem:[%s7778_s23 + $0x2c] sm:$0x1] }
  0x1f   : > { %v665_v29 = vld [vmem:[%s7778_s23 + $0x30] sm:$0xf] }
  0x21   : > { %7161 = vmatpush3.bf16.msra.mxu0 %v7612_v7  ;;  %7595 = vmatpush3.bf16.msra.mxu1 %v7612_v7  ;;  %v734_v7 = vrot.slane %v732_v59, 5  ;;  %v774_v59 = vrot.slane %v772_v48, 5 }
  0x22   : > { %7162 = vmatprep.subr.bf16.mxu0 %v7613_v8  ;;  %7588 = vmatprep.subr.bf16.mxu1 %v7613_v8 }
  0x25   : > { %7163 = vmatpush3.bf16.msra.mxu0 %v7613_v8  ;;  %7596 = vmatpush3.bf16.msra.mxu1 %v7613_v8  ;;  %v740_v8 = vrot.slane %v738_v60, 5  ;;  %v6189_v60 = vrot.slane %v1480_v37, 9 }
  0x26   : > { %7164 = vmatprep.subr.bf16.mxu0 %v7614_v9  ;;  %7589 = vmatprep.subr.bf16.mxu1 %v7614_v9 }
  0x29   : > { %7165 = vmatpush3.bf16.msra.mxu0 %v7614_v9  ;;  %7597 = vmatpush3.bf16.msra.mxu1 %v7614_v9  ;;  %v1479_v9 = vld [vmem:[%s7778_s23 + $0x14] sm:$0x1] }
  0x2a   : > { %7198 = vmatprep.subr.bf16.mxu1 %v7619_v10  ;;  %7246 = vmatprep.subr.bf16.mxu0 %v7620_v12  ;;  %v1585_v28 = vrot.slane %v1479_v9, 5  ;;  %v786_v9 = vshll.u32 %v663_v57, 16 }
  0x2c   : > { %7167 = vmatmul.mubr.bf16.vlgmr.msra.gmra.mxu0 %v7617_v11  ;;  %7183 = vmatmul.mubr.bf16.vlgmr.msra.gmra.mxu1 %v7618_v13  ;;  %v7887_v11 = vsel %vm7849_vm4, %v1577_v2, %v1578_v51  ;;  %v748_v13 = vshll.u32 %v658_v53, 16  ;;  %v7646_v51 = vld [vmem:[%s9558_s1 + $0x80] sm:$0xff]  }
  0x2d   : > { %7199 = vmatpush3.bf16.msra.mxu1 %v7619_v10  ;;  %7247 = vmatpush3.bf16.msra.mxu0 %v7620_v12  ;;  %v717_v10 = vsel %vm7868_vm5, %v712_v0, %v716_v43  ;;  %v744_v12 = vrot.slane %v742_v3, 4  ;;  %v1481_v43 = vld [vmem:[%s7778_s23 + $0x1c] sm:$0xf]  ;;  %v777_v3 = vshrl.u32 %v662_v50, 16 }
  0x2e   : > { %7200 = vmatprep.subr.bf16.mxu1 %v7621_v14  ;;  %7248 = vmatprep.subr.bf16.mxu0 %v7622_v15 }
  0x2f   : > { %7170 = vmatprep.mubr.bf16.mxu0 %v7623_v16  ;;  %7186 = vmatprep.mubr.bf16.mxu1 %v7624_v17  ;;  %v727_v16 = vsel %vm7868_vm5, %v722_v5, %v726_v45  ;;  %v6219_v17 = vcombine.low %v7877_v1, %v7887_v11  ;;  %v1484_v5 = vld [vmem:[%s7778_s23 + $0x28] sm:$0xf] }
  0x31   : > { %7201 = vmatpush3.bf16.msra.mxu1 %v7621_v14  ;;  %7249 = vmatpush3.bf16.msra.mxu0 %v7622_v15  ;;  %v7892_v14 = vld [vmem:[%s9558_s1 + $0x48] sm:$0xff]  }
  0x32   : > { %7202 = vmatprep.subr.bf16.mxu1 %v7627_v18  ;;  %7250 = vmatprep.subr.bf16.mxu0 %v7628_v20  ;;  %v7897_v15 = vld [vmem:[%s9558_s1 + $0x88] sm:$0xff]  }
  0x34   : > { %7171 = vmatmul.mubr.bf16.gmra.mxu0 %v7625_v19  ;;  %7187 = vmatmul.mubr.bf16.gmra.mxu1 %v7626_v21  ;;  %v6188_v19 = vrot.slane %v1477_v61, 9  ;;  %v745_v21 = vor.u32 %v744_v12, %v740_v8  ;;  %v1589_v61 = vrot.slane %v1481_v43, 5  ;;  %v1485_v12 = vld [vmem:[%s7778_s23 + $0x2c] sm:$0x1] }
  0x35   : > { %7203 = vmatpush3.bf16.msra.mxu1 %v7627_v18  ;;  %7251 = vmatpush3.bf16.msra.mxu0 %v7628_v20  ;;  %v735_v18 = vor.u32 %v734_v7, %v731_v6  ;;  %v7905_v20 = vcombine.low %v717_v10, %v727_v16  ;;  %v7647_v6 = vld [vmem:[%s9558_s1 + $0xf8] sm:$0xff]   ;;  %v790_v10 = vshrl.u32 %v663_v57, 16  ;;  %v779_v16 = vrot.slane %v777_v3, 4 }
  0x36   : > { %7204 = vmatprep.subr.bf16.mxu1 %v7629_v22  ;;  %7252 = vmatprep.subr.bf16.mxu0 %v7630_v23  ;;  %v746_v33 = vrot.slane %v745_v21, 4  ;;  %v1590_v7 = vsel %vm7849_vm4, %v6189_v60, %v1589_v61  ;;  %v788_v21 = vrot.slane %v786_v9, 5  ;;  %v669_v60 = vld [vmem:[%s7778_s23 + $0x40] sm:$0xf] }
  0x37   : > { %7174 = vmatprep.mubr.bf16.mxu0 %v7631_v24  ;;  %7190 = vmatprep.mubr.bf16.mxu1 %v7632_v25  ;;  %v659_v24 = vld [vmem:[%s7778_s23 + $0x18] sm:$0xf]  ;;  %v660_v25 = vld [vmem:[%s7778_s23 + $0x1c] sm:$0xf]  ;;  %v736_v27 = vrot.slane %v735_v18, 4 }
  0x38   : > { %v753_v30 = vshrl.u32 %v659_v24, 16  ;;  %v762_v36 = vshll.u32 %v660_v25, 16  ;;  %v1490_v9 = vld [vmem:[%s7778_s23 + $0x40] sm:$0xf] }
  0x39   : > { %7205 = vmatpush3.bf16.msra.mxu1 %v7629_v22  ;;  %7253 = vmatpush3.bf16.msra.mxu0 %v7630_v23  ;;  %v750_v22 = vrot.slane %v748_v13, 5  ;;  %v1582_v23 = vrot.slane %v1478_v4, 5  ;;  %v741_v39 = vsel %vm7868_vm5, %v736_v27, %v740_v8  ;;  %v780_v4 = vshll.u32 %v662_v50, 16  ;;  %v7648_v13 = vld [vmem:[%s9558_s1 + $0x138] sm:$0xff]   ;;  %v7651_v50 = vld [vmem:[%s9558_s1 + $0xe8] sm:$0xff]  }
  0x3a   : > { %7206 = vmatprep.subr.bf16.mxu1 %v7835_v31  ;;  %7254 = vmatprep.subr.bf16.mxu0 %v7840_v32  ;;  %v755_v40 = vrot.slane %v753_v30, 4  ;;  %v764_v47 = vrot.slane %v762_v36, 5  ;;  %v1591_v8 = vrot.slane %v1589_v61, 4  ;;  %v666_v30 = vld [vmem:[%s7778_s23 + $0x34] sm:$0xf]  ;;  %v804_v36 = vshll.u32 %v665_v29, 16 }
  0x3b   : > { %v7916_v34 = vsel %vm7849_vm4, %v6188_v19, %v1582_v23  ;;  %v1584_v35 = vrot.slane %v1582_v23, 4  ;;  %v751_v44 = vsel %vm7868_vm5, %v746_v33, %v750_v22  ;;  %v782_v18 = vrot.slane %v780_v4, 5  ;;  %v667_v33 = vld [vmem:[%s7778_s23 + $0x38] sm:$0x1]  ;;  %v670_v61 = vld [vmem:[%s7778_s23 + $0x44] sm:$0x1] }
  0x3c   : > { %7175 = vmatmul.mubr.bf16.gmra.mxu0 %v7633_v41  ;;  %7191 = vmatmul.mubr.bf16.gmra.mxu1 %v7634_v42  ;;  %v766_v42 = vshrl.u32 %v660_v25, 16  ;;  %v7940_v52 = vcombine.low %v741_v39, %v751_v44  ;;  %v792_v22 = vrot.slane %v790_v10, 4  ;;  %v796_v23 = vshll.u32 %v664_v58, 16  ;;  %v1489_v4 = vld [vmem:[%s7778_s23 + $0x3c] sm:$0xe] }
  0x3d   : > { %7207 = vmatpush3.bf16.msra.mxu1 %v7835_v31  ;;  %7255 = vmatpush3.bf16.msra.mxu0 %v7840_v32  ;;  %v756_v31 = vshll.u32 %v659_v24, 16  ;;  %v7642_v32 = vld [vmem:[%s7778_s23 + $0xb4] sm:$0xff]   ;;  %v7931_v45 = vsel %vm7849_vm4, %v1584_v35, %v1585_v28  ;;  %v801_v35 = vshrl.u32 %v665_v29, 16  ;;  %v814_v48 = vshrl.u32 %v666_v30, 16 }
  0x3e   : > { %7208 = vmatprep.subr.bf16.mxu1 %v7859_v54  ;;  %7256 = vmatprep.subr.bf16.mxu0 %v7864_v55  ;;  %v6220_v53 = vcombine.low %v7916_v34, %v7931_v45  ;;  %v793_v1 = vor.u32 %v792_v22, %v788_v21  ;;  %v798_v11 = vrot.slane %v796_v23, 5  ;;  %v7649_v28 = vld [vmem:[%s9558_s1 + $0xf0] sm:$0xff]   ;;  %v7653_v22 = vld [vmem:[%s9558_s1 + $0xe0] sm:$0xff]   ;;  %v8027_v29 = vld [vmem:[%s9558_s1 + $0x118] sm:$0xff]  }
  0x3f   : > { %7178 = vmatprep.mubr.bf16.mxu0 %v7639_v62  ;;  %7194 = vmatprep.mubr.bf16.mxu1 %v7640_v63  ;;  %v758_v41 = vrot.slane %v756_v31, 5  ;;  %v1592_v62 = vrot.slane %v1482_v49, 5  ;;  %v1483_v63 = vld [vmem:[%s7778_s23 + $0x24] sm:$0xe]  ;;  %v803_v44 = vrot.slane %v801_v35, 4 }
  0x40   : > { %v6190_v27 = vrot.slane %v1483_v63, 9  ;;  %v794_v37 = vrot.slane %v793_v1, 4  ;;  %v1487_v49 = vld [vmem:[%s7778_s23 + $0x34] sm:$0xf]  ;;  %v671_v35 = vld [vmem:[%s7778_s23 + $0x48] sm:$0xf] }
  0x41   : > { %7209 = vmatpush3.bf16.msra.mxu1 %v7859_v54  ;;  %7257 = vmatpush3.bf16.msra.mxu0 %v7864_v55  ;;  %v759_v54 = vor.u32 %v758_v41, %v755_v40  ;;  %v768_v55 = vrot.slane %v766_v42, 4  ;;  %v1593_v19 = vsel %vm7849_vm4, %v1591_v8, %v1592_v62  ;;  %v7650_v40 = vld [vmem:[%s9558_s1 + $0x130] sm:$0xff]   ;;  %v810_v41 = vshll.u32 %v666_v30, 16  ;;  %v7652_v62 = vld [vmem:[%s9558_s1 + $0x128] sm:$0xff]  }
  0x42   : > { %7210 = vmatprep.subr.bf16.mxu1 %v7892_v14  ;;  %7258 = vmatprep.subr.bf16.mxu0 %v7897_v15  ;;  %v6221_v25 = vcombine.low %v1590_v7, %v1593_v19  ;;  %v1486_v42 = vld [vmem:[%s7778_s23 + $0x30] sm:$0xe] }
  0x43   : > { %v760_v0 = vrot.slane %v759_v54, 4  ;;  %v769_v2 = vor.u32 %v768_v55, %v764_v47  ;;  %v812_v45 = vrot.slane %v810_v41, 5  ;;  %v668_v54 = vld [vmem:[%s7778_s23 + $0x3c] sm:$0xf]  ;;  %v852_v41 = vshll.u32 %v671_v35, 16 }
  0x44   : > { %7179 = vmatmul.mubr.bf16.gmra.mxu0 %v7641_v26  ;;  %7195 = vmatmul.mubr.bf16.gmra.mxu1 %v7642_v32  ;;  %v783_v26 = vor.u32 %v782_v18, %v779_v16  ;;  %v1599_v32 = vrot.slane %v1485_v12, 5  ;;  %v825_v7 = vshrl.u32 %v668_v54, 16  ;;  %v828_v8 = vshll.u32 %v668_v54, 16 }
  0x45   : > { %7211 = vmatpush3.bf16.msra.mxu1 %v7892_v14  ;;  %7259 = vmatpush3.bf16.msra.mxu0 %v7897_v15  ;;  %v765_v14 = vsel %vm7868_vm5, %v760_v0, %v764_v47  ;;  %v770_v15 = vrot.slane %v769_v2, 4  ;;  %v806_v47 = vrot.slane %v804_v36, 5  ;;  %v6191_v0 = vrot.slane %v1486_v42, 9  ;;  %v672_v36 = vld [vmem:[%s7778_s23 + $0x4c] sm:$0xf] }
  0x46   : > { %7212 = vmatprep.subr.bf16.mxu1 %v7645_v38  ;;  %7260 = vmatprep.subr.bf16.mxu0 %v7646_v51  ;;  %v784_v31 = vrot.slane %v783_v26, 4  ;;  %v1603_v2 = vrot.slane %v1487_v49, 5  ;;  %v827_v19 = vrot.slane %v825_v7, 4  ;;  %v844_v26 = vshll.u32 %v670_v61, 16 }
  0x47   : > { %7214 = vmatprep.mubr.bf16.mxu1 %v7905_v20  ;;  %7262 = vmatprep.mubr.bf16.mxu0 %v6219_v17  ;;  %v775_v24 = vsel %vm7868_vm5, %v770_v15, %v774_v59  ;;  %v1596_v17 = vrot.slane %v1484_v5, 5  ;;  %v807_v58 = vor.u32 %v806_v47, %v803_v44  ;;  %v816_v59 = vrot.slane %v814_v48, 4  ;;  %v1491_v15 = vld [vmem:[%s7778_s23 + $0x44] sm:$0x1]  ;;  %v1492_v48 = vld [vmem:[%s7778_s23 + $0x48] sm:$0xe] }
  0x48   : > { %v6165_v20 = vcombine.low %v765_v14, %v775_v24  ;;  %v789_v43 = vsel %vm7868_vm5, %v784_v31, %v788_v21  ;;  %v1604_v10 = vsel %vm7849_vm4, %v6191_v0, %v1603_v2  ;;  %v1605_v12 = vrot.slane %v1603_v2, 4  ;;  %v675_v0 = vld [vmem:[%s7778_s23 + $0x58] sm:$0xf]  ;;  %v676_v2 = vld [vmem:[%s7778_s23 + $0x5c] sm:$0x1] }
  0x49   : > { %7213 = vmatpush3.bf16.msra.mxu1 %v7645_v38  ;;  %7261 = vmatpush3.bf16.msra.mxu0 %v7646_v51  ;;  %v1597_v38 = vsel %vm7849_vm4, %v6190_v27, %v1596_v17  ;;  %v1598_v39 = vrot.slane %v1596_v17, 4  ;;  %v799_v51 = vsel %vm7868_vm5, %v794_v37, %v798_v11  ;;  %v808_v5 = vrot.slane %v807_v58, 4  ;;  %v7654_v27 = vld [vmem:[%s9558_s1 + $0x120] sm:$0xff]   ;;  %v1494_v58 = vld [vmem:[%s7778_s23 + $0x50] sm:$0x1] }
  0x4a   : > { %7294 = vmatprep.subr.bf16.mxu1 %v7647_v6  ;;  %7342 = vmatprep.subr.bf16.mxu0 %v7648_v13  ;;  %v6166_v55 = vcombine.low %v789_v43, %v799_v51  ;;  %v838_v14 = vshrl.u32 %v669_v60, 16  ;;  %v830_v21 = vrot.slane %v828_v8, 5  ;;  %v6192_v17 = vrot.slane %v1489_v4, 9  ;;  %v1495_v8 = vld [vmem:[%s7778_s23 + $0x54] sm:$0xe] }
  0x4b   : > { %v1600_v34 = vsel %vm7849_vm4, %v1598_v39, %v1599_v32  ;;  %v813_v16 = vsel %vm7868_vm5, %v808_v5, %v812_v45  ;;  %v846_v32 = vrot.slane %v844_v26, 5  ;;  %v673_v39 = vld [vmem:[%s7778_s23 + $0x50] sm:$0x1]  ;;  %v858_v47 = vshll.u32 %v672_v36, 16  ;;  %v7659_v26 = vld [vmem:[%s9558_s1 + $0xc8] sm:$0xff]  }
  0x4c   : > { %7215 = vmatmul.mubr.bf16.vlgmr.msra.gmra.mxu1 %v7940_v52  ;;  %7263 = vmatmul.mubr.bf16.vlgmr.msra.gmra.mxu0 %v6220_v53  ;;  %v820_v52 = vshll.u32 %v667_v33, 16  ;;  %v1488_v53 = vld [vmem:[%s7778_s23 + $0x38] sm:$0x1]  ;;  %v6222_v57 = vcombine.low %v1597_v38, %v1600_v34  ;;  %v831_v11 = vor.u32 %v830_v21, %v827_v19  ;;  %v1610_v33 = vrot.slane %v1490_v9, 5  ;;  %v1497_v21 = vld [vmem:[%s7778_s23 + $0x5c] sm:$0x1] }
  0x4d   : > { %7295 = vmatpush3.bf16.msra.mxu1 %v7647_v6  ;;  %7343 = vmatpush3.bf16.msra.mxu0 %v7648_v13  ;;  %v1606_v3 = vrot.slane %v1488_v53, 5  ;;  %v817_v6 = vor.u32 %v816_v59, %v812_v45  ;;  %v834_v13 = vshll.u32 %v669_v60, 16  ;;  %v1613_v38 = vrot.slane %v1491_v15, 5  ;;  %v1493_v45 = vld [vmem:[%s7778_s23 + $0x4c] sm:$0xf] }
  0x4e   : > { %7218 = vmatprep.mubr.bf16.mxu1 %v6165_v20  ;;  %7266 = vmatprep.mubr.bf16.mxu0 %v6221_v25  ;;  %v822_v63 = vrot.slane %v820_v52, 5  ;;  %v840_v25 = vrot.slane %v838_v14, 4  ;;  %v832_v37 = vrot.slane %v831_v11, 4  ;;  %v1611_v43 = vsel %vm7849_vm4, %v6192_v17, %v1610_v33  ;;  %v7657_v52 = vld [vmem:[%s9558_s1 + $0xd0] sm:$0xff]   ;;  %v1496_v14 = vld [vmem:[%s7778_s23 + $0x58] sm:$0xf] }
  0x4f   : > { %7296 = vmatprep.subr.bf16.mxu1 %v7649_v28  ;;  %7344 = vmatprep.subr.bf16.mxu0 %v7650_v40  ;;  %v818_v18 = vrot.slane %v817_v6, 4  ;;  %v1607_v23 = vsel %vm7849_vm4, %v1605_v12, %v1606_v3  ;;  %v836_v24 = vrot.slane %v834_v13, 5  ;;  %v1612_v44 = vrot.slane %v1610_v33, 4  ;;  %v674_v59 = vld [vmem:[%s7778_s23 + $0x54] sm:$0xf]  ;;  %v7660_v17 = vld [vmem:[%s9558_s1 + $0x108] sm:$0xff]  }
  0x50   : > { %v6223_v1 = vcombine.low %v1604_v10, %v1607_v23  ;;  %v854_v51 = vrot.slane %v852_v41, 5  ;;  %v862_v34 = vshrl.u32 %v672_v36, 16  ;;  %v7658_v3 = vld [vmem:[%s9558_s1 + $0x110] sm:$0xff]   ;;  %v6193_v5 = vrot.slane %v1492_v48, 9  ;;  %v8081_v33 = vld [vmem:[%s9558_s1 + $0x100] sm:$0xff]  }
  0x51   : > { %7297 = vmatpush3.bf16.msra.mxu1 %v7649_v28  ;;  %7345 = vmatpush3.bf16.msra.mxu0 %v7650_v40  ;;  %v823_v20 = vsel %vm7868_vm5, %v818_v18, %v822_v63  ;;  %v8022_v28 = vld [vmem:[%s9558_s1 + $0xd8] sm:$0xff]   ;;  %v841_v31 = vor.u32 %v840_v25, %v836_v24  ;;  %v849_v40 = vshrl.u32 %v671_v35, 16  ;;  %v837_v49 = vsel %vm7868_vm5, %v832_v37, %v836_v24 }
  0x52   : > { %7298 = vmatprep.subr.bf16.mxu1 %v7651_v50  ;;  %7346 = vmatprep.subr.bf16.mxu0 %v7652_v62  ;;  %v6167_v30 = vcombine.low %v813_v16, %v823_v20  ;;  %v1614_v54 = vsel %vm7849_vm4, %v1612_v44, %v1613_v38  ;;  %v864_v63 = vrot.slane %v862_v34, 4  ;;  %v1617_v6 = vrot.slane %v1493_v45, 5  ;;  %v1498_v34 = vld [vmem:[%s7778_s23 + $0x60] sm:$0xe] }
  0x53   : > { %v842_v42 = vrot.slane %v841_v31, 4  ;;  %v6224_v61 = vcombine.low %v1611_v43, %v1614_v54  ;;  %v1620_v7 = vrot.slane %v1494_v58, 5  ;;  %v873_v12 = vshrl.u32 %v674_v59, 16  ;;  %v679_v43 = vld [vmem:[%s7778_s23 + $0x68] sm:$0x1] }
  0x54   : > { %7219 = vmatmul.mubr.bf16.gmra.mxu1 %v6166_v55  ;;  %7267 = vmatmul.mubr.bf16.gmra.mxu0 %v6222_v57  ;;  %v860_v55 = vrot.slane %v858_v47, 5  ;;  %v868_v57 = vshll.u32 %v673_v39, 16  ;;  %v876_v13 = vshll.u32 %v674_v59, 16  ;;  %v1618_v15 = vsel %vm7849_vm4, %v6193_v5, %v1617_v6  ;;  %v677_v39 = vld [vmem:[%s7778_s23 + $0x60] sm:$0xf] }
  0x55   : > { %7299 = vmatpush3.bf16.msra.mxu1 %v7651_v50  ;;  %7347 = vmatpush3.bf16.msra.mxu0 %v7652_v62  ;;  %v851_v50 = vrot.slane %v849_v40, 4  ;;  %v847_v53 = vsel %vm7868_vm5, %v842_v42, %v846_v32  ;;  %v1619_v16 = vrot.slane %v1617_v6, 4  ;;  %v882_v18 = vshll.u32 %v675_v0, 16  ;;  %v8076_v32 = vld [vmem:[%s9558_s1 + $0xc0] sm:$0xff]   ;;  %v681_v5 = vld [vmem:[%s7778_s23 + $0x70] sm:$0xf] }
  0x56   : > { %7270 = vmatprep.mubr.bf16.mxu0 %v6223_v1  ;;  %7300 = vmatprep.subr.bf16.mxu1 %v7653_v22  ;;  %v6168_v60 = vcombine.low %v837_v49, %v847_v53  ;;  %v870_v4 = vrot.slane %v868_v57, 5  ;;  %v865_v10 = vor.u32 %v864_v63, %v860_v55  ;;  %v886_v19 = vshrl.u32 %v675_v0, 16  ;;  %v678_v40 = vld [vmem:[%s7778_s23 + $0x64] sm:$0xf]  ;;  %v8095_v57 = vld [vmem:[%s9558_s1 + $0x178] sm:$0xff]  }
  0x57   : > { %7222 = vmatprep.mubr.bf16.mxu1 %v6167_v30  ;;  %7348 = vmatprep.subr.bf16.mxu0 %v7654_v27  ;;  %v855_v62 = vor.u32 %v854_v51, %v851_v50  ;;  %v875_v24 = vrot.slane %v873_v12, 4  ;;  %v878_v25 = vrot.slane %v876_v13, 5  ;;  %v884_v20 = vrot.slane %v882_v18, 5  ;;  %v680_v63 = vld [vmem:[%s7778_s23 + $0x6c] sm:$0xf] }
  0x58   : > { %v866_v23 = vrot.slane %v865_v10, 4  ;;  %v888_v1 = vrot.slane %v886_v19, 4  ;;  %v892_v11 = vshll.u32 %v676_v2, 16  ;;  %v6194_v31 = vrot.slane %v1495_v8, 9  ;;  %v682_v6 = vld [vmem:[%s7778_s23 + $0x74] sm:$0x1] }
  0x59   : > { %7301 = vmatpush3.bf16.msra.mxu1 %v7653_v22  ;;  %7349 = vmatpush3.bf16.msra.mxu0 %v7654_v27  ;;  %v856_v9 = vrot.slane %v855_v62, 4  ;;  %v1621_v27 = vsel %vm7849_vm4, %v1619_v16, %v1620_v7  ;;  %v879_v30 = vor.u32 %v878_v25, %v875_v24  ;;  %v1624_v38 = vrot.slane %v1496_v14, 5  ;;  %v1500_v62 = vld [vmem:[%s7778_s23 + $0x68] sm:$0x1]  ;;  %v8110_v7 = vld [vmem:[%s9558_s1 + $0x1b8] sm:$0xff]  }
  0x5a   : > { %7302 = vmatprep.subr.bf16.mxu1 %v8022_v28  ;;  %7350 = vmatprep.subr.bf16.mxu0 %v8027_v29  ;;  %v889_v36 = vor.u32 %v888_v1, %v884_v20  ;;  %v894_v37 = vrot.slane %v892_v11, 5  ;;  %v1627_v42 = vrot.slane %v1497_v21, 5  ;;  %v897_v44 = vshrl.u32 %v677_v39, 16  ;;  %v1501_v13 = vld [vmem:[%s7778_s23 + $0x6c] sm:$0xe] }
  0x5b   : > { %v861_v22 = vsel %vm7868_vm5, %v856_v9, %v860_v55  ;;  %v880_v41 = vrot.slane %v879_v30, 4  ;;  %v900_v47 = vshll.u32 %v677_v39, 16  ;;  %v1625_v49 = vsel %vm7849_vm4, %v6194_v31, %v1624_v38  ;;  %v1499_v55 = vld [vmem:[%s7778_s23 + $0x64] sm:$0xf]  ;;  %v1502_v19 = vld [vmem:[%s7778_s23 + $0x70] sm:$0xf] }
  0x5c   : > { %7223 = vmatmul.mubr.bf16.gmra.mxu1 %v6168_v60  ;;  %7271 = vmatmul.mubr.bf16.gmra.mxu0 %v6224_v61  ;;  %v890_v48 = vrot.slane %v889_v36, 4  ;;  %v1626_v50 = vrot.slane %v1624_v38, 4  ;;  %v906_v51 = vshll.u32 %v678_v40, 16  ;;  %v910_v54 = vshrl.u32 %v678_v40, 16  ;;  %v1503_v25 = vld [vmem:[%s7778_s23 + $0x74] sm:$0x1] }
  0x5d   : > { %7303 = vmatpush3.bf16.msra.mxu1 %v8022_v28  ;;  %7351 = vmatpush3.bf16.msra.mxu0 %v8027_v29  ;;  %v871_v28 = vsel %vm7868_vm5, %v866_v23, %v870_v4  ;;  %v6225_v29 = vcombine.low %v1618_v15, %v1621_v27  ;;  %v885_v45 = vsel %vm7868_vm5, %v880_v41, %v884_v20  ;;  %v902_v53 = vrot.slane %v900_v47, 5  ;;  %v683_v39 = vld [vmem:[%s7778_s23 + $0x78] sm:$0xf]  ;;  %v684_v40 = vld [vmem:[%s7778_s23 + $0x7c] sm:$0xf] }
  0x5e   : > { %7304 = vmatprep.subr.bf16.mxu1 %v7657_v52  ;;  %7352 = vmatprep.subr.bf16.mxu0 %v7658_v3  ;;  %v6169_v35 = vcombine.low %v861_v22, %v871_v28  ;;  %v895_v58 = vsel %vm7868_vm5, %v890_v48, %v894_v37  ;;  %v1628_v59 = vsel %vm7849_vm4, %v1626_v50, %v1627_v42  ;;  %v908_v60 = vrot.slane %v906_v51, 5 }
  0x5f   : > { %7274 = vmatprep.mubr.bf16.mxu0 %v6225_v29  ;;  %v916_v61 = vshll.u32 %v679_v43, 16  ;;  %v6170_v0 = vcombine.low %v885_v45, %v895_v58  ;;  %v6226_v2 = vcombine.low %v1625_v49, %v1628_v59  ;;  %v912_v4 = vrot.slane %v910_v54, 4  ;;  %v685_v43 = vld [vmem:[%s7778_s23 + $0x80] sm:$0x1] }
  0x60   : > { %7226 = vmatprep.mubr.bf16.mxu1 %v6169_v35  ;;  %v6195_v9 = vrot.slane %v1498_v34, 9  ;;  %v1631_v10 = vrot.slane %v1499_v55, 5  ;;  %v1634_v12 = vrot.slane %v1500_v62, 5  ;;  %v921_v16 = vshrl.u32 %v680_v63, 16  ;;  %v1504_v34 = vld [vmem:[%s7778_s23 + $0x78] sm:$0xe] }
  0x61   : > { %7305 = vmatpush3.bf16.msra.mxu1 %v7657_v52  ;;  %7353 = vmatpush3.bf16.msra.mxu0 %v7658_v3  ;;  %v899_v52 = vrot.slane %v897_v44, 4  ;;  %v918_v8 = vrot.slane %v916_v61, 5  ;;  %v913_v15 = vor.u32 %v912_v4, %v908_v60  ;;  %v924_v18 = vshll.u32 %v680_v63, 16  ;;  %v1505_v55 = vld [vmem:[%s7778_s23 + $0x7c] sm:$0xf] }
  0x62   : > { %7306 = vmatprep.subr.bf16.mxu1 %v7659_v26  ;;  %7354 = vmatprep.subr.bf16.mxu0 %v7660_v17  ;;  %v1632_v21 = vsel %vm7849_vm4, %v6195_v9, %v1631_v10  ;;  %v1633_v22 = vrot.slane %v1631_v10, 4  ;;  %v930_v23 = vshll.u32 %v681_v5, 16  ;;  %v934_v24 = vshrl.u32 %v681_v5, 16  ;;  %v1506_v62 = vld [vmem:[%s7778_s23 + $0x80] sm:$0x1] }
  0x63   : > { %v903_v3 = vor.u32 %v902_v53, %v899_v52  ;;  %v914_v27 = vrot.slane %v913_v15, 4  ;;  %v923_v20 = vrot.slane %v921_v16, 4  ;;  %v926_v1 = vrot.slane %v924_v18, 5  ;;  %v686_v63 = vld [vmem:[%s7778_s23 + $0x84] sm:$0xf] }
  0x64   : > { %7227 = vmatmul.mubr.bf16.gmra.mxu1 %v6170_v0  ;;  %7275 = vmatmul.mubr.bf16.gmra.mxu0 %v6226_v2  ;;  %v1635_v11 = vsel %vm7849_vm4, %v1633_v22, %v1634_v12  ;;  %v936_v28 = vrot.slane %v934_v24, 4  ;;  %v940_v29 = vshll.u32 %v682_v6, 16  ;;  %v1638_v38 = vrot.slane %v1502_v19, 5  ;;  %v687_v5 = vld [vmem:[%s7778_s23 + $0x88] sm:$0xf] }
  0x65   : > { %7307 = vmatpush3.bf16.msra.mxu1 %v7659_v26  ;;  %7355 = vmatpush3.bf16.msra.mxu0 %v7660_v17  ;;  %v904_v14 = vrot.slane %v903_v3, 4  ;;  %v932_v17 = vrot.slane %v930_v23, 5  ;;  %v919_v30 = vsel %vm7868_vm5, %v914_v27, %v918_v8  ;;  %v6227_v31 = vcombine.low %v1632_v21, %v1635_v11  ;;  %v688_v6 = vld [vmem:[%s7778_s23 + $0x8c] sm:$0x1]  ;;  %v1508_v19 = vld [vmem:[%s7778_s23 + $0x88] sm:$0xf] }
  0x66   : > { %7308 = vmatprep.subr.bf16.mxu1 %v8076_v32  ;;  %7356 = vmatprep.subr.bf16.mxu0 %v8081_v33  ;;  %v942_v37 = vrot.slane %v940_v29, 5  ;;  %v1641_v42 = vrot.slane %v1503_v25, 5  ;;  %v945_v44 = vshrl.u32 %v683_v39, 16  ;;  %v948_v47 = vshll.u32 %v683_v39, 16  ;;  %v1509_v25 = vld [vmem:[%s7778_s23 + $0x8c] sm:$0x1] }
  0x67   : > { %v909_v26 = vsel %vm7868_vm5, %v904_v14, %v908_v60  ;;  %v937_v36 = vor.u32 %v936_v28, %v932_v17  ;;  %7278 = vmatprep.mubr.bf16.mxu0 %v6227_v31  ;;  %v1640_v50 = vrot.slane %v1638_v38, 4  ;;  %v954_v51 = vshll.u32 %v684_v40, 16  ;;  %v689_v39 = vld [vmem:[%s7778_s23 + $0x90] sm:$0xf] }
  0x68   : > { %v6171_v35 = vcombine.low %v909_v26, %v919_v30  ;;  %v947_v52 = vrot.slane %v945_v44, 4  ;;  %v950_v53 = vrot.slane %v948_v47, 5  ;;  %v958_v54 = vshrl.u32 %v684_v40, 16  ;;  %v690_v40 = vld [vmem:[%s7778_s23 + $0x94] sm:$0xf] }
  0x69   : > { %7309 = vmatpush3.bf16.msra.mxu1 %v8076_v32  ;;  %7357 = vmatpush3.bf16.msra.mxu0 %v8081_v33  ;;  %v927_v32 = vor.u32 %v926_v1, %v923_v20  ;;  %v6196_v33 = vrot.slane %v1501_v13, 9  ;;  %v938_v48 = vrot.slane %v937_v36, 4  ;;  %v1642_v59 = vsel %vm7849_vm4, %v1640_v50, %v1641_v42  ;;  %v1507_v13 = vld [vmem:[%s7778_s23 + $0x84] sm:$0xe] }
  0x6a   : > { %7390 = vmatprep.subr.bf16.mxu1 %v8095_v57  ;;  %7438 = vmatprep.subr.bf16.mxu0 %v8110_v7  ;;  %v956_v60 = vrot.slane %v954_v51, 5  ;;  %v964_v61 = vshll.u32 %v685_v43, 16  ;;  %v951_v3 = vor.u32 %v950_v53, %v947_v52  ;;  %v960_v4 = vrot.slane %v958_v54, 4  ;;  %v691_v43 = vld [vmem:[%s7778_s23 + $0x98] sm:$0x1] }
  0x6b   : > { %v928_v41 = vrot.slane %v927_v32, 4  ;;  %7230 = vmatprep.mubr.bf16.mxu1 %v6171_v35  ;;  %v1639_v49 = vsel %vm7849_vm4, %v6196_v33, %v1638_v38  ;;  %v943_v58 = vsel %vm7868_vm5, %v938_v48, %v942_v37  ;;  %v6197_v9 = vrot.slane %v1504_v34, 9  ;;  %v1510_v34 = vld [vmem:[%s7778_s23 + $0x90] sm:$0xe] }
  0x6c   : > { %v6228_v2 = vcombine.low %v1639_v49, %v1642_v59  ;;  %v966_v8 = vrot.slane %v964_v61, 5  ;;  %v1645_v10 = vrot.slane %v1505_v55, 5  ;;  %v1648_v12 = vrot.slane %v1506_v62, 5  ;;  %v1511_v55 = vld [vmem:[%s7778_s23 + $0x94] sm:$0xf] }
  0x6d   : > { %v933_v45 = vsel %vm7868_vm5, %v928_v41, %v932_v17  ;;  %v952_v14 = vrot.slane %v951_v3, 4  ;;  %v961_v15 = vor.u32 %v960_v4, %v956_v60  ;;  %v969_v16 = vshrl.u32 %v686_v63, 16  ;;  %v1512_v62 = vld [vmem:[%s7778_s23 + $0x98] sm:$0x1] }
  0x6e   : > { %v6172_v0 = vcombine.low %v933_v45, %v943_v58  ;;  %7279 = vmatmul.mubr.bf16.gmra.mxu0 %v6228_v2  ;;  %v972_v18 = vshll.u32 %v686_v63, 16  ;;  %v1646_v21 = vsel %vm7849_vm4, %v6197_v9, %v1645_v10  ;;  %v1647_v22 = vrot.slane %v1645_v10, 4  ;;  %v692_v63 = vld [vmem:[%s7778_s23 + $0x9c] sm:$0xf] }
  0x6f   : > { %v978_v23 = vshll.u32 %v687_v5, 16  ;;  %v982_v24 = vshrl.u32 %v687_v5, 16  ;;  %v957_v26 = vsel %vm7868_vm5, %v952_v14, %v956_v60  ;;  %v962_v27 = vrot.slane %v961_v15, 4  ;;  %v693_v5 = vld [vmem:[%s7778_s23 + $0xa0] sm:$0xf] }
  0x70   : > { %7231 = vmatmul.mubr.bf16.gmra.mxu1 %v6172_v0  ;;  %v971_v20 = vrot.slane %v969_v16, 4  ;;  %v974_v1 = vrot.slane %v972_v18, 5  ;;  %v1649_v11 = vsel %vm7849_vm4, %v1647_v22, %v1648_v12  ;;  %v988_v29 = vshll.u32 %v688_v6, 16  ;;  %v694_v6 = vld [vmem:[%s7778_s23 + $0xa4] sm:$0x1] }
  0x71   : > { %v980_v17 = vrot.slane %v978_v23, 5  ;;  %v984_v28 = vrot.slane %v982_v24, 4  ;;  %v967_v30 = vsel %vm7868_vm5, %v962_v27, %v966_v8  ;;  %v6229_v31 = vcombine.low %v1646_v21, %v1649_v11 }
  0x72   : > { %v975_v32 = vor.u32 %v974_v1, %v971_v20  ;;  %v6198_v33 = vrot.slane %v1507_v13, 9  ;;  %v6173_v35 = vcombine.low %v957_v26, %v967_v30  ;;  %v990_v37 = vrot.slane %v988_v29, 5  ;;  %v1513_v13 = vld [vmem:[%s7778_s23 + $0x9c] sm:$0xe] }
  0x73   : > { %v985_v36 = vor.u32 %v984_v28, %v980_v17  ;;  %v1652_v38 = vrot.slane %v1508_v19, 5  ;;  %7282 = vmatprep.mubr.bf16.mxu0 %v6229_v31  ;;  %v1655_v42 = vrot.slane %v1509_v25, 5  ;;  %v993_v44 = vshrl.u32 %v689_v39, 16  ;;  %v1514_v19 = vld [vmem:[%s7778_s23 + $0xa0] sm:$0xf] }
  0x74   : > { %v976_v41 = vrot.slane %v975_v32, 4  ;;  %v996_v47 = vshll.u32 %v689_v39, 16  ;;  %7234 = vmatprep.mubr.bf16.mxu1 %v6173_v35  ;;  %v1002_v51 = vshll.u32 %v690_v40, 16  ;;  %v1006_v54 = vshrl.u32 %v690_v40, 16  ;;  %v1515_v25 = vld [vmem:[%s7778_s23 + $0xa4] sm:$0x1] }
  0x75   : > { %v986_v48 = vrot.slane %v985_v36, 4  ;;  %v1653_v49 = vsel %vm7849_vm4, %v6198_v33, %v1652_v38  ;;  %v1654_v50 = vrot.slane %v1652_v38, 4  ;;  %v995_v52 = vrot.slane %v993_v44, 4  ;;  %v695_v39 = vld [vmem:[%s7778_s23 + $0xa8] sm:$0xf] }
  0x76   : > { %v981_v45 = vsel %vm7868_vm5, %v976_v41, %v980_v17  ;;  %v998_v53 = vrot.slane %v996_v47, 5  ;;  %v1004_v60 = vrot.slane %v1002_v51, 5  ;;  %v1012_v61 = vshll.u32 %v691_v43, 16  ;;  %v696_v40 = vld [vmem:[%s7778_s23 + $0xac] sm:$0xf] }
  0x77   : > { %v991_v58 = vsel %vm7868_vm5, %v986_v48, %v990_v37  ;;  %v1656_v59 = vsel %vm7849_vm4, %v1654_v50, %v1655_v42  ;;  %v1008_v4 = vrot.slane %v1006_v54, 4  ;;  %v6199_v9 = vrot.slane %v1510_v34, 9  ;;  %v697_v43 = vld [vmem:[%s7778_s23 + $0xb0] sm:$0x1]  ;;  %v1516_v34 = vld [vmem:[%s7778_s23 + $0xa8] sm:$0xe] }
  0x78   : > { %v6174_v0 = vcombine.low %v981_v45, %v991_v58  ;;  %v6230_v2 = vcombine.low %v1653_v49, %v1656_v59  ;;  %v999_v3 = vor.u32 %v998_v53, %v995_v52  ;;  %v1014_v8 = vrot.slane %v1012_v61, 5 }
  0x79   : > { %v1659_v10 = vrot.slane %v1511_v55, 5  ;;  %v1662_v12 = vrot.slane %v1512_v62, 5  ;;  %v1009_v15 = vor.u32 %v1008_v4, %v1004_v60  ;;  %v1017_v16 = vshrl.u32 %v692_v63, 16  ;;  %v1517_v55 = vld [vmem:[%s7778_s23 + $0xac] sm:$0xf] }
  0x7a   : > { %7235 = vmatmul.mubr.bf16.gmra.mxu1 %v6174_v0  ;;  %7283 = vmatmul.mubr.bf16.gmra.mxu0 %v6230_v2  ;;  %v1000_v14 = vrot.slane %v999_v3, 4  ;;  %v1020_v18 = vshll.u32 %v692_v63, 16  ;;  %v1026_v23 = vshll.u32 %v693_v5, 16  ;;  %v1030_v24 = vshrl.u32 %v693_v5, 16  ;;  %v1518_v62 = vld [vmem:[%s7778_s23 + $0xb0] sm:$0x1] }
  0x7b   : > { %v1660_v21 = vsel %vm7849_vm4, %v6199_v9, %v1659_v10  ;;  %v1661_v22 = vrot.slane %v1659_v10, 4  ;;  %v1010_v27 = vrot.slane %v1009_v15, 4  ;;  %v1019_v20 = vrot.slane %v1017_v16, 4  ;;  %v698_v63 = vld [vmem:[%s7778_s23 + $0xb4] sm:$0xf] }
  0x7c   : > { %v1005_v26 = vsel %vm7868_vm5, %v1000_v14, %v1004_v60  ;;  %v1022_v1 = vrot.slane %v1020_v18, 5  ;;  %v1028_v17 = vrot.slane %v1026_v23, 5  ;;  %v1032_v28 = vrot.slane %v1030_v24, 4  ;;  %v699_v5 = vld [vmem:[%s7778_s23 + $0xb8] sm:$0xf] }
  0x7d   : > { %v1663_v11 = vsel %vm7849_vm4, %v1661_v22, %v1662_v12  ;;  %v1036_v29 = vshll.u32 %v694_v6, 16  ;;  %v1015_v30 = vsel %vm7868_vm5, %v1010_v27, %v1014_v8  ;;  %v6200_v33 = vrot.slane %v1513_v13, 9  ;;  %v700_v6 = vld [vmem:[%s7778_s23 + $0xbc] sm:$0x1]  ;;  %v1519_v13 = vld [vmem:[%s7778_s23 + $0xb4] sm:$0xe] }
  0x7e   : > { %v6231_v31 = vcombine.low %v1660_v21, %v1663_v11  ;;  %v1023_v32 = vor.u32 %v1022_v1, %v1019_v20  ;;  %v6175_v35 = vcombine.low %v1005_v26, %v1015_v30  ;;  %v1033_v36 = vor.u32 %v1032_v28, %v1028_v17 }
  0x7f   : > { %v1038_v37 = vrot.slane %v1036_v29, 5  ;;  %v1666_v38 = vrot.slane %v1514_v19, 5  ;;  %v1669_v42 = vrot.slane %v1515_v25, 5  ;;  %v1041_v44 = vshrl.u32 %v695_v39, 16  ;;  %v1520_v19 = vld [vmem:[%s7778_s23 + $0xb8] sm:$0xf] }
  0x80   : > { %7286 = vmatprep.mubr.bf16.mxu0 %v6231_v31  ;;  %v1024_v41 = vrot.slane %v1023_v32, 4  ;;  %v1044_v47 = vshll.u32 %v695_v39, 16  ;;  %7238 = vmatprep.mubr.bf16.mxu1 %v6175_v35  ;;  %v1034_v48 = vrot.slane %v1033_v36, 4  ;;  %v1050_v51 = vshll.u32 %v696_v40, 16  ;;  %v1521_v25 = vld [vmem:[%s7778_s23 + $0xbc] sm:$0x1] }
  0x81   : > { %v1667_v49 = vsel %vm7849_vm4, %v6200_v33, %v1666_v38  ;;  %v1668_v50 = vrot.slane %v1666_v38, 4  ;;  %v1043_v52 = vrot.slane %v1041_v44, 4  ;;  %v1054_v54 = vshrl.u32 %v696_v40, 16 }
  0x82   : > { %v1029_v45 = vsel %vm7868_vm5, %v1024_v41, %v1028_v17  ;;  %v1046_v53 = vrot.slane %v1044_v47, 5  ;;  %v1039_v58 = vsel %vm7868_vm5, %v1034_v48, %v1038_v37  ;;  %v1052_v60 = vrot.slane %v1050_v51, 5  ;;  %v6315_v41 = vld [vmem:[%s7778_s23 + $0xc] sm:$0xf]  ;;  %v6317_v48 = vld [vmem:[%s7778_s23 + $0x14] sm:$0x1] }
  0x83   : > { %v1670_v59 = vsel %vm7849_vm4, %v1668_v50, %v1669_v42  ;;  %v1060_v61 = vshll.u32 %v697_v43, 16  ;;  %v6176_v0 = vcombine.low %v1029_v45, %v1039_v58  ;;  %v1056_v4 = vrot.slane %v1054_v54, 4  ;;  %v6316_v42 = vld [vmem:[%s7778_s23 + $0x10] sm:$0xf] }
  0x84   : > { %v6232_v2 = vcombine.low %v1667_v49, %v1670_v59  ;;  %v1047_v3 = vor.u32 %v1046_v53, %v1043_v52  ;;  %v6201_v9 = vrot.slane %v1516_v34, 9  ;;  %v1673_v10 = vrot.slane %v1517_v55, 5  ;;  %v7663_v51 = vld [vmem:[%s7778_s23 + $0xc] sm:$0xff]   ;;  %v6318_v59 = vld [vmem:[%s7778_s23 + $0x18] sm:$0xf] }
  0x85   : > { %v1062_v8 = vrot.slane %v1060_v61, 5  ;;  %v1676_v12 = vrot.slane %v1518_v62, 5  ;;  %7239 = vmatmul.mubr.bf16.gmra.mxu1 %v6176_v0  ;;  %v1057_v15 = vor.u32 %v1056_v4, %v1052_v60  ;;  %v1065_v16 = vshrl.u32 %v698_v63, 16  ;;  %v6319_v0 = vld [vmem:[%s7778_s23 + $0x1c] sm:$0xf] }
  0x86   : > { %7287 = vmatmul.mubr.bf16.gmra.mxu0 %v6232_v2  ;;  %v1048_v14 = vrot.slane %v1047_v3, 4  ;;  %v1068_v18 = vshll.u32 %v698_v63, 16  ;;  %v1674_v21 = vsel %vm7849_vm4, %v6201_v9, %v1673_v10  ;;  %v1675_v22 = vrot.slane %v1673_v10, 4  ;;  %v6320_v2 = vld [vmem:[%s7778_s23 + $0x20] sm:$0x1] }
  0x87   : > { %v1074_v23 = vshll.u32 %v699_v5, 16  ;;  %v1078_v24 = vshrl.u32 %v699_v5, 16  ;;  %v1058_v27 = vrot.slane %v1057_v15, 4  ;;  %v1067_v20 = vrot.slane %v1065_v16, 4 }
  0x88   : > { %v1053_v26 = vsel %vm7868_vm5, %v1048_v14, %v1052_v60  ;;  %v1070_v1 = vrot.slane %v1068_v18, 5  ;;  %v1677_v11 = vsel %vm7849_vm4, %v1675_v22, %v1676_v12  ;;  %v1084_v29 = vshll.u32 %v700_v6, 16  ;;  %v7664_v18 = vld [vmem:[%s7778_s23 + $0x18] sm:$0xff]  }
  0x89   : > { %v1076_v17 = vrot.slane %v1074_v23, 5  ;;  %v1080_v28 = vrot.slane %v1078_v24, 4  ;;  %v1063_v30 = vsel %vm7868_vm5, %v1058_v27, %v1062_v8  ;;  %v6233_v31 = vcombine.low %v1674_v21, %v1677_v11 }
  0x8a   : > { %v1071_v32 = vor.u32 %v1070_v1, %v1067_v20  ;;  %v6202_v33 = vrot.slane %v1519_v13, 9  ;;  %v6177_v35 = vcombine.low %v1053_v26, %v1063_v30  ;;  %v1086_v37 = vrot.slane %v1084_v29, 5  ;;  %v6322_v20 = vld [vmem:[%s7778_s23 + $0x28] sm:$0xf]  ;;  %v6323_v1 = vld [vmem:[%s7778_s23 + $0x2c] sm:$0x1] }
  0x8b   : > { %v1081_v36 = vor.u32 %v1080_v28, %v1076_v17  ;;  %v1680_v38 = vrot.slane %v1520_v19, 5  ;;  %7290 = vmatprep.mubr.bf16.mxu0 %v6233_v31  ;;  %v1683_v40 = vrot.slane %v1521_v25, 5  ;;  %v2571_v49 = vshrl.u32 %v6315_v41, 16  ;;  %v6321_v25 = vld [vmem:[%s7778_s23 + $0x24] sm:$0xf] }
  0x8c   : > { %v1072_v39 = vrot.slane %v1071_v32, 4  ;;  %7242 = vmatprep.mubr.bf16.mxu1 %v6177_v35  ;;  %v2574_v34 = vshll.u32 %v6315_v41, 16  ;;  %v2580_v45 = vshll.u32 %v6316_v42, 16  ;;  %v2584_v52 = vshrl.u32 %v6316_v42, 16  ;;  %v7667_v30 = vld [vmem:[%s7778_s23 + $0x24] sm:$0xff]  }
  0x8d   : > { %v1082_v43 = vrot.slane %v1081_v36, 4  ;;  %v1681_v44 = vsel %vm7849_vm4, %v6202_v33, %v1680_v38  ;;  %v1682_v47 = vrot.slane %v1680_v38, 4  ;;  %v2573_v55 = vrot.slane %v2571_v49, 4  ;;  %v7669_v38 = vld [vmem:[%s9558_s1 + $0x170] sm:$0xff]  }
  0x8e   : > { %v1077_v50 = vsel %vm7868_vm5, %v1072_v39, %v1076_v17  ;;  %v2590_v58 = vshll.u32 %v6317_v48, 16  ;;  %v2576_v62 = vrot.slane %v2574_v34, 5  ;;  %v2582_v63 = vrot.slane %v2580_v45, 5  ;;  %v6325_v49 = vld [vmem:[%s7778_s23 + $0x34] sm:$0xf]  ;;  %v7673_v45 = vld [vmem:[%s9558_s1 + $0x168] sm:$0xff]  }
  0x8f   : > { %v1087_v53 = vsel %vm7868_vm5, %v1082_v43, %v1086_v37  ;;  %v1684_v54 = vsel %vm7849_vm4, %v1682_v47, %v1683_v40  ;;  %v2586_v3 = vrot.slane %v2584_v52, 4  ;;  %v2595_v5 = vshrl.u32 %v6318_v59, 16  ;;  %v6324_v43 = vld [vmem:[%s7778_s23 + $0x30] sm:$0xf] }
  0x90   : > { %v6178_v60 = vcombine.low %v1077_v50, %v1087_v53  ;;  %v6234_v61 = vcombine.low %v1681_v44, %v1684_v54  ;;  %v2592_v4 = vrot.slane %v2590_v58, 5  ;;  %v2598_v6 = vshll.u32 %v6318_v59, 16  ;;  %v7670_v44 = vld [vmem:[%s9558_s1 + $0x1b0] sm:$0xff]   ;;  %v6326_v50 = vld [vmem:[%s7778_s23 + $0x38] sm:$0x1] }
  0x91   : > { %v2577_v8 = vor.u32 %v2576_v62, %v2573_v55  ;;  %v2604_v9 = vshll.u32 %v6319_v0, 16  ;;  %v2608_v10 = vshrl.u32 %v6319_v0, 16  ;;  %v2614_v12 = vshll.u32 %v6320_v2, 16  ;;  %v7668_v59 = vld [vmem:[%s7778_s23 + $0x30] sm:$0xff]  }
  0x92   : > { %7243 = vmatmul.mubr.bf16.gmra.mxu1 %v6178_v60  ;;  %7291 = vmatmul.mubr.bf16.gmra.mxu0 %v6234_v61  ;;  %v2587_v13 = vor.u32 %v2586_v3, %v2582_v63  ;;  %v2597_v14 = vrot.slane %v2595_v5, 4  ;;  %v2600_v15 = vrot.slane %v2598_v6, 5  ;;  %v2619_v11 = vshrl.u32 %v6321_v25, 16  ;;  %v7671_v3 = vld [vmem:[%s7778_s23 + $0x3c] sm:$0xff]   ;;  %v7674_v6 = vld [vmem:[%s9558_s1 + $0x1a8] sm:$0xff]  }
  0x93   : > { %7310 = vmatprep.mubr.bf16.mxu1 %v7663_v51  ;;  %v2578_v16 = vrot.slane %v2577_v8, 4  ;;  %v2606_v19 = vrot.slane %v2604_v9, 5  ;;  %v2610_v21 = vrot.slane %v2608_v10, 4  ;;  %v2616_v24 = vrot.slane %v2614_v12, 5  ;;  %v6327_v10 = vld [vmem:[%s7778_s23 + $0x3c] sm:$0xf] }
  0x94   : > { %v2588_v22 = vrot.slane %v2587_v13, 4  ;;  %v2601_v23 = vor.u32 %v2600_v15, %v2597_v14  ;;  %v2622_v17 = vshll.u32 %v6321_v25, 16  ;;  %v2628_v31 = vshll.u32 %v6322_v20, 16  ;;  %v6328_v12 = vld [vmem:[%s7778_s23 + $0x40] sm:$0xf] }
  0x95   : > { %v2583_v26 = vsel %vm7868_vm5, %v2578_v16, %v2582_v63  ;;  %v2611_v27 = vor.u32 %v2610_v21, %v2606_v19  ;;  %v2632_v32 = vshrl.u32 %v6322_v20, 16  ;;  %v2621_v36 = vrot.slane %v2619_v11, 4  ;;  %v6329_v16 = vld [vmem:[%s7778_s23 + $0x44] sm:$0x1]  ;;  %v6331_v20 = vld [vmem:[%s7778_s23 + $0x4c] sm:$0xf] }
  0x96   : > { %v2593_v28 = vsel %vm7868_vm5, %v2588_v22, %v2592_v4  ;;  %v2602_v29 = vrot.slane %v2601_v23, 4  ;;  %v2624_v37 = vrot.slane %v2622_v17, 5  ;;  %v2630_v40 = vrot.slane %v2628_v31, 5  ;;  %v7672_v31 = vld [vmem:[%s7778_s23 + $0x48] sm:$0xff]  }
  0x97   : > { %v6379_v33 = vcombine.low %v2583_v26, %v2593_v28  ;;  %v2612_v35 = vrot.slane %v2611_v27, 4  ;;  %v2634_v41 = vrot.slane %v2632_v32, 4  ;;  %v2638_v42 = vshll.u32 %v6323_v1, 16  ;;  %v6330_v27 = vld [vmem:[%s7778_s23 + $0x48] sm:$0xf] }
  0x98   : > { %v2607_v39 = vsel %vm7868_vm5, %v2602_v29, %v2606_v19  ;;  %v2625_v48 = vor.u32 %v2624_v37, %v2621_v36  ;;  %v2643_v51 = vshrl.u32 %v6324_v43, 16  ;;  %v2646_v34 = vshll.u32 %v6324_v43, 16  ;;  %v6332_v29 = vld [vmem:[%s7778_s23 + $0x50] sm:$0x1]  ;;  %v7678_v36 = vld [vmem:[%s9558_s1 + $0x1a0] sm:$0xff]  }
  0x99   : > { %7358 = vmatprep.mubr.bf16.mxu0 %v6379_v33  ;;  %v2617_v47 = vsel %vm7868_vm5, %v2612_v35, %v2616_v24  ;;  %v2635_v53 = vor.u32 %v2634_v41, %v2630_v40  ;;  %v2640_v54 = vrot.slane %v2638_v42, 5  ;;  %v2652_v55 = vshll.u32 %v6325_v49, 16  ;;  %v7681_v41 = vld [vmem:[%s9558_s1 + $0x158] sm:$0xff]  }
  0x9a   : > { %7311 = vmatmul.mubr.bf16.vlgmr.msra.gmra.mxu1 %v7664_v18  ;;  %v6380_v52 = vcombine.low %v2607_v39, %v2617_v47  ;;  %v2626_v58 = vrot.slane %v2625_v48, 4  ;;  %v2645_v60 = vrot.slane %v2643_v51, 4  ;;  %v2648_v61 = vrot.slane %v2646_v34, 5  ;;  %v7675_v51 = vld [vmem:[%s7778_s23 + $0x54] sm:$0xff]  }
  0x9b   : > { %7391 = vmatpush3.bf16.msra.mxu1 %v8095_v57  ;;  %7314 = vmatprep.mubr.bf16.mxu1 %v7667_v30  ;;  %v2656_v62 = vshrl.u32 %v6325_v49, 16  ;;  %v2636_v63 = vrot.slane %v2635_v53, 4  ;;  %v2654_v0 = vrot.slane %v2652_v55, 5  ;;  %v2662_v2 = vshll.u32 %v6326_v50, 16 }
  0x9c   : > { %7392 = vmatprep.subr.bf16.mxu1 %v7669_v38  ;;  %7359 = vmatmul.mubr.bf16.vlgmr.msra.gmra.mxu0 %v6380_v52  ;;  %v2631_v57 = vsel %vm7868_vm5, %v2626_v58, %v2630_v40  ;;  %v2649_v4 = vor.u32 %v2648_v61, %v2645_v60  ;;  %v2667_v18 = vshrl.u32 %v6327_v10, 16  ;;  %v2670_v19 = vshll.u32 %v6327_v10, 16  ;;  %v6333_v52 = vld [vmem:[%s7778_s23 + $0x54] sm:$0xf]  ;;  %v6334_v58 = vld [vmem:[%s7778_s23 + $0x58] sm:$0xf] }
  0x9d   : > { %7439 = vmatpush3.bf16.msra.mxu0 %v8110_v7  ;;  %v2658_v5 = vrot.slane %v2656_v62, 4  ;;  %v2641_v8 = vsel %vm7868_vm5, %v2636_v63, %v2640_v54  ;;  %v2664_v9 = vrot.slane %v2662_v2, 5  ;;  %v7677_v7 = vld [vmem:[%s9558_s1 + $0x160] sm:$0xff]   ;;  %v2676_v21 = vshll.u32 %v6328_v12, 16  ;;  %v7682_v61 = vld [vmem:[%s9558_s1 + $0x198] sm:$0xff]  }
  0x9e   : > { %7440 = vmatprep.subr.bf16.mxu0 %v7670_v44  ;;  %v6381_v13 = vcombine.low %v2631_v57, %v2641_v8  ;;  %v2650_v14 = vrot.slane %v2649_v4, 4  ;;  %v2680_v22 = vshrl.u32 %v6328_v12, 16  ;;  %v2686_v23 = vshll.u32 %v6329_v16, 16  ;;  %v7676_v12 = vld [vmem:[%s7778_s23 + $0x60] sm:$0xff]  }
  0x9f   : > { %7393 = vmatpush3.bf16.msra.mxu1 %v7669_v38  ;;  %v2659_v15 = vor.u32 %v2658_v5, %v2654_v0  ;;  %v2669_v26 = vrot.slane %v2667_v18, 4  ;;  %v2672_v1 = vrot.slane %v2670_v19, 5  ;;  %v2678_v11 = vrot.slane %v2676_v21, 5  ;;  %v6338_v18 = vld [vmem:[%s7778_s23 + $0x68] sm:$0x1]  ;;  %v7679_v21 = vld [vmem:[%s7778_s23 + $0x6c] sm:$0xff]  }
  0xa0   : > { %7394 = vmatprep.subr.bf16.mxu1 %v7673_v45  ;;  %7362 = vmatprep.mubr.bf16.mxu0 %v6381_v13  ;;  %v2655_v24 = vsel %vm7868_vm5, %v2650_v14, %v2654_v0  ;;  %v2682_v17 = vrot.slane %v2680_v22, 4  ;;  %v2688_v28 = vrot.slane %v2686_v23, 5  ;;  %v2691_v32 = vshrl.u32 %v6330_v27, 16  ;;  %v6337_v13 = vld [vmem:[%s7778_s23 + $0x64] sm:$0xf]  ;;  %v7686_v22 = vld [vmem:[%s9558_s1 + $0x190] sm:$0xff]  }
  0xa1   : > { %v2660_v25 = vrot.slane %v2659_v15, 4  ;;  %7441 = vmatpush3.bf16.msra.mxu0 %v7670_v44  ;;  %v2694_v33 = vshll.u32 %v6330_v27, 16  ;;  %v2700_v35 = vshll.u32 %v6331_v20, 16  ;;  %v2673_v38 = vor.u32 %v2672_v1, %v2669_v26 }
  0xa2   : > { %7315 = vmatmul.mubr.bf16.gmra.mxu1 %v7668_v59  ;;  %7442 = vmatprep.subr.bf16.mxu0 %v7674_v6  ;;  %v2683_v39 = vor.u32 %v2682_v17, %v2678_v11  ;;  %v2704_v40 = vshrl.u32 %v6331_v20, 16  ;;  %v2693_v42 = vrot.slane %v2691_v32, 4  ;;  %v2710_v47 = vshll.u32 %v6332_v29, 16  ;;  %v6335_v59 = vld [vmem:[%s7778_s23 + $0x5c] sm:$0x1]  ;;  %v7689_v17 = vld [vmem:[%s9558_s1 + $0x148] sm:$0xff]  }
  0xa3   : > { %7318 = vmatprep.mubr.bf16.mxu1 %v7671_v3  ;;  %v2665_v30 = vsel %vm7868_vm5, %v2660_v25, %v2664_v9  ;;  %7395 = vmatpush3.bf16.msra.mxu1 %v7673_v45  ;;  %v2696_v43 = vrot.slane %v2694_v33, 5  ;;  %v2702_v44 = vrot.slane %v2700_v35, 5  ;;  %v2674_v48 = vrot.slane %v2673_v38, 4  ;;  %v7685_v3 = vld [vmem:[%s9558_s1 + $0x150] sm:$0xff]  }
  0xa4   : > { %v6382_v37 = vcombine.low %v2655_v24, %v2665_v30  ;;  %7396 = vmatprep.subr.bf16.mxu1 %v7677_v7  ;;  %v2684_v49 = vrot.slane %v2683_v39, 4  ;;  %v2706_v50 = vrot.slane %v2704_v40, 4  ;;  %v2712_v45 = vrot.slane %v2710_v47, 5  ;;  %v6339_v39 = vld [vmem:[%s7778_s23 + $0x6c] sm:$0xf] }
  0xa5   : > { %v2697_v34 = vor.u32 %v2696_v43, %v2693_v42  ;;  %7443 = vmatpush3.bf16.msra.mxu0 %v7674_v6  ;;  %v2679_v53 = vsel %vm7868_vm5, %v2674_v48, %v2678_v11  ;;  %v2715_v60 = vshrl.u32 %v6333_v52, 16  ;;  %v2718_v0 = vshll.u32 %v6333_v52, 16  ;;  %v6340_v40 = vld [vmem:[%s7778_s23 + $0x70] sm:$0xf]  ;;  %v6341_v43 = vld [vmem:[%s7778_s23 + $0x74] sm:$0x1] }
  0xa6   : > { %7363 = vmatmul.mubr.bf16.gmra.mxu0 %v6382_v37  ;;  %v2689_v54 = vsel %vm7868_vm5, %v2684_v49, %v2688_v28  ;;  %v2707_v55 = vor.u32 %v2706_v50, %v2702_v44  ;;  %7444 = vmatprep.subr.bf16.mxu0 %v7678_v36  ;;  %v2724_v2 = vshll.u32 %v6334_v58, 16  ;;  %v2728_v5 = vshrl.u32 %v6334_v58, 16  ;;  %v7683_v58 = vld [vmem:[%s7778_s23 + $0x84] sm:$0xff]  }
  0xa7   : > { %7397 = vmatpush3.bf16.msra.mxu1 %v7677_v7  ;;  %v6383_v62 = vcombine.low %v2679_v53, %v2689_v54  ;;  %v2698_v63 = vrot.slane %v2697_v34, 4  ;;  %v2717_v4 = vrot.slane %v2715_v60, 4  ;;  %v2734_v6 = vshll.u32 %v6335_v59, 16  ;;  %v6336_v7 = vld [vmem:[%s7778_s23 + $0x60] sm:$0xf]  ;;  %v7680_v34 = vld [vmem:[%s7778_s23 + $0x78] sm:$0xff]  }
  0xa8   : > { %7398 = vmatprep.subr.bf16.mxu1 %v7681_v41  ;;  %v2708_v57 = vrot.slane %v2707_v55, 4  ;;  %v2720_v9 = vrot.slane %v2718_v0, 5  ;;  %v2726_v10 = vrot.slane %v2724_v2, 5  ;;  %v2730_v15 = vrot.slane %v2728_v5, 4  ;;  %v6342_v55 = vld [vmem:[%s7778_s23 + $0x78] sm:$0xf] }
  0xa9   : > { %7366 = vmatprep.mubr.bf16.mxu0 %v6383_v62  ;;  %v2703_v8 = vsel %vm7868_vm5, %v2698_v63, %v2702_v44  ;;  %7445 = vmatpush3.bf16.msra.mxu0 %v7678_v36  ;;  %v2736_v16 = vrot.slane %v2734_v6, 5  ;;  %v2739_v19 = vshrl.u32 %v6336_v7, 16  ;;  %v2742_v25 = vshll.u32 %v6336_v7, 16  ;;  %v7693_v36 = vld [vmem:[%s9558_s1 + $0x140] sm:$0xff]   ;;  %v6343_v63 = vld [vmem:[%s7778_s23 + $0x7c] sm:$0xf] }
  0xaa   : > { %7319 = vmatmul.mubr.bf16.gmra.mxu1 %v7672_v31  ;;  %v2713_v14 = vsel %vm7868_vm5, %v2708_v57, %v2712_v45  ;;  %7446 = vmatprep.subr.bf16.mxu0 %v7682_v61  ;;  %v2721_v24 = vor.u32 %v2720_v9, %v2717_v4  ;;  %v2748_v26 = vshll.u32 %v6337_v13, 16  ;;  %v2731_v27 = vor.u32 %v2730_v15, %v2726_v10  ;;  %v7690_v31 = vld [vmem:[%s9558_s1 + $0x188] sm:$0xff]   ;;  %v7694_v59 = vld [vmem:[%s9558_s1 + $0x180] sm:$0xff]   ;;  %v8337_v2 = vld [vmem:[%s9558_s1 + $0x1f8] sm:$0xff]  }
  0xab   : > { %7322 = vmatprep.mubr.bf16.mxu1 %v7675_v51  ;;  %7399 = vmatpush3.bf16.msra.mxu1 %v7681_v41  ;;  %v6384_v23 = vcombine.low %v2703_v8, %v2713_v14  ;;  %v2741_v20 = vrot.slane %v2739_v19, 4  ;;  %v2752_v1 = vshrl.u32 %v6337_v13, 16  ;;  %v2758_v11 = vshll.u32 %v6338_v18, 16  ;;  %v6344_v0 = vld [vmem:[%s7778_s23 + $0x80] sm:$0x1]  ;;  %v8344_v19 = vld [vmem:[%s9558_s1 + $0x238] sm:$0xff]  }
  0xac   : > { %7400 = vmatprep.subr.bf16.mxu1 %v7685_v3  ;;  %v2722_v28 = vrot.slane %v2721_v24, 4  ;;  %v2744_v29 = vrot.slane %v2742_v25, 5  ;;  %v2750_v30 = vrot.slane %v2748_v26, 5  ;;  %v2732_v32 = vrot.slane %v2731_v27, 4  ;;  %v6345_v24 = vld [vmem:[%s7778_s23 + $0x84] sm:$0xf] }
  0xad   : > { %v2754_v33 = vrot.slane %v2752_v1, 4  ;;  %v2760_v35 = vrot.slane %v2758_v11, 5  ;;  %7447 = vmatpush3.bf16.msra.mxu0 %v7682_v61  ;;  %v2763_v44 = vshrl.u32 %v6339_v39, 16  ;;  %v2766_v47 = vshll.u32 %v6339_v39, 16  ;;  %v6346_v25 = vld [vmem:[%s7778_s23 + $0x88] sm:$0xf] }
  0xae   : > { %7367 = vmatmul.mubr.bf16.gmra.mxu0 %v6384_v23  ;;  %v2727_v37 = vsel %vm7868_vm5, %v2722_v28, %v2726_v10  ;;  %v2745_v38 = vor.u32 %v2744_v29, %v2741_v20  ;;  %7448 = vmatprep.subr.bf16.mxu0 %v7686_v22  ;;  %v2737_v41 = vsel %vm7868_vm5, %v2732_v32, %v2736_v16  ;;  %v2772_v50 = vshll.u32 %v6340_v40, 16  ;;  %v6347_v20 = vld [vmem:[%s7778_s23 + $0x8c] sm:$0x1]  ;;  %v6348_v32 = vld [vmem:[%s7778_s23 + $0x90] sm:$0xf] }
  0xaf   : > { %7401 = vmatpush3.bf16.msra.mxu1 %v7685_v3  ;;  %v2755_v42 = vor.u32 %v2754_v33, %v2750_v30  ;;  %v6385_v48 = vcombine.low %v2727_v37, %v2737_v41  ;;  %v2776_v51 = vshrl.u32 %v6340_v40, 16  ;;  %v2765_v52 = vrot.slane %v2763_v44, 4  ;;  %v7687_v33 = vld [vmem:[%s7778_s23 + $0x9c] sm:$0xff]   ;;  %v6349_v39 = vld [vmem:[%s7778_s23 + $0x94] sm:$0xf] }
  0xb0   : > { %7402 = vmatprep.subr.bf16.mxu1 %v7689_v17  ;;  %v2746_v49 = vrot.slane %v2745_v38, 4  ;;  %v2768_v53 = vrot.slane %v2766_v47, 5  ;;  %v2782_v54 = vshll.u32 %v6341_v43, 16  ;;  %v2774_v61 = vrot.slane %v2772_v50, 5  ;;  %v6350_v43 = vld [vmem:[%s7778_s23 + $0x98] sm:$0x1] }
  0xb1   : > { %v2756_v45 = vrot.slane %v2755_v42, 4  ;;  %7449 = vmatpush3.bf16.msra.mxu0 %v7686_v22  ;;  %7370 = vmatprep.mubr.bf16.mxu0 %v6385_v48  ;;  %v2778_v62 = vrot.slane %v2776_v51, 4  ;;  %v2787_v5 = vshrl.u32 %v6342_v55, 16  ;;  %v2790_v9 = vshll.u32 %v6342_v55, 16 }
  0xb2   : > { %7323 = vmatmul.mubr.bf16.gmra.mxu1 %v7676_v12  ;;  %v2751_v60 = vsel %vm7868_vm5, %v2746_v49, %v2750_v30  ;;  %7450 = vmatprep.subr.bf16.mxu0 %v7690_v31  ;;  %v2769_v57 = vor.u32 %v2768_v53, %v2765_v52  ;;  %v2784_v4 = vrot.slane %v2782_v54, 5  ;;  %v2796_v10 = vshll.u32 %v6343_v63, 16 }
  0xb3   : > { %7326 = vmatprep.mubr.bf16.mxu1 %v7679_v21  ;;  %7403 = vmatpush3.bf16.msra.mxu1 %v7689_v17  ;;  %v2761_v3 = vsel %vm7868_vm5, %v2756_v45, %v2760_v35  ;;  %v2779_v8 = vor.u32 %v2778_v62, %v2774_v61  ;;  %v2789_v7 = vrot.slane %v2787_v5, 4  ;;  %v2800_v13 = vshrl.u32 %v6343_v63, 16  ;;  %v7684_v17 = vld [vmem:[%s7778_s23 + $0x90] sm:$0xff]  }
  0xb4   : > { %7404 = vmatprep.subr.bf16.mxu1 %v7693_v36  ;;  %v6386_v6 = vcombine.low %v2751_v60, %v2761_v3  ;;  %v2770_v12 = vrot.slane %v2769_v57, 4  ;;  %v2806_v14 = vshll.u32 %v6344_v0, 16  ;;  %v2792_v16 = vrot.slane %v2790_v9, 5  ;;  %v6351_v3 = vld [vmem:[%s7778_s23 + $0x9c] sm:$0xf] }
  0xb5   : > { %7451 = vmatpush3.bf16.msra.mxu0 %v7690_v31  ;;  %v2780_v15 = vrot.slane %v2779_v8, 4  ;;  %v2798_v18 = vrot.slane %v2796_v10, 5  ;;  %v2802_v22 = vrot.slane %v2800_v13, 4  ;;  %v2811_v1 = vshrl.u32 %v6345_v24, 16  ;;  %v6352_v57 = vld [vmem:[%s7778_s23 + $0xa0] sm:$0xf] }
  0xb6   : > { %7371 = vmatmul.mubr.bf16.gmra.mxu0 %v6386_v6  ;;  %v2775_v21 = vsel %vm7868_vm5, %v2770_v12, %v2774_v61  ;;  %v2808_v23 = vrot.slane %v2806_v14, 5  ;;  %7452 = vmatprep.subr.bf16.mxu0 %v7694_v59  ;;  %v2793_v27 = vor.u32 %v2792_v16, %v2789_v7  ;;  %v2814_v11 = vshll.u32 %v6345_v24, 16  ;;  %v6353_v8 = vld [vmem:[%s7778_s23 + $0xa4] sm:$0x1]  ;;  %v7691_v12 = vld [vmem:[%s7778_s23 + $0xb4] sm:$0xff]  }
  0xb7   : > { %7405 = vmatpush3.bf16.msra.mxu1 %v7693_v36  ;;  %v2785_v26 = vsel %vm7868_vm5, %v2780_v15, %v2784_v4  ;;  %v2803_v29 = vor.u32 %v2802_v22, %v2798_v18  ;;  %v2820_v30 = vshll.u32 %v6346_v25, 16  ;;  %v2824_v31 = vshrl.u32 %v6346_v25, 16  ;;  %v7688_v4 = vld [vmem:[%s7778_s23 + $0xa8] sm:$0xff]  }
  0xb8   : > { %7486 = vmatprep.subr.bf16.mxu1 %v8337_v2  ;;  %v6387_v28 = vcombine.low %v2775_v21, %v2785_v26  ;;  %v2794_v35 = vrot.slane %v2793_v27, 4  ;;  %v2813_v36 = vrot.slane %v2811_v1, 4  ;;  %v2816_v37 = vrot.slane %v2814_v11, 5  ;;  %v6355_v27 = vld [vmem:[%s7778_s23 + $0xac] sm:$0xf] }
  0xb9   : > { %7453 = vmatpush3.bf16.msra.mxu0 %v7694_v59  ;;  %v2830_v38 = vshll.u32 %v6347_v20, 16  ;;  %v2804_v40 = vrot.slane %v2803_v29, 4  ;;  %v2822_v41 = vrot.slane %v2820_v30, 5  ;;  %v2826_v42 = vrot.slane %v2824_v31, 4  ;;  %v6356_v20 = vld [vmem:[%s7778_s23 + $0xb0] sm:$0x1] }
  0xba   : > { %7327 = vmatmul.mubr.bf16.gmra.mxu1 %v7680_v34  ;;  %7534 = vmatprep.subr.bf16.mxu0 %v8344_v19  ;;  %v2835_v44 = vshrl.u32 %v6348_v32, 16  ;;  %v2799_v47 = vsel %vm7868_vm5, %v2794_v35, %v2798_v18  ;;  %v2817_v48 = vor.u32 %v2816_v37, %v2813_v36  ;;  %v2838_v50 = vshll.u32 %v6348_v32, 16 }
  0xbb   : > { %7330 = vmatprep.mubr.bf16.mxu1 %v7683_v58  ;;  %7374 = vmatprep.mubr.bf16.mxu0 %v6387_v28  ;;  %v2832_v49 = vrot.slane %v2830_v38, 5  ;;  %v2809_v51 = vsel %vm7868_vm5, %v2804_v40, %v2808_v23  ;;  %v2827_v34 = vor.u32 %v2826_v42, %v2822_v41  ;;  %v2844_v52 = vshll.u32 %v6349_v39, 16  ;;  %v6354_v23 = vld [vmem:[%s7778_s23 + $0xa8] sm:$0xf] }
  0xbc   : > { %v2837_v45 = vrot.slane %v2835_v44, 4  ;;  %v6388_v53 = vcombine.low %v2799_v47, %v2809_v51  ;;  %v2818_v54 = vrot.slane %v2817_v48, 4  ;;  %v2840_v55 = vrot.slane %v2838_v50, 5  ;;  %v6357_v44 = vld [vmem:[%s7778_s23 + $0xb4] sm:$0xf]  ;;  %v7692_v47 = vld [vmem:[%s7778_s23 + $0xc0] sm:$0xff]  }
  0xbd   : > { %v2848_v58 = vshrl.u32 %v6349_v39, 16  ;;  %v2828_v59 = vrot.slane %v2827_v34, 4  ;;  %v2846_v60 = vrot.slane %v2844_v52, 5  ;;  %v2854_v61 = vshll.u32 %v6350_v43, 16  ;;  %v6358_v51 = vld [vmem:[%s7778_s23 + $0xb8] sm:$0xf] }
  0xbe   : > { %7375 = vmatmul.mubr.bf16.gmra.mxu0 %v6388_v53  ;;  %v2823_v62 = vsel %vm7868_vm5, %v2818_v54, %v2822_v41  ;;  %v2841_v63 = vor.u32 %v2840_v55, %v2837_v45  ;;  %v2859_v9 = vshrl.u32 %v6351_v3, 16  ;;  %v2862_v10 = vshll.u32 %v6351_v3, 16  ;;  %v6359_v34 = vld [vmem:[%s7778_s23 + $0xbc] sm:$0x1] }
  0xbf   : > { %v2850_v0 = vrot.slane %v2848_v58, 4  ;;  %v2833_v5 = vsel %vm7868_vm5, %v2828_v59, %v2832_v49  ;;  %v2856_v6 = vrot.slane %v2854_v61, 5  ;;  %v2868_v15 = vshll.u32 %v6352_v57, 16 }
  0xc0   : > { %v6389_v7 = vcombine.low %v2823_v62, %v2833_v5  ;;  %v2842_v13 = vrot.slane %v2841_v63, 4  ;;  %v2861_v16 = vrot.slane %v2859_v9, 4  ;;  %v2864_v18 = vrot.slane %v2862_v10, 5 }
  0xc1   : > { %v2851_v14 = vor.u32 %v2850_v0, %v2846_v60  ;;  %v2872_v21 = vshrl.u32 %v6352_v57, 16  ;;  %v2878_v22 = vshll.u32 %v6353_v8, 16  ;;  %v2870_v26 = vrot.slane %v2868_v15, 5  ;;  %v6360_v57 = vld [vmem:[%s7778_s23 + $0xc0] sm:$0xf] }
  0xc2   : > { %7331 = vmatmul.mubr.bf16.gmra.mxu1 %v7684_v17  ;;  %7378 = vmatprep.mubr.bf16.mxu0 %v6389_v7  ;;  %v2847_v24 = vsel %vm7868_vm5, %v2842_v13, %v2846_v60  ;;  %v2865_v1 = vor.u32 %v2864_v18, %v2861_v16  ;;  %v2883_v28 = vshrl.u32 %v6354_v23, 16  ;;  %v2886_v30 = vshll.u32 %v6354_v23, 16  ;;  %v6362_v8 = vld [vmem:[%s7778_s23 + $0xc8] sm:$0x1] }
  0xc3   : > { %7334 = vmatprep.mubr.bf16.mxu1 %v7687_v33  ;;  %v2852_v25 = vrot.slane %v2851_v14, 4  ;;  %v2874_v11 = vrot.slane %v2872_v21, 4  ;;  %v2880_v17 = vrot.slane %v2878_v22, 5  ;;  %v2892_v31 = vshll.u32 %v6355_v27, 16 }
  0xc4   : > { %v2896_v32 = vshrl.u32 %v6355_v27, 16  ;;  %v2866_v35 = vrot.slane %v2865_v1, 4  ;;  %v2885_v37 = vrot.slane %v2883_v28, 4  ;;  %v2888_v38 = vrot.slane %v2886_v30, 5  ;;  %v6404_v1 = vld [vmem:[%s7778_s23 + $0x10] sm:$0xf] }
  0xc5   : > { %v2857_v29 = vsel %vm7868_vm5, %v2852_v25, %v2856_v6  ;;  %v2875_v36 = vor.u32 %v2874_v11, %v2870_v26  ;;  %v2894_v39 = vrot.slane %v2892_v31, 5  ;;  %v2902_v41 = vshll.u32 %v6356_v20, 16  ;;  %v6361_v6 = vld [vmem:[%s7778_s23 + $0xc4] sm:$0xf]  ;;  %v6403_v20 = vld [vmem:[%s7778_s23 + $0xc] sm:$0xe] }
  0xc6   : > { %v6390_v33 = vcombine.low %v2847_v24, %v2857_v29  ;;  %v2898_v40 = vrot.slane %v2896_v32, 4  ;;  %v2871_v42 = vsel %vm7868_vm5, %v2866_v35, %v2870_v26  ;;  %v2889_v48 = vor.u32 %v2888_v38, %v2885_v37  ;;  %v6405_v29 = vld [vmem:[%s7778_s23 + $0x14] sm:$0x1]  ;;  %v6407_v38 = vld [vmem:[%s7778_s23 + $0x1c] sm:$0xf] }
  0xc7   : > { %v2876_v43 = vrot.slane %v2875_v36, 4  ;;  %v2904_v50 = vrot.slane %v2902_v41, 5  ;;  %v2907_v45 = vshrl.u32 %v6357_v44, 16  ;;  %v2910_v53 = vshll.u32 %v6357_v44, 16  ;;  %v6406_v36 = vld [vmem:[%s7778_s23 + $0x18] sm:$0xe] }
  0xc8   : > { %7379 = vmatmul.mubr.bf16.gmra.mxu0 %v6390_v33  ;;  %v2899_v49 = vor.u32 %v2898_v40, %v2894_v39  ;;  %v2916_v54 = vshll.u32 %v6358_v51, 16  ;;  %v2920_v55 = vshrl.u32 %v6358_v51, 16  ;;  %v2890_v59 = vrot.slane %v2889_v48, 4 }
  0xc9   : > { %v2881_v52 = vsel %vm7868_vm5, %v2876_v43, %v2880_v17  ;;  %v2909_v61 = vrot.slane %v2907_v45, 4  ;;  %v2912_v62 = vrot.slane %v2910_v53, 5  ;;  %v2926_v3 = vshll.u32 %v6359_v34, 16  ;;  %v6409_v34 = vld [vmem:[%s7778_s23 + $0x24] sm:$0xe] }
  0xca   : > { %7335 = vmatmul.mubr.bf16.gmra.mxu1 %v7688_v4  ;;  %v6391_v58 = vcombine.low %v2871_v42, %v2881_v52  ;;  %v2900_v60 = vrot.slane %v2899_v49, 4  ;;  %v2918_v63 = vrot.slane %v2916_v54, 5  ;;  %v2922_v0 = vrot.slane %v2920_v55, 4  ;;  %v6410_v55 = vld [vmem:[%s7778_s23 + $0x28] sm:$0xf] }
  0xcb   : > { %7338 = vmatprep.mubr.bf16.mxu1 %v7691_v12  ;;  %v2895_v4 = vsel %vm7868_vm5, %v2890_v59, %v2894_v39  ;;  %v2931_v9 = vshrl.u32 %v6360_v57, 16  ;;  %v2934_v10 = vshll.u32 %v6360_v57, 16  ;;  %v2913_v7 = vor.u32 %v2912_v62, %v2909_v61  ;;  %v6408_v39 = vld [vmem:[%s7778_s23 + $0x20] sm:$0x1]  ;;  %v7701_v62 = vld [vmem:[%s9558_s1 + $0x1f0] sm:$0xff]  }
  0xcc   : > { %7382 = vmatprep.mubr.bf16.mxu0 %v6391_v58  ;;  %v2905_v5 = vsel %vm7868_vm5, %v2900_v60, %v2904_v50  ;;  %v2923_v13 = vor.u32 %v2922_v0, %v2918_v63  ;;  %v2928_v14 = vrot.slane %v2926_v3, 5  ;;  %v2940_v18 = vshll.u32 %v6361_v6, 16  ;;  %v6411_v58 = vld [vmem:[%s7778_s23 + $0x2c] sm:$0x1]  ;;  %v6412_v0 = vld [vmem:[%s7778_s23 + $0x30] sm:$0xe] }
  0xcd   : > { %v6392_v12 = vcombine.low %v2895_v4, %v2905_v5  ;;  %v2933_v15 = vrot.slane %v2931_v9, 4  ;;  %v2936_v16 = vrot.slane %v2934_v10, 5  ;;  %v2944_v21 = vshrl.u32 %v6361_v6, 16  ;;  %v6413_v3 = vld [vmem:[%s7778_s23 + $0x34] sm:$0xf]  ;;  %v7696_v9 = vld [vmem:[%s7778_s23 + $0x24] sm:$0xff]  }
  0xce   : > { %v2914_v22 = vrot.slane %v2913_v7, 4  ;;  %v2924_v23 = vrot.slane %v2923_v13, 4  ;;  %v2950_v24 = vshll.u32 %v6362_v8, 16  ;;  %v2942_v26 = vrot.slane %v2940_v18, 5  ;;  %v6414_v6 = vld [vmem:[%s7778_s23 + $0x38] sm:$0x1] }
  0xcf   : > { %v2937_v25 = vor.u32 %v2936_v16, %v2933_v15  ;;  %v2946_v27 = vrot.slane %v2944_v21, 4  ;;  %v6451_v30 = vrot.slane %v6403_v20, 9  ;;  %v3438_v35 = vrot.slane %v6404_v1, 5  ;;  %v7699_v13 = vld [vmem:[%s7778_s23 + $0x30] sm:$0xff]   ;;  %v6415_v21 = vld [vmem:[%s7778_s23 + $0x3c] sm:$0xe] }
  0xd0   : > { %7383 = vmatmul.mubr.bf16.gmra.mxu0 %v6392_v12  ;;  %v2919_v11 = vsel %vm7868_vm5, %v2914_v22, %v2918_v63  ;;  %v2929_v17 = vsel %vm7868_vm5, %v2924_v23, %v2928_v14  ;;  %v2952_v28 = vrot.slane %v2950_v24, 5  ;;  %v3441_v37 = vrot.slane %v6405_v29, 5  ;;  %v7702_v18 = vld [vmem:[%s9558_s1 + $0x230] sm:$0xff]   ;;  %v6416_v22 = vld [vmem:[%s7778_s23 + $0x40] sm:$0xf]  ;;  %v7705_v20 = vld [vmem:[%s9558_s1 + $0x1e8] sm:$0xff]  }
  0xd1   : > { %v6393_v31 = vcombine.low %v2919_v11, %v2929_v17  ;;  %v2938_v32 = vrot.slane %v2937_v25, 4  ;;  %v2947_v33 = vor.u32 %v2946_v27, %v2942_v26  ;;  %v6452_v40 = vrot.slane %v6406_v36, 9  ;;  %v6417_v23 = vld [vmem:[%s7778_s23 + $0x44] sm:$0x1]  ;;  %v6418_v27 = vld [vmem:[%s7778_s23 + $0x48] sm:$0xe] }
  0xd2   : > { %7339 = vmatmul.mubr.bf16.gmra.mxu1 %v7692_v47  ;;  %v3439_v43 = vsel %vm7849_vm4, %v6451_v30, %v3438_v35  ;;  %v3440_v44 = vrot.slane %v3438_v35, 4  ;;  %v7695_v47 = vld [vmem:[%s7778_s23 + $0x18] sm:$0xff]   ;;  %v3445_v48 = vrot.slane %v6407_v38, 5  ;;  %v3448_v49 = vrot.slane %v6408_v39, 5  ;;  %v6420_v29 = vld [vmem:[%s7778_s23 + $0x50] sm:$0x1] }
  0xd3   : > { %7386 = vmatprep.mubr.bf16.mxu0 %v6393_v31  ;;  %v2943_v41 = vsel %vm7868_vm5, %v2938_v32, %v2942_v26  ;;  %v2948_v42 = vrot.slane %v2947_v33, 4  ;;  %v6453_v59 = vrot.slane %v6409_v34, 9  ;;  %v3452_v60 = vrot.slane %v6410_v55, 5  ;;  %v7709_v31 = vld [vmem:[%s9558_s1 + $0x1e0] sm:$0xff]  }
  0xd4   : > { %v3442_v51 = vsel %vm7849_vm4, %v3440_v44, %v3441_v37  ;;  %v3446_v53 = vsel %vm7849_vm4, %v6452_v40, %v3445_v48  ;;  %v3447_v54 = vrot.slane %v3445_v48, 4  ;;  %v3455_v61 = vrot.slane %v6411_v58, 5  ;;  %v7700_v40 = vld [vmem:[%s7778_s23 + $0x3c] sm:$0xff]   ;;  %v6421_v44 = vld [vmem:[%s7778_s23 + $0x54] sm:$0xe] }
  0xd5   : > { %v2953_v50 = vsel %vm7868_vm5, %v2948_v42, %v2952_v28  ;;  %v6483_v52 = vcombine.low %v3439_v43, %v3442_v51  ;;  %v3453_v4 = vsel %vm7849_vm4, %v6453_v59, %v3452_v60  ;;  %v3454_v5 = vrot.slane %v3452_v60, 4  ;;  %v6419_v28 = vld [vmem:[%s7778_s23 + $0x4c] sm:$0xf]  ;;  %v6423_v48 = vld [vmem:[%s7778_s23 + $0x5c] sm:$0x1] }
  0xd6   : > { %v6394_v45 = vcombine.low %v2943_v41, %v2953_v50  ;;  %v3449_v63 = vsel %vm7849_vm4, %v3447_v54, %v3448_v49  ;;  %v6454_v8 = vrot.slane %v6412_v0, 9  ;;  %v3459_v10 = vrot.slane %v6413_v3, 5  ;;  %v7706_v43 = vld [vmem:[%s9558_s1 + $0x228] sm:$0xff]   ;;  %v6424_v54 = vld [vmem:[%s7778_s23 + $0x60] sm:$0xe]  ;;  %v7713_v3 = vld [vmem:[%s9558_s1 + $0x1d8] sm:$0xff]  }
  0xd7   : > { %7406 = vmatprep.mubr.bf16.mxu1 %v6483_v52  ;;  %v6484_v57 = vcombine.low %v3446_v53, %v3449_v63  ;;  %v3462_v12 = vrot.slane %v6414_v6, 5  ;;  %v3456_v7 = vsel %vm7849_vm4, %v3454_v5, %v3455_v61  ;;  %v6455_v24 = vrot.slane %v6415_v21, 9  ;;  %v6425_v55 = vld [vmem:[%s7778_s23 + $0x64] sm:$0xf]  ;;  %v6426_v58 = vld [vmem:[%s7778_s23 + $0x68] sm:$0x1] }
  0xd8   : > { %7387 = vmatmul.mubr.bf16.gmra.mxu0 %v6394_v45  ;;  %v6485_v14 = vcombine.low %v3453_v4, %v3456_v7  ;;  %v3460_v15 = vsel %vm7849_vm4, %v6454_v8, %v3459_v10  ;;  %v3461_v16 = vrot.slane %v3459_v10, 4  ;;  %v3466_v25 = vrot.slane %v6416_v22, 5  ;;  %v7710_v0 = vld [vmem:[%s9558_s1 + $0x220] sm:$0xff]   ;;  %v7717_v8 = vld [vmem:[%s9558_s1 + $0x1d0] sm:$0xff]   ;;  %v7714_v7 = vld [vmem:[%s9558_s1 + $0x218] sm:$0xff]  }
  0xd9   : > { %7454 = vmatprep.mubr.bf16.mxu0 %v7695_v47  ;;  %v3469_v26 = vrot.slane %v6417_v23, 5  ;;  %v6456_v30 = vrot.slane %v6418_v27, 9  ;;  %v3473_v35 = vrot.slane %v6419_v28, 5  ;;  %v3476_v36 = vrot.slane %v6420_v29, 5  ;;  %v6422_v47 = vld [vmem:[%s7778_s23 + $0x58] sm:$0xf] }
  0xda   : > { %7407 = vmatmul.mubr.bf16.vlgmr.msra.gmra.mxu1 %v6484_v57  ;;  %v3467_v11 = vsel %vm7849_vm4, %v6455_v24, %v3466_v25  ;;  %v3468_v17 = vrot.slane %v3466_v25, 4  ;;  %v6457_v49 = vrot.slane %v6421_v44, 9  ;;  %v3480_v52 = vrot.slane %v6422_v47, 5  ;;  %v7704_v21 = vld [vmem:[%s7778_s23 + $0x54] sm:$0xff]   ;;  %v7707_v25 = vld [vmem:[%s7778_s23 + $0x60] sm:$0xff]  }
  0xdb   : > { %7487 = vmatpush3.bf16.msra.mxu1 %v8337_v2  ;;  %7410 = vmatprep.mubr.bf16.mxu1 %v6485_v14  ;;  %v3463_v2 = vsel %vm7849_vm4, %v3461_v16, %v3462_v12  ;;  %v3475_v42 = vrot.slane %v3473_v35, 4  ;;  %v3474_v34 = vsel %vm7849_vm4, %v6456_v30, %v3473_v35  ;;  %v3483_v53 = vrot.slane %v6423_v48, 5  ;;  %v6427_v14 = vld [vmem:[%s7778_s23 + $0x6c] sm:$0xe]  ;;  %v6429_v22 = vld [vmem:[%s7778_s23 + $0x74] sm:$0x1] }
  0xdc   : > { %7488 = vmatprep.subr.bf16.mxu1 %v7701_v62  ;;  %v6486_v1 = vcombine.low %v3460_v15, %v3463_v2  ;;  %v3470_v37 = vsel %vm7849_vm4, %v3468_v17, %v3469_v26  ;;  %v3481_v61 = vsel %vm7849_vm4, %v6457_v49, %v3480_v52  ;;  %v3487_v63 = vrot.slane %v6425_v55, 5  ;;  %v6428_v15 = vld [vmem:[%s7778_s23 + $0x70] sm:$0xf]  ;;  %v6430_v26 = vld [vmem:[%s7778_s23 + $0x78] sm:$0xe]  ;;  %v7725_v49 = vld [vmem:[%s9558_s1 + $0x1c0] sm:$0xff]  }
  0xdd   : > { %v6487_v41 = vcombine.low %v3467_v11, %v3470_v37  ;;  %v3477_v45 = vsel %vm7849_vm4, %v3475_v42, %v3476_v36  ;;  %v6458_v4 = vrot.slane %v6424_v54, 9  ;;  %v3490_v12 = vrot.slane %v6426_v58, 5  ;;  %v6431_v28 = vld [vmem:[%s7778_s23 + $0x7c] sm:$0xf]  ;;  %v6432_v29 = vld [vmem:[%s7778_s23 + $0x80] sm:$0x1] }
  0xde   : > { %v6488_v57 = vcombine.low %v3474_v34, %v3477_v45  ;;  %v3489_v10 = vrot.slane %v3487_v63, 4  ;;  %v6459_v23 = vrot.slane %v6427_v14, 9  ;;  %v3494_v24 = vrot.slane %v6428_v15, 5  ;;  %v7718_v30 = vld [vmem:[%s9558_s1 + $0x210] sm:$0xff]   ;;  %v7722_v55 = vld [vmem:[%s9558_s1 + $0x208] sm:$0xff]   ;;  %v7726_v15 = vld [vmem:[%s9558_s1 + $0x200] sm:$0xff]  }
  0xdf   : > { %7489 = vmatpush3.bf16.msra.mxu1 %v7701_v62  ;;  %v3482_v62 = vrot.slane %v3480_v52, 4  ;;  %v3497_v2 = vrot.slane %v6429_v22, 5  ;;  %v3501_v35 = vrot.slane %v6431_v28, 5  ;;  %v3504_v44 = vrot.slane %v6432_v29, 5  ;;  %v6434_v52 = vld [vmem:[%s7778_s23 + $0x88] sm:$0xf] }
  0xe0   : > { %7455 = vmatmul.mubr.bf16.vlgmr.msra.gmra.mxu0 %v7696_v9  ;;  %7490 = vmatprep.subr.bf16.mxu1 %v7705_v20  ;;  %v3491_v11 = vsel %vm7849_vm4, %v3489_v10, %v3490_v12  ;;  %v3496_v17 = vrot.slane %v3494_v24, 4  ;;  %v3508_v58 = vrot.slane %v6434_v52, 5  ;;  %v6441_v28 = vld [vmem:[%s7778_s23 + $0xa4] sm:$0x1] }
  0xe1   : > { %7535 = vmatpush3.bf16.msra.mxu0 %v8344_v19  ;;  %7458 = vmatprep.mubr.bf16.mxu0 %v7699_v13  ;;  %v7703_v19 = vld [vmem:[%s7778_s23 + $0x48] sm:$0xff]   ;;  %v3484_v9 = vsel %vm7849_vm4, %v3482_v62, %v3483_v53  ;;  %v3503_v45 = vrot.slane %v3501_v35, 4 }
  0xe2   : > { %7536 = vmatprep.subr.bf16.mxu0 %v7702_v18  ;;  %7411 = vmatmul.mubr.bf16.gmra.mxu1 %v6486_v1  ;;  %v6489_v13 = vcombine.low %v3481_v61, %v3484_v9  ;;  %v3488_v1 = vsel %vm7849_vm4, %v6458_v4, %v3487_v63  ;;  %v6435_v53 = vld [vmem:[%s7778_s23 + $0x8c] sm:$0x1]  ;;  %v3510_v9 = vrot.slane %v3508_v58, 4 }
  0xe3   : > { %7414 = vmatprep.mubr.bf16.mxu1 %v6487_v41  ;;  %7491 = vmatpush3.bf16.msra.mxu1 %v7705_v20  ;;  %v3498_v41 = vsel %vm7849_vm4, %v3496_v17, %v3497_v2  ;;  %v6490_v42 = vcombine.low %v3488_v1, %v3491_v11  ;;  %v3511_v61 = vrot.slane %v6435_v53, 5  ;;  %v7708_v4 = vld [vmem:[%s7778_s23 + $0x6c] sm:$0xff]   ;;  %v3505_v14 = vsel %vm7849_vm4, %v3503_v45, %v3504_v44  ;;  %v6440_v1 = vld [vmem:[%s7778_s23 + $0xa0] sm:$0xf] }
  0xe4   : > { %7492 = vmatprep.subr.bf16.mxu1 %v7709_v31  ;;  %v3522_v29 = vrot.slane %v6440_v1, 5  ;;  %v6443_v44 = vld [vmem:[%s7778_s23 + $0xac] sm:$0xf] }
  0xe5   : > { %7537 = vmatpush3.bf16.msra.mxu0 %v7702_v18  ;;  %v3512_v22 = vsel %vm7849_vm4, %v3510_v9, %v3511_v61  ;;  %v3529_v53 = vrot.slane %v6443_v44, 5  ;;  %v7715_v9 = vld [vmem:[%s7778_s23 + $0x90] sm:$0xff]  }
  0xe6   : > { %7538 = vmatprep.subr.bf16.mxu0 %v7706_v43 }
  0xe7   : > { %7493 = vmatpush3.bf16.msra.mxu1 %v7709_v31  ;;  %v3495_v31 = vsel %vm7849_vm4, %v6459_v23, %v3494_v24 }
  0xe8   : > { %7459 = vmatmul.mubr.bf16.gmra.mxu0 %v7700_v40  ;;  %7494 = vmatprep.subr.bf16.mxu1 %v7713_v3  ;;  %v7721_v40 = vld [vmem:[%s9558_s1 + $0x1c8] sm:$0xff]   ;;  %v6491_v34 = vcombine.low %v3495_v31, %v3498_v41  ;;  %v3525_v41 = vrot.slane %v6441_v28, 5  ;;  %v6448_v28 = vld [vmem:[%s7778_s23 + $0xc0] sm:$0xe] }
  0xe9   : > { %7462 = vmatprep.mubr.bf16.mxu0 %v7703_v19  ;;  %7539 = vmatpush3.bf16.msra.mxu0 %v7706_v43  ;;  %v6460_v43 = vrot.slane %v6430_v26, 9  ;;  %v6433_v19 = vld [vmem:[%s7778_s23 + $0x84] sm:$0xe]  ;;  %v6439_v26 = vld [vmem:[%s7778_s23 + $0x9c] sm:$0xe] }
  0xea   : > { %7540 = vmatprep.subr.bf16.mxu0 %v7710_v0  ;;  %7415 = vmatmul.mubr.bf16.gmra.mxu1 %v6488_v57  ;;  %v6461_v54 = vrot.slane %v6433_v19, 9  ;;  %v6438_v57 = vld [vmem:[%s7778_s23 + $0x98] sm:$0x1]  ;;  %v6444_v19 = vld [vmem:[%s7778_s23 + $0xb0] sm:$0x1] }
  0xeb   : > { %7418 = vmatprep.mubr.bf16.mxu1 %v6489_v13  ;;  %7495 = vmatpush3.bf16.msra.mxu1 %v7713_v3  ;;  %v6437_v3 = vld [vmem:[%s7778_s23 + $0x94] sm:$0xf]  ;;  %v3502_v13 = vsel %vm7849_vm4, %v6460_v43, %v3501_v35  ;;  %v3518_v24 = vrot.slane %v6438_v57, 5  ;;  %v3524_v43 = vrot.slane %v3522_v29, 4 }
  0xec   : > { %v8455_v32 = vpop.f32.mrf.mxu0  ;;  %v8457_v33 = vpop.f32.mrf.mxu1  ;;  %7496 = vmatprep.subr.bf16.mxu1 %v7717_v8  ;;  %v3515_v10 = vrot.slane %v6437_v3, 5  ;;  %v6492_v11 = vcombine.low %v3502_v13, %v3505_v14  ;;  %v6447_v13 = vld [vmem:[%s7778_s23 + $0xbc] sm:$0x1] }
  0xed   : > { %7541 = vmatpush3.bf16.msra.mxu0 %v7710_v0  ;;  %v6436_v0 = vld [vmem:[%s7778_s23 + $0x90] sm:$0xe]  ;;  %v3526_v57 = vsel %vm7849_vm4, %v3524_v43, %v3525_v41  ;;  %v6466_v43 = vrot.slane %v6448_v28, 9 }
  0xee   : > { %v8462_v38 = vpop.f32.mrf.mxu0  ;;  %v8464_v39 = vpop.f32.mrf.mxu1  ;;  %7542 = vmatprep.subr.bf16.mxu0 %v7714_v7  ;;  %v6462_v23 = vrot.slane %v6436_v0, 9  ;;  %v3517_v17 = vrot.slane %v3515_v10, 4 }
  0xef   : > { %7497 = vmatpush3.bf16.msra.mxu1 %v7717_v8  ;;  %v7711_v8 = vld [vmem:[%s7778_s23 + $0x78] sm:$0xff]  }
  0xf0   : > { %v8474_v50 = vpop.f32.mrf.mxu0  ;;  %v8476_v51 = vpop.f32.mrf.mxu1  ;;  %7463 = vmatmul.mubr.bf16.gmra.mxu0 %v7704_v21  ;;  %7498 = vmatprep.subr.bf16.mxu1 %v7721_v40  ;;  %v3509_v21 = vsel %vm7849_vm4, %v6461_v54, %v3508_v58  ;;  %v3532_v54 = vrot.slane %v6444_v19, 5  ;;  %v3519_v0 = vsel %vm7849_vm4, %v3517_v17, %v3518_v24  ;;  %v3539_v24 = vrot.slane %v6447_v13, 5 }
  0xf1   : > { %7466 = vmatprep.mubr.bf16.mxu0 %v7707_v25  ;;  %7543 = vmatpush3.bf16.msra.mxu0 %v7714_v7 }
  0xf2   : > { %v8485_v59 = vpop.f32.mrf.mxu0  ;;  %v8487_v60 = vpop.f32.mrf.mxu1  ;;  %7544 = vmatprep.subr.bf16.mxu0 %v7718_v30  ;;  %7419 = vmatmul.mubr.bf16.gmra.mxu1 %v6490_v42  ;;  %v6442_v42 = vld [vmem:[%s7778_s23 + $0xa8] sm:$0xe] }
  0xf3   : > { %7422 = vmatprep.mubr.bf16.mxu1 %v6491_v34  ;;  %7499 = vmatpush3.bf16.msra.mxu1 %v7721_v40  ;;  %v6463_v40 = vrot.slane %v6439_v26, 9  ;;  %v6464_v34 = vrot.slane %v6442_v42, 9 }
  0xf4   : > { %v8497_v5 = vpop.f32.mrf.mxu0  ;;  %v8499_v6 = vpop.f32.mrf.mxu1  ;;  %7500 = vmatprep.subr.bf16.mxu1 %v7725_v49 }
  0xf5   : > { %7545 = vmatpush3.bf16.msra.mxu0 %v7718_v30  ;;  %v6493_v30 = vcombine.low %v3509_v21, %v3512_v22  ;;  %v3523_v3 = vsel %vm7849_vm4, %v6463_v40, %v3522_v29  ;;  %v6449_v29 = vld [vmem:[%s7778_s23 + $0xc4] sm:$0xf] }
  0xf6   : > { %v8511_v16 = vpop.f32.mrf.mxu0  ;;  %v8513_v18 = vpop.f32.mrf.mxu1  ;;  %7546 = vmatprep.subr.bf16.mxu0 %v7722_v55  ;;  %v6495_v1 = vcombine.low %v3523_v3, %v3526_v57  ;;  %v3543_v44 = vrot.slane %v6449_v29, 5 }
  0xf7   : > { %7501 = vmatpush3.bf16.msra.mxu1 %v7725_v49  ;;  %v3516_v49 = vsel %vm7849_vm4, %v6462_v23, %v3515_v10  ;;  %v6446_v10 = vld [vmem:[%s7778_s23 + $0xb8] sm:$0xf] }
  0xf8   : > { %v8519_v27 = vpop.f32.mrf.mxu0  ;;  %v8521_v20 = vpop.f32.mrf.mxu1  ;;  %7467 = vmatmul.mubr.bf16.gmra.mxu0 %v7708_v4  ;;  %v3531_v4 = vrot.slane %v3529_v53, 4  ;;  %v3536_v23 = vrot.slane %v6446_v10, 5  ;;  %v6494_v26 = vcombine.low %v3516_v49, %v3519_v0  ;;  %v7716_v49 = vld [vmem:[%s7778_s23 + $0x9c] sm:$0xff]   ;;  %v8642_v0 = vsel %vm7849_vm4, %v6466_v43, %v3543_v44 }
  0xf9   : > { %9565 = vst [vmem:[#allocation3_spill] sm:$0xff] %v8521_v20  ;;  %7470 = vmatprep.mubr.bf16.mxu0 %v7711_v8  ;;  %7547 = vmatpush3.bf16.msra.mxu0 %v7722_v55  ;;  %v7712_v55 = vld [vmem:[%s7778_s23 + $0x84] sm:$0xff]   ;;  %v6445_v8 = vld [vmem:[%s7778_s23 + $0xb4] sm:$0xe]  ;;  %v3545_v3 = vrot.slane %v3543_v44, 4 }
  0xfa   : > { %v8534_v36 = vpop.f32.mrf.mxu0  ;;  %v8536_v37 = vpop.f32.mrf.mxu1  ;;  %7548 = vmatprep.subr.bf16.mxu0 %v7726_v15  ;;  %7423 = vmatmul.mubr.bf16.gmra.mxu1 %v6492_v11  ;;  %v6465_v14 = vrot.slane %v6445_v8, 9  ;;  %v8621_v11 = vsel %vm7849_vm4, %v6464_v34, %v3529_v53  ;;  %v8625_v17 = vsel %vm7849_vm4, %v3531_v4, %v3532_v54  ;;  %v3538_v42 = vrot.slane %v3536_v23, 4  ;;  %v6579_v8 = vld [vmem:[%s7778_s23 + $0x18] sm:$0xf] }
  0xfb   : > { %9566 = vst [vmem:[#allocation4_spill] sm:$0xff] %v8536_v37  ;;  %7426 = vmatprep.mubr.bf16.mxu1 %v6493_v30  ;;  %v6589_v37 = vld [vmem:[%s7778_s23 + $0x40] sm:$0xf] }
  0xfc   : > { %v8544_v47 = vpop.f32.mrf.mxu0  ;;  %v8546_v48 = vpop.f32.mrf.mxu1  ;;  %v8632_v41 = vsel %vm7849_vm4, %v6465_v14, %v3536_v23  ;;  %v7719_v23 = vld [vmem:[%s7778_s23 + $0xa8] sm:$0xff]  }
  0xfd   : > { %9567 = vst [vmem:[#allocation5_spill] sm:$0xff] %v8546_v48  ;;  %7549 = vmatpush3.bf16.msra.mxu0 %v7726_v15  ;;  %v6450_v15 = vld [vmem:[%s7778_s23 + $0xc8] sm:$0x1] }
  0xfe   : > { %v8556_v62 = vpop.f32.mrf.mxu0  ;;  %v8558_v63 = vpop.f32.mrf.mxu1  ;;  %v3546_v19 = vrot.slane %v6450_v15, 5 }
  0xff   : > { %9568 = vst [vmem:[#allocation6_spill] sm:$0xff] %v8558_v63 }
 0x100   : > { %v8565_v12 = vpop.f32.mrf.mxu0  ;;  %v8567_v7 = vpop.f32.mrf.mxu1  ;;  %7471 = vmatmul.mubr.bf16.gmra.mxu0 %v7712_v55  ;;  %v8638_v55 = vsel %vm7849_vm4, %v3538_v42, %v3539_v24  ;;  %v6581_v24 = vld [vmem:[%s7778_s23 + $0x20] sm:$0x1] }
 0x101   : > { %9569 = vst [vmem:[#allocation7_spill] sm:$0xff] %v8567_v7  ;;  %7474 = vmatprep.mubr.bf16.mxu0 %v7715_v9  ;;  %v6497_v4 = vcombine.low %v8632_v41, %v8638_v55  ;;  %v6580_v9 = vld [vmem:[%s7778_s23 + $0x1c] sm:$0xf]  ;;  %v4453_v15 = vshll.u32 %v6581_v24, 16  ;;  %v6582_v24 = vld [vmem:[%s7778_s23 + $0x24] sm:$0xf] }
 0x102   : > { %v8580_v25 = vpop.f32.mrf.mxu0  ;;  %v8582_v2 = vpop.f32.mrf.mxu1  ;;  %7427 = vmatmul.mubr.bf16.gmra.mxu1 %v6494_v26  ;;  %v4434_v26 = vshrl.u32 %v6579_v8, 16  ;;  %v4447_v29 = vshrl.u32 %v6580_v9, 16 }
 0x103   : > { %9570 = vst [vmem:[#allocation8_spill] sm:$0xff] %v8582_v2  ;;  %7430 = vmatprep.mubr.bf16.mxu1 %v6495_v1  ;;  %v6585_v2 = vld [vmem:[%s7778_s23 + $0x30] sm:$0xf] }
 0x104   : > { %v8587_v31 = vpop.f32.mrf.mxu0  ;;  %v8589_v35 = vpop.f32.mrf.mxu1  ;;  %v4436_v43 = vrot.slane %v4434_v26, 4  ;;  %v4449_v55 = vrot.slane %v4447_v29, 4  ;;  %v4458_v26 = vshrl.u32 %v6582_v24, 16 }
 0x105   : > { %9571 = vst [vmem:[#allocation9_spill] sm:$0xff] %v8589_v35 }
 0x106   : > { %v8594_v45 = vpop.f32.mrf.mxu0  ;;  %v8596_v52 = vpop.f32.mrf.mxu1 }
 0x107   : > { %9572 = vst [vmem:[#allocation10_spill] sm:$0xff] %v8596_v52 }
 0x108   : > { %v8600_v58 = vpop.f32.mrf.mxu0  ;;  %v8602_v61 = vpop.f32.mrf.mxu1  ;;  %7475 = vmatmul.mubr.bf16.gmra.mxu0 %v7716_v49 }
 0x109   : > { %9573 = vst [vmem:[#allocation11_spill] sm:$0xff] %v8602_v61  ;;  %7478 = vmatprep.mubr.bf16.mxu0 %v7719_v23 }
 0x10a   : > { %v8615_v21 = vpop.f32.mrf.mxu0  ;;  %v8617_v22 = vpop.f32.mrf.mxu1 }
 0x10b   : > { %9574 = vst [vmem:[#allocation12_spill] sm:$0xff] %v8617_v22  ;;  %v4460_v22 = vrot.slane %v4458_v26, 4 }
 0x10c   : > { %v7216_v30 = vpop.f32.mrf.mxu1  ;;  %v7264_v40 = vpop.f32.mrf.mxu0 }
 0x10d   : > { %v1412_v34 = vadd.f32 %v7216_v30, %v8455_v32  ;;  %v6496_v32 = vcombine.low %v8621_v11, %v8625_v17  ;;  %v4437_v11 = vshll.u32 %v6579_v8, 16  ;;  %v4443_v17 = vshll.u32 %v6580_v9, 16  ;;  %v6667_v30 = vld [vmem:[%s7778_s23 + $0x18] sm:$0xe] }
 0x10e   : > { %v1283_v53 = vpop.f32.mrf.mxu1  ;;  %v1880_v54 = vpop.f32.mrf.mxu0 }
 0x10f   : > { %v1410_v57 = vadd.f32 %v1283_v53, %v8462_v38  ;;  %v8651_v10 = vadd.f32 %v7264_v40, %v1412_v34  ;;  %v8658_v38 = vsel %vm7849_vm4, %v3545_v3, %v3546_v19  ;;  %v6668_v40 = vld [vmem:[%s7778_s23 + $0x1c] sm:$0xf]  ;;  %v4439_v44 = vrot.slane %v4437_v11, 5  ;;  %v6669_v34 = vld [vmem:[%s7778_s23 + $0x20] sm:$0x1]  ;;  %7431 = vmatmul.mubr.bf16.gmra.mxu1 %v6496_v32 }
 0x110   : > { %v7217_v13 = vpop.f32.mrf.mxu1  ;;  %v8653_v14 = vpop.f32.mrf.mxu0  ;;  %v4445_v19 = vrot.slane %v4443_v17, 5  ;;  %v6715_v53 = vrot.slane %v6667_v30, 9  ;;  %v4455_v3 = vrot.slane %v4453_v15, 5  ;;  %v5301_v8 = vrot.slane %v6668_v40, 5  ;;  %7434 = vmatprep.mubr.bf16.mxu1 %v6497_v4 }
 0x111   : > { %9575 = vst [vmem:[#allocation13_spill] sm:$0xff] %v8651_v10  ;;  %v8665_v41 = vadd.f32 %v1880_v54, %v1410_v57  ;;  %v5304_v9 = vrot.slane %v6669_v34, 5  ;;  %v4440_v57 = vor.u32 %v4439_v44, %v4436_v43  ;;  %v6584_v10 = vld [vmem:[%s7778_s23 + $0x2c] sm:$0x1]  ;;  %v4461_v11 = vshll.u32 %v6582_v24, 16 }
 0x112   : > { %v8667_v1 = vpop.f32.mrf.mxu1  ;;  %v8669_v42 = vpop.f32.mrf.mxu0  ;;  %v1413_v17 = vadd.f32 %v7217_v13, %v8474_v50  ;;  %v4450_v29 = vor.u32 %v4449_v55, %v4445_v19  ;;  %v8682_v15 = vsel %vm7849_vm4, %v6715_v53, %v5301_v8  ;;  %v5303_v30 = vrot.slane %v5301_v8, 4  ;;  %v6670_v34 = vld [vmem:[%s7778_s23 + $0x24] sm:$0xe]  ;;  %v6671_v50 = vld [vmem:[%s7778_s23 + $0x28] sm:$0xf] }
 0x113   : > { %9576 = vst [vmem:[#allocation14_spill] sm:$0xff] %v8665_v41  ;;  %v6583_v41 = vld [vmem:[%s7778_s23 + $0x28] sm:$0xf]  ;;  %v4441_v44 = vrot.slane %v4440_v57, 4  ;;  %v4463_v24 = vrot.slane %v4461_v11, 5  ;;  %v4477_v55 = vshll.u32 %v6584_v10, 16 }
 0x114   : > { %v8673_v28 = vpop.f32.mrf.mxu1  ;;  %v8675_v54 = vpop.f32.mrf.mxu0  ;;  %v4467_v40 = vshll.u32 %v6583_v41, 16  ;;  %v4471_v61 = vshrl.u32 %v6583_v41, 16  ;;  %v4451_v13 = vrot.slane %v4450_v29, 4  ;;  %v8692_v23 = vsel %vm7849_vm4, %v5303_v30, %v5304_v9  ;;  %v6672_v8 = vld [vmem:[%s7778_s23 + $0x2c] sm:$0x1]  ;;  %v7720_v57 = vld [vmem:[%s7778_s23 + $0xb4] sm:$0xff]  }
 0x115   : > { %v4446_v41 = vsel %vm7868_vm5, %v4441_v44, %v4445_v19  ;;  %v4464_v26 = vor.u32 %v4463_v24, %v4460_v22  ;;  %v7723_v11 = vld [vmem:[%s7778_s23 + $0xc0] sm:$0xff]   ;;  %v4479_v29 = vrot.slane %v4477_v55, 5  ;;  %v6716_v30 = vrot.slane %v6670_v34, 9  ;;  %v6586_v22 = vld [vmem:[%s7778_s23 + $0x34] sm:$0xf]  ;;  %7479 = vmatmul.mubr.bf16.gmra.mxu0 %v7720_v57 }
 0x116   : > { %v8685_v49 = vpop.f32.mrf.mxu1  ;;  %v8687_v43 = vpop.f32.mrf.mxu0  ;;  %v4469_v53 = vrot.slane %v4467_v40, 5  ;;  %v4473_v9 = vrot.slane %v4471_v61, 4  ;;  %v4456_v10 = vsel %vm7868_vm5, %v4451_v13, %v4455_v3  ;;  %v5308_v40 = vrot.slane %v6671_v50, 5  ;;  %v6587_v50 = vld [vmem:[%s7778_s23 + $0x38] sm:$0x1]  ;;  %7482 = vmatprep.mubr.bf16.mxu0 %v7723_v11 }
 0x117   : > { %v6643_v19 = vcombine.low %v4446_v41, %v4456_v10  ;;  %v4465_v44 = vrot.slane %v4464_v26, 4  ;;  %v5311_v32 = vrot.slane %v6672_v8, 5  ;;  %v8718_v24 = vadd.f32 %v8653_v14, %v1413_v17  ;;  %v6673_v14 = vld [vmem:[%s7778_s23 + $0x30] sm:$0xe]  ;;  %v6675_v57 = vld [vmem:[%s7778_s23 + $0x38] sm:$0x1] }
 0x118   : > { %v8695_v52 = vpop.f32.mrf.mxu1  ;;  %v8697_v35 = vpop.f32.mrf.mxu0  ;;  %v4474_v63 = vor.u32 %v4473_v9, %v4469_v53  ;;  %v8715_v61 = vsel %vm7849_vm4, %v6716_v30, %v5308_v40  ;;  %v5310_v3 = vrot.slane %v5308_v40, 4  ;;  %v1411_v34 = vadd.f32 %v8667_v1, %v8485_v59  ;;  %v6674_v30 = vld [vmem:[%s7778_s23 + $0x34] sm:$0xf] }
 0x119   : > { %9577 = vst [vmem:[#allocation15_spill] sm:$0xff] %v8718_v24  ;;  %v4470_v8 = vsel %vm7868_vm5, %v4465_v44, %v4469_v53  ;;  %v4482_v26 = vshrl.u32 %v6585_v2, 16  ;;  %v4485_v9 = vshll.u32 %v6585_v2, 16  ;;  %v4491_v1 = vshll.u32 %v6586_v22, 16 }
 0x11a   : > { %v8708_v7 = vpop.f32.mrf.mxu1  ;;  %v8710_v4 = vpop.f32.mrf.mxu0  ;;  %v4475_v41 = vrot.slane %v4474_v63, 4  ;;  %v8732_v17 = vsel %vm7849_vm4, %v5310_v3, %v5311_v32  ;;  %v8735_v59 = vadd.f32 %v8669_v42, %v1411_v34  ;;  %v4495_v10 = vshrl.u32 %v6586_v22, 16  ;;  %v6588_v42 = vld [vmem:[%s7778_s23 + $0x3c] sm:$0xf] }
 0x11b   : > { %v4484_v32 = vrot.slane %v4482_v26, 4  ;;  %v4487_v11 = vrot.slane %v4485_v9, 5  ;;  %v9579_v44 = vcombine.low %v8642_v0, %v8658_v38  ;;  %v4493_v3 = vrot.slane %v4491_v1, 5 }
 0x11c   : > { %v8723_v13 = vpop.f32.mrf.mxu1  ;;  %v8725_v55 = vpop.f32.mrf.mxu0  ;;  %9578 = vst [vmem:[#allocation16_spill] sm:$0xff] %v8735_v59  ;;  %v4480_v2 = vsel %vm7868_vm5, %v4475_v41, %v4479_v29  ;;  %v4497_v34 = vrot.slane %v4495_v10, 4  ;;  %v4501_v59 = vshll.u32 %v6587_v50, 16  ;;  %v7724_v29 = vld [vmem:[%s7778_s23 + $0xcc] sm:$0xff]   ;;  %v6717_v26 = vrot.slane %v6673_v14, 9 }
 0x11d   : > { %7435 = vmatmul.mubr.bf16.gmra.mxu1 %v9579_v44  ;;  %v6644_v22 = vcombine.low %v4470_v8, %v4480_v2  ;;  %v4488_v41 = vor.u32 %v4487_v11, %v4484_v32  ;;  %v5315_v53 = vrot.slane %v6674_v30, 5  ;;  %v5318_v9 = vrot.slane %v6675_v57, 5  ;;  %v6676_v32 = vld [vmem:[%s7778_s23 + $0x3c] sm:$0xe]  ;;  %7483 = vmatmul.mubr.bf16.gmra.mxu0 %v7724_v29  ;;  %v6677_v44 = vld [vmem:[%s7778_s23 + $0x40] sm:$0xf] }
 0x11e   : > { %v8739_v40 = vpop.f32.mrf.mxu1  ;;  %v8741_v63 = vpop.f32.mrf.mxu0  ;;  %7502 = vmatprep.mubr.bf16.mxu1 %v6643_v19  ;;  %v4498_v20 = vor.u32 %v4497_v34, %v4493_v3  ;;  %v4503_v0 = vrot.slane %v4501_v59, 5  ;;  %v1416_v38 = vadd.f32 %v8673_v28, %v8497_v5  ;;  %v4506_v8 = vshrl.u32 %v6588_v42, 16  ;;  %v6590_v19 = vld [vmem:[%s7778_s23 + $0x44] sm:$0x1] }
 0x11f   : > { %v4489_v50 = vrot.slane %v4488_v41, 4  ;;  %v8761_v1 = vsel %vm7849_vm4, %v6717_v26, %v5315_v53  ;;  %v5317_v10 = vrot.slane %v5315_v53, 4  ;;  %v4509_v14 = vshll.u32 %v6588_v42, 16 }
 0x120   : > { %v8751_v24 = vpop.f32.mrf.mxu1  ;;  %v8753_v48 = vpop.f32.mrf.mxu0  ;;  %v4499_v30 = vrot.slane %v4498_v20, 4  ;;  %v8765_v57 = vadd.f32 %v8675_v54, %v1416_v38  ;;  %v4508_v2 = vrot.slane %v4506_v8, 4  ;;  %v4515_v59 = vshll.u32 %v6589_v37, 16  ;;  %v6678_v54 = vld [vmem:[%s7778_s23 + $0x44] sm:$0x1] }
 0x121   : > { %v4494_v28 = vsel %vm7868_vm5, %v4489_v50, %v4493_v3  ;;  %v5319_v53 = vsel %vm7849_vm4, %v5317_v10, %v5318_v9  ;;  %v4511_v42 = vrot.slane %v4509_v14, 5  ;;  %v4519_v20 = vshrl.u32 %v6589_v37, 16  ;;  %v6591_v10 = vld [vmem:[%s7778_s23 + $0x48] sm:$0xf] }
 0x122   : > { %9580 = vst [vmem:[#allocation17_spill] sm:$0xff] %v8765_v57  ;;  %v8768_v11 = vpop.f32.mrf.mxu1  ;;  %v8770_v5 = vpop.f32.mrf.mxu0  ;;  %v9581_v34 = vcombine.low %v8682_v15, %v8692_v23  ;;  %v4504_v41 = vsel %vm7868_vm5, %v4499_v30, %v4503_v0  ;;  %v6749_v29 = vcombine.low %v8761_v1, %v5319_v53  ;;  %v4517_v26 = vrot.slane %v4515_v59, 5 }
 0x123   : > { %v4525_v38 = vshll.u32 %v6590_v19, 16  ;;  %v6645_v8 = vcombine.low %v4494_v28, %v4504_v41  ;;  %v4512_v3 = vor.u32 %v4511_v42, %v4508_v2  ;;  %v4521_v50 = vrot.slane %v4519_v20, 4  ;;  %v6592_v2 = vld [vmem:[%s7778_s23 + $0x4c] sm:$0xf]  ;;  %v6679_v20 = vld [vmem:[%s7778_s23 + $0x48] sm:$0xe] }
 0x124   : > { %7550 = vmatprep.mubr.bf16.mxu0 %v9581_v34  ;;  %v6718_v9 = vrot.slane %v6676_v32, 9  ;;  %v5322_v14 = vrot.slane %v6677_v44, 5  ;;  %v5325_v57 = vrot.slane %v6678_v54, 5  ;;  %v1414_v15 = vadd.f32 %v8685_v49, %v8511_v16  ;;  %v8787_v23 = vpop.f32.mrf.mxu1  ;;  %v8789_v0 = vpop.f32.mrf.mxu0  ;;  %v6593_v32 = vld [vmem:[%s7778_s23 + $0x50] sm:$0x1] }
 0x125   : > { %7503 = vmatmul.mubr.bf16.vlgmr.msra.gmra.mxu1 %v6644_v22  ;;  %v4527_v37 = vrot.slane %v4525_v38, 5  ;;  %v4513_v1 = vrot.slane %v4512_v3, 4  ;;  %v4522_v19 = vor.u32 %v4521_v50, %v4517_v26  ;;  %v1417_v30 = vadd.f32 %v8695_v52, %v8519_v27  ;;  %v6681_v38 = vld [vmem:[%s7778_s23 + $0x50] sm:$0x1] }
 0x126   : > { %7506 = vmatprep.mubr.bf16.mxu1 %v6645_v8  ;;  %v1415_v22 = vadd.f32 %v8708_v7, %v8534_v36  ;;  %v8798_v59 = vsel %vm7849_vm4, %v6718_v9, %v5322_v14  ;;  %v5324_v16 = vrot.slane %v5322_v14, 4  ;;  %v8801_v49 = vadd.f32 %v8687_v43, %v1414_v15  ;;  %v8804_v53 = vpop.f32.mrf.mxu1  ;;  %v8806_v42 = vpop.f32.mrf.mxu0  ;;  %v6680_v43 = vld [vmem:[%s7778_s23 + $0x4c] sm:$0xf]  ;;  %v6594_v9 = vld [vmem:[%s7778_s23 + $0x54] sm:$0xf] }
 0x127   : > { %v4530_v28 = vshrl.u32 %v6591_v10, 16  ;;  %v4518_v27 = vsel %vm7868_vm5, %v4513_v1, %v4517_v26  ;;  %v4523_v36 = vrot.slane %v4522_v19, 4  ;;  %v8811_v7 = vadd.f32 %v8697_v35, %v1417_v30  ;;  %v6595_v19 = vld [vmem:[%s7778_s23 + $0x58] sm:$0xf] }
 0x128   : > { %v8814_v52 = vadd.f32 %v8710_v4, %v1415_v22  ;;  %v5326_v44 = vsel %vm7849_vm4, %v5324_v16, %v5325_v57  ;;  %v4533_v34 = vshll.u32 %v6591_v10, 16  ;;  %v4539_v41 = vshll.u32 %v6592_v2, 16  ;;  %v8821_v8 = vpop.f32.mrf.mxu1  ;;  %v8823_v26 = vpop.f32.mrf.mxu0 }
 0x129   : > { %v4532_v54 = vrot.slane %v4530_v28, 4  ;;  %v9582_v35 = vcombine.low %v8715_v61, %v8732_v17  ;;  %v4528_v4 = vsel %vm7868_vm5, %v4523_v36, %v4527_v37  ;;  %v6750_v3 = vcombine.low %v8798_v59, %v5326_v44  ;;  %v6682_v44 = vld [vmem:[%s7778_s23 + $0x54] sm:$0xe] }
 0x12a   : > { %v4543_v50 = vshrl.u32 %v6592_v2, 16  ;;  %v4549_v57 = vshll.u32 %v6593_v32, 16  ;;  %v6646_v10 = vcombine.low %v4518_v27, %v4528_v4  ;;  %v4535_v14 = vrot.slane %v4533_v34, 5  ;;  %v8837_v32 = vpop.f32.mrf.mxu0 }
 0x12b   : > { %7551 = vmatmul.mubr.bf16.vlgmr.msra.gmra.mxu0 %v9582_v35  ;;  %v4541_v15 = vrot.slane %v4539_v41, 5  ;;  %v6719_v1 = vrot.slane %v6679_v20, 9  ;;  %v5329_v61 = vrot.slane %v6680_v43, 5  ;;  %v5332_v17 = vrot.slane %v6681_v38, 5  ;;  %v6596_v20 = vld [vmem:[%s7778_s23 + $0x5c] sm:$0x1] }
 0x12c   : > { %7554 = vmatprep.mubr.bf16.mxu0 %v6749_v29  ;;  %v4545_v30 = vrot.slane %v4543_v50, 4  ;;  %v4551_v22 = vrot.slane %v4549_v57, 5  ;;  %v4536_v16 = vor.u32 %v4535_v14, %v4532_v54  ;;  %v1420_v37 = vadd.f32 %v8723_v13, %v8544_v47  ;;  %v8835_v29 = vpop.f32.mrf.mxu1  ;;  %v6683_v41 = vld [vmem:[%s7778_s23 + $0x58] sm:$0xf]  ;;  %v6684_v57 = vld [vmem:[%s7778_s23 + $0x5c] sm:$0x1] }
 0x12d   : > { %7507 = vmatmul.mubr.bf16.gmra.mxu1 %v6646_v10  ;;  %v4554_v2 = vshrl.u32 %v6594_v9, 16  ;;  %v4557_v59 = vshll.u32 %v6594_v9, 16  ;;  %v5330_v27 = vsel %vm7849_vm4, %v6719_v1, %v5329_v61  ;;  %v5331_v36 = vrot.slane %v5329_v61, 4 }
 0x12e   : > { %v4546_v28 = vor.u32 %v4545_v30, %v4541_v15  ;;  %v4563_v43 = vshll.u32 %v6595_v19, 16  ;;  %v4537_v54 = vrot.slane %v4536_v16, 4  ;;  %v8844_v34 = vadd.f32 %v8725_v55, %v1420_v37  ;;  %v8854_v55 = vpop.f32.mrf.mxu0 }
 0x12f   : > { %v4556_v47 = vrot.slane %v4554_v2, 4  ;;  %v4559_v13 = vrot.slane %v4557_v59, 5  ;;  %v5333_v35 = vsel %vm7849_vm4, %v5331_v36, %v5332_v17  ;;  %v4567_v50 = vshrl.u32 %v6595_v19, 16  ;;  %v6597_v2 = vld [vmem:[%s7778_s23 + $0x60] sm:$0xf] }
 0x130   : > { %v4547_v38 = vrot.slane %v4546_v28, 4  ;;  %v4565_v4 = vrot.slane %v4563_v43, 5  ;;  %v4542_v9 = vsel %vm7868_vm5, %v4537_v54, %v4541_v15  ;;  %v6751_v10 = vcombine.low %v5330_v27, %v5333_v35  ;;  %v8852_v30 = vpop.f32.mrf.mxu1  ;;  %v8861_v36 = vpop.f32.mrf.mxu0 }
 0x131   : > { %v4560_v14 = vor.u32 %v4559_v13, %v4556_v47  ;;  %v4573_v1 = vshll.u32 %v6596_v20, 16  ;;  %v4569_v16 = vrot.slane %v4567_v50, 4  ;;  %v6720_v37 = vrot.slane %v6682_v44, 9  ;;  %v6598_v13 = vld [vmem:[%s7778_s23 + $0x64] sm:$0xf] }
 0x132   : > { %v4552_v61 = vsel %vm7868_vm5, %v4547_v38, %v4551_v22  ;;  %v5336_v17 = vrot.slane %v6683_v41, 5  ;;  %v5339_v28 = vrot.slane %v6684_v57, 5  ;;  %v8859_v27 = vpop.f32.mrf.mxu1  ;;  %v1418_v43 = vadd.f32 %v8739_v40, %v8556_v62  ;;  %v6599_v41 = vld [vmem:[%s7778_s23 + $0x68] sm:$0x1]  ;;  %v8877_v50 = vpop.f32.mrf.mxu0 }
 0x133   : > { %7555 = vmatmul.mubr.bf16.gmra.mxu0 %v6750_v3  ;;  %v6647_v19 = vcombine.low %v4542_v9, %v4552_v61  ;;  %v4561_v15 = vrot.slane %v4560_v14, 4  ;;  %v4575_v59 = vrot.slane %v4573_v1, 5  ;;  %v4570_v20 = vor.u32 %v4569_v16, %v4565_v4  ;;  %v6687_v14 = vld [vmem:[%s7778_s23 + $0x68] sm:$0x1] }
 0x134   : > { %7558 = vmatprep.mubr.bf16.mxu0 %v6751_v10  ;;  %v5337_v3 = vsel %vm7849_vm4, %v6720_v37, %v5336_v17  ;;  %v5338_v22 = vrot.slane %v5336_v17, 4  ;;  %v1421_v54 = vadd.f32 %v8751_v24, %v8565_v12  ;;  %v1419_v47 = vadd.f32 %v8768_v11, %v8580_v25  ;;  %v8875_v35 = vpop.f32.mrf.mxu1  ;;  %v6685_v12 = vld [vmem:[%s7778_s23 + $0x60] sm:$0xe]  ;;  %v6686_v24 = vld [vmem:[%s7778_s23 + $0x64] sm:$0xf] }
 0x135   : > { %7510 = vmatprep.mubr.bf16.mxu1 %v6647_v19  ;;  %v4566_v44 = vsel %vm7868_vm5, %v4561_v15, %v4565_v4  ;;  %v4578_v38 = vshrl.u32 %v6597_v2, 16  ;;  %v4571_v57 = vrot.slane %v4570_v20, 4  ;;  %v8882_v40 = vadd.f32 %v8741_v63, %v1418_v43  ;;  %v6600_v15 = vld [vmem:[%s7778_s23 + $0x6c] sm:$0xf] }
 0x136   : > { %v5340_v62 = vsel %vm7849_vm4, %v5338_v22, %v5339_v28  ;;  %v4581_v4 = vshll.u32 %v6597_v2, 16  ;;  %v8887_v11 = vadd.f32 %v8753_v48, %v1421_v54  ;;  %v8890_v9 = vadd.f32 %v8770_v5, %v1419_v47  ;;  %v8896_v48 = vpop.f32.mrf.mxu1  ;;  %v8898_v28 = vpop.f32.mrf.mxu0  ;;  %v6601_v22 = vld [vmem:[%s7778_s23 + $0x70] sm:$0xf] }
 0x137   : > { %v6752_v25 = vcombine.low %v5337_v3, %v5340_v62  ;;  %v4580_v10 = vrot.slane %v4578_v38, 4  ;;  %v4576_v1 = vsel %vm7868_vm5, %v4571_v57, %v4575_v59  ;;  %v4587_v63 = vshll.u32 %v6598_v13, 16 }
 0x138   : > { %9583 = vst [vmem:[#allocation18_spill] sm:$0xff] %v8890_v9  ;;  %v4583_v61 = vrot.slane %v4581_v4, 5  ;;  %v4591_v16 = vshrl.u32 %v6598_v13, 16  ;;  %v6648_v37 = vcombine.low %v4566_v44, %v4576_v1  ;;  %v4597_v17 = vshll.u32 %v6599_v41, 16  ;;  %v6602_v13 = vld [vmem:[%s7778_s23 + $0x74] sm:$0x1] }
 0x139   : > { %v6721_v2 = vrot.slane %v6685_v12, 9  ;;  %v5343_v19 = vrot.slane %v6686_v24, 5  ;;  %v4589_v20 = vrot.slane %v4587_v63, 5  ;;  %v5346_v59 = vrot.slane %v6687_v14, 5  ;;  %v6688_v4 = vld [vmem:[%s7778_s23 + $0x6c] sm:$0xe] }
 0x13a   : > { %v4584_v5 = vor.u32 %v4583_v61, %v4580_v10  ;;  %v4593_v3 = vrot.slane %v4591_v16, 4  ;;  %7511 = vmatmul.mubr.bf16.gmra.mxu1 %v6648_v37  ;;  %v4599_v43 = vrot.slane %v4597_v17, 5  ;;  %v1424_v47 = vadd.f32 %v8787_v23, %v8587_v31  ;;  %v6689_v14 = vld [vmem:[%s7778_s23 + $0x70] sm:$0xf]  ;;  %v6690_v1 = vld [vmem:[%s7778_s23 + $0x74] sm:$0x1]  ;;  %v8914_v61 = vpop.f32.mrf.mxu1  ;;  %v8916_v63 = vpop.f32.mrf.mxu0 }
 0x13b   : > { %7559 = vmatmul.mubr.bf16.gmra.mxu0 %v6752_v25  ;;  %v5344_v44 = vsel %vm7849_vm4, %v6721_v2, %v5343_v19  ;;  %v5345_v54 = vrot.slane %v5343_v19, 4  ;;  %v4602_v57 = vshrl.u32 %v6600_v15, 16  ;;  %v4605_v62 = vshll.u32 %v6600_v15, 16 }
 0x13c   : > { %v4585_v41 = vrot.slane %v4584_v5, 4  ;;  %v4594_v38 = vor.u32 %v4593_v3, %v4589_v20  ;;  %v8910_v24 = vadd.f32 %v8789_v0, %v1424_v47  ;;  %v4611_v25 = vshll.u32 %v6601_v22, 16  ;;  %v8920_v15 = vpop.f32.mrf.mxu1  ;;  %v8922_v5 = vpop.f32.mrf.mxu0 }
 0x13d   : > { %v5347_v12 = vsel %vm7849_vm4, %v5345_v54, %v5346_v59  ;;  %v4615_v10 = vshrl.u32 %v6601_v22, 16  ;;  %v4604_v37 = vrot.slane %v4602_v57, 4  ;;  %v4607_v17 = vrot.slane %v4605_v62, 5 }
 0x13e   : > { %9584 = vst [vmem:[#allocation19_spill] sm:$0xff] %v8910_v24  ;;  %v4590_v31 = vsel %vm7868_vm5, %v4585_v41, %v4589_v20  ;;  %v4595_v23 = vrot.slane %v4594_v38, 4  ;;  %v6753_v16 = vcombine.low %v5344_v44, %v5347_v12  ;;  %v4613_v2 = vrot.slane %v4611_v25, 5  ;;  %v6603_v20 = vld [vmem:[%s7778_s23 + $0x78] sm:$0xf]  ;;  %v8927_v57 = vpop.f32.mrf.mxu1 }
 0x13f   : > { %v4617_v19 = vrot.slane %v4615_v10, 4  ;;  %v4621_v0 = vshll.u32 %v6602_v13, 16  ;;  %v6722_v59 = vrot.slane %v6688_v4, 9  ;;  %v5350_v22 = vrot.slane %v6689_v14, 5  ;;  %v8929_v13 = vpop.f32.mrf.mxu0  ;;  %v6604_v25 = vld [vmem:[%s7778_s23 + $0x7c] sm:$0xf] }
 0x140   : > { %v4600_v3 = vsel %vm7868_vm5, %v4595_v23, %v4599_v43  ;;  %7562 = vmatprep.mubr.bf16.mxu0 %v6753_v16  ;;  %v5353_v54 = vrot.slane %v6690_v1, 5  ;;  %v4608_v47 = vor.u32 %v4607_v17, %v4604_v37  ;;  %v1422_v4 = vadd.f32 %v8804_v53, %v8594_v45  ;;  %v6691_v53 = vld [vmem:[%s7778_s23 + $0x78] sm:$0xe] }
 0x141   : > { %v6649_v44 = vcombine.low %v4590_v31, %v4600_v3  ;;  %v4618_v41 = vor.u32 %v4617_v19, %v4613_v2  ;;  %v4623_v38 = vrot.slane %v4621_v0, 5  ;;  %v5351_v62 = vsel %vm7849_vm4, %v6722_v59, %v5350_v22  ;;  %v6605_v31 = vld [vmem:[%s7778_s23 + $0x80] sm:$0x1]  ;;  %v8961_v3 = vpop.f32.mrf.mxu0 }
 0x142   : > { %v5352_v43 = vrot.slane %v5350_v22, 4  ;;  %v1425_v12 = vadd.f32 %v8821_v8, %v8600_v58  ;;  %v4609_v10 = vrot.slane %v4608_v47, 4  ;;  %v1423_v1 = vadd.f32 %v8835_v29, %v8615_v21  ;;  %v6692_v8 = vld [vmem:[%s7778_s23 + $0x7c] sm:$0xf]  ;;  %v6693_v0 = vld [vmem:[%s7778_s23 + $0x80] sm:$0x1] }
 0x143   : > { %7514 = vmatprep.mubr.bf16.mxu1 %v6649_v44  ;;  %v4619_v14 = vrot.slane %v4618_v41, 4  ;;  %v4626_v23 = vshrl.u32 %v6603_v20, 16  ;;  %v8944_v37 = vadd.f32 %v8806_v42, %v1422_v4  ;;  %v4629_v58 = vshll.u32 %v6603_v20, 16  ;;  %v8959_v42 = vpop.f32.mrf.mxu1  ;;  %v6606_v41 = vld [vmem:[%s7778_s23 + $0x84] sm:$0xf] }
 0x144   : > { %v5354_v16 = vsel %vm7849_vm4, %v5352_v43, %v5353_v54  ;;  %v8947_v45 = vadd.f32 %v8823_v26, %v1425_v12  ;;  %v4614_v17 = vsel %vm7868_vm5, %v4609_v10, %v4613_v2  ;;  %v8956_v19 = vadd.f32 %v8837_v32, %v1423_v1  ;;  %v6607_v4 = vld [vmem:[%s7778_s23 + $0x88] sm:$0xf]  ;;  %v6608_v1 = vld [vmem:[%s7778_s23 + $0x8c] sm:$0x1] }
 0x145   : > { %9585 = vst [vmem:[#allocation20_spill] sm:$0xff] %v8944_v37  ;;  %v4624_v21 = vsel %vm7868_vm5, %v4619_v14, %v4623_v38  ;;  %v6754_v29 = vcombine.low %v5351_v62, %v5354_v16  ;;  %v4628_v59 = vrot.slane %v4626_v23, 4  ;;  %v4631_v22 = vrot.slane %v4629_v58, 5 }
 0x146   : > { %9586 = vst [vmem:[#allocation21_spill] sm:$0xff] %v8947_v45  ;;  %9587 = vst [vmem:[#allocation22_spill] sm:$0xff] %v8956_v19  ;;  %v6650_v26 = vcombine.low %v4614_v17, %v4624_v21  ;;  %v4635_v54 = vshll.u32 %v6604_v25, 16  ;;  %v4639_v2 = vshrl.u32 %v6604_v25, 16  ;;  %v4645_v20 = vshll.u32 %v6605_v31, 16  ;;  %v8970_v31 = vpop.f32.mrf.mxu1  ;;  %v8972_v23 = vpop.f32.mrf.mxu0 }
 0x147   : > { %7563 = vmatmul.mubr.bf16.gmra.mxu0 %v6754_v29  ;;  %v6723_v44 = vrot.slane %v6691_v53, 9  ;;  %v5357_v47 = vrot.slane %v6692_v8, 5  ;;  %v4632_v32 = vor.u32 %v4631_v22, %v4628_v59  ;;  %v5360_v62 = vrot.slane %v6693_v0, 5  ;;  %v6695_v0 = vld [vmem:[%s7778_s23 + $0x88] sm:$0xf] }
 0x148   : > { %7515 = vmatmul.mubr.bf16.gmra.mxu1 %v6650_v26  ;;  %v4637_v38 = vrot.slane %v4635_v54, 5  ;;  %v1428_v43 = vadd.f32 %v8852_v30, %v8457_v33  ;;  %v4641_v12 = vrot.slane %v4639_v2, 4  ;;  %v4647_v10 = vrot.slane %v4645_v20, 5  ;;  %v6694_v30 = vld [vmem:[%s7778_s23 + $0x84] sm:$0xe]  ;;  %v8982_v59 = vpop.f32.mrf.mxu1  ;;  %v8984_v22 = vpop.f32.mrf.mxu0 }
 0x149   : > { %v5358_v25 = vsel %vm7849_vm4, %v6723_v44, %v5357_v47  ;;  %v5359_v14 = vrot.slane %v5357_v47, 4  ;;  %v4633_v16 = vrot.slane %v4632_v32, 4  ;;  %v4650_v53 = vshrl.u32 %v6606_v41, 16  ;;  %v6696_v26 = vld [vmem:[%s7778_s23 + $0x8c] sm:$0x1] }
 0x14a   : > { %v8975_v58 = vadd.f32 %v8854_v55, %v1428_v43  ;;  %v4653_v33 = vshll.u32 %v6606_v41, 16  ;;  %v4642_v8 = vor.u32 %v4641_v12, %v4637_v38  ;;  %v4659_v21 = vshll.u32 %v6607_v4, 16  ;;  %v8990_v43 = vpop.f32.mrf.mxu0 }
 0x14b   : > { %v5361_v17 = vsel %vm7849_vm4, %v5359_v14, %v5360_v62  ;;  %v4663_v29 = vshrl.u32 %v6607_v4, 16  ;;  %v4638_v54 = vsel %vm7868_vm5, %v4633_v16, %v4637_v38  ;;  %v4652_v2 = vrot.slane %v4650_v53, 4  ;;  %v8988_v62 = vpop.f32.mrf.mxu1 }
 0x14c   : > { %9588 = vst [vmem:[#allocation23_spill] sm:$0xff] %v8975_v58  ;;  %v6755_v55 = vcombine.low %v5358_v25, %v5361_v17  ;;  %v4655_v20 = vrot.slane %v4653_v33, 5  ;;  %v4643_v44 = vrot.slane %v4642_v8, 4  ;;  %v4661_v47 = vrot.slane %v4659_v21, 5 }
 0x14d   : > { %v4665_v41 = vrot.slane %v4663_v29, 4  ;;  %v4669_v32 = vshll.u32 %v6608_v1, 16  ;;  %v6724_v12 = vrot.slane %v6694_v30, 9  ;;  %v5364_v14 = vrot.slane %v6695_v0, 5  ;;  %v6609_v1 = vld [vmem:[%s7778_s23 + $0x90] sm:$0xf] }
 0x14e   : > { %7566 = vmatprep.mubr.bf16.mxu0 %v6755_v55  ;;  %v4656_v4 = vor.u32 %v4655_v20, %v4652_v2  ;;  %v5367_v58 = vrot.slane %v6696_v26, 5  ;;  %v4648_v38 = vsel %vm7868_vm5, %v4643_v44, %v4647_v10  ;;  %v1426_v53 = vadd.f32 %v8859_v27, %v8464_v39  ;;  %v6610_v39 = vld [vmem:[%s7778_s23 + $0x94] sm:$0xf]  ;;  %v6611_v27 = vld [vmem:[%s7778_s23 + $0x98] sm:$0x1]  ;;  %v9008_v26 = vpop.f32.mrf.mxu1 }
 0x14f   : > { %v4666_v25 = vor.u32 %v4665_v41, %v4661_v47  ;;  %v4671_v16 = vrot.slane %v4669_v32, 5  ;;  %v6651_v33 = vcombine.low %v4638_v54, %v4648_v38  ;;  %v5365_v17 = vsel %vm7849_vm4, %v6724_v12, %v5364_v14  ;;  %v9010_v54 = vpop.f32.mrf.mxu0  ;;  %v6699_v32 = vld [vmem:[%s7778_s23 + $0x98] sm:$0x1] }
 0x150   : > { %v4657_v8 = vrot.slane %v4656_v4, 4  ;;  %v5366_v30 = vrot.slane %v5364_v14, 4  ;;  %v9000_v29 = vadd.f32 %v8861_v36, %v1426_v53  ;;  %v1429_v10 = vadd.f32 %v8875_v35, %v8476_v51  ;;  %v6697_v51 = vld [vmem:[%s7778_s23 + $0x90] sm:$0xe]  ;;  %v6698_v35 = vld [vmem:[%s7778_s23 + $0x94] sm:$0xf] }
 0x151   : > { %v4667_v21 = vrot.slane %v4666_v25, 4  ;;  %v1427_v0 = vadd.f32 %v8896_v48, %v8487_v60  ;;  %7518 = vmatprep.mubr.bf16.mxu1 %v6651_v33  ;;  %v4674_v2 = vshrl.u32 %v6609_v1, 16  ;;  %v4677_v20 = vshll.u32 %v6609_v1, 16 }
 0x152   : > { %9589 = vst [vmem:[#allocation24_spill] sm:$0xff] %v9000_v29  ;;  %v4662_v55 = vsel %vm7868_vm5, %v4657_v8, %v4661_v47  ;;  %v5368_v36 = vsel %vm7849_vm4, %v5366_v30, %v5367_v58  ;;  %v9021_v44 = vadd.f32 %v8877_v50, %v1429_v10  ;;  %v4683_v12 = vshll.u32 %v6610_v39, 16  ;;  %v9028_v1 = vpop.f32.mrf.mxu1  ;;  %v9030_v50 = vpop.f32.mrf.mxu0  ;;  %v6613_v30 = vld [vmem:[%s7778_s23 + $0xa0] sm:$0xf] }
 0x153   : > { %v4672_v60 = vsel %vm7868_vm5, %v4667_v21, %v4671_v16  ;;  %v6756_v48 = vcombine.low %v5365_v17, %v5368_v36  ;;  %v9024_v41 = vadd.f32 %v8898_v28, %v1427_v0  ;;  %v4676_v4 = vrot.slane %v4674_v2, 4  ;;  %v6612_v16 = vld [vmem:[%s7778_s23 + $0x9c] sm:$0xf] }
 0x154   : > { %9590 = vst [vmem:[#allocation25_spill] sm:$0xff] %v9021_v44  ;;  %v6652_v47 = vcombine.low %v4662_v55, %v4672_v60  ;;  %v4679_v58 = vrot.slane %v4677_v20, 5  ;;  %v4687_v14 = vshrl.u32 %v6610_v39, 16  ;;  %v4693_v38 = vshll.u32 %v6611_v27, 16  ;;  %v6614_v27 = vld [vmem:[%s7778_s23 + $0xa4] sm:$0x1]  ;;  %v9038_v55 = vpop.f32.mrf.mxu1  ;;  %v9040_v36 = vpop.f32.mrf.mxu0 }
 0x155   : > { %9591 = vst [vmem:[#allocation26_spill] sm:$0xff] %v9024_v41  ;;  %7567 = vmatmul.mubr.bf16.gmra.mxu0 %v6756_v48  ;;  %v6725_v25 = vrot.slane %v6697_v51, 9  ;;  %v5371_v53 = vrot.slane %v6698_v35, 5  ;;  %v4685_v33 = vrot.slane %v4683_v12, 5  ;;  %v5374_v8 = vrot.slane %v6699_v32, 5 }
 0x156   : > { %7519 = vmatmul.mubr.bf16.gmra.mxu1 %v6652_v47  ;;  %v4680_v28 = vor.u32 %v4679_v58, %v4676_v4  ;;  %v1432_v17 = vadd.f32 %v8914_v61, %v8499_v6  ;;  %v4689_v21 = vrot.slane %v4687_v14, 4  ;;  %v4695_v10 = vrot.slane %v4693_v38, 5  ;;  %v6700_v61 = vld [vmem:[%s7778_s23 + $0x9c] sm:$0xe]  ;;  %v6701_v47 = vld [vmem:[%s7778_s23 + $0xa0] sm:$0xf]  ;;  %v9050_v58 = vpop.f32.mrf.mxu1  ;;  %v9052_v12 = vpop.f32.mrf.mxu0 }
 0x157   : > { %v5372_v0 = vsel %vm7849_vm4, %v6725_v25, %v5371_v53  ;;  %v5373_v39 = vrot.slane %v5371_v53, 4  ;;  %v4698_v51 = vshrl.u32 %v6612_v16, 16  ;;  %v4701_v6 = vshll.u32 %v6612_v16, 16  ;;  %v6702_v4 = vld [vmem:[%s7778_s23 + $0xa4] sm:$0x1] }
 0x158   : > { %v4681_v2 = vrot.slane %v4680_v28, 4  ;;  %v9043_v20 = vadd.f32 %v8916_v63, %v1432_v17  ;;  %v4690_v35 = vor.u32 %v4689_v21, %v4685_v33  ;;  %v4707_v48 = vshll.u32 %v6613_v30, 16  ;;  %v9058_v41 = vpop.f32.mrf.mxu0 }
 0x159   : > { %v5375_v60 = vsel %vm7849_vm4, %v5373_v39, %v5374_v8  ;;  %v4711_v32 = vshrl.u32 %v6613_v30, 16  ;;  %v4700_v38 = vrot.slane %v4698_v51, 4  ;;  %v4703_v25 = vrot.slane %v4701_v6, 5  ;;  %v9056_v8 = vpop.f32.mrf.mxu1 }
 0x15a   : > { %9592 = vst [vmem:[#allocation27_spill] sm:$0xff] %v9043_v20  ;;  %v4686_v14 = vsel %vm7868_vm5, %v4681_v2, %v4685_v33  ;;  %v6757_v63 = vcombine.low %v5372_v0, %v5375_v60  ;;  %v4691_v53 = vrot.slane %v4690_v35, 4  ;;  %v4709_v16 = vrot.slane %v4707_v48, 5 }
 0x15b   : > { %v4713_v28 = vrot.slane %v4711_v32, 4  ;;  %v4717_v17 = vshll.u32 %v6614_v27, 16  ;;  %v4704_v30 = vor.u32 %v4703_v25, %v4700_v38  ;;  %v6726_v21 = vrot.slane %v6700_v61, 9  ;;  %v6615_v27 = vld [vmem:[%s7778_s23 + $0xa8] sm:$0xf]  ;;  %v9065_v6 = vpop.f32.mrf.mxu1 }
 0x15c   : > { %7570 = vmatprep.mubr.bf16.mxu0 %v6757_v63  ;;  %v5378_v39 = vrot.slane %v6701_v47, 5  ;;  %v5381_v20 = vrot.slane %v6702_v4, 5  ;;  %v4696_v33 = vsel %vm7868_vm5, %v4691_v53, %v4695_v10  ;;  %v1430_v51 = vadd.f32 %v8920_v15, %v8513_v18  ;;  %v9594_v10 = vld [vmem:[#allocation3_spill] sm:$0xff]  ;;  %v9595_v63 = vld [vmem:[#allocation4_spill] sm:$0xff] }
 0x15d   : > { %v4714_v0 = vor.u32 %v4713_v28, %v4709_v16  ;;  %v4719_v2 = vrot.slane %v4717_v17, 5  ;;  %v6653_v35 = vcombine.low %v4686_v14, %v4696_v33  ;;  %v4705_v61 = vrot.slane %v4704_v30, 4  ;;  %v6616_v15 = vld [vmem:[%s7778_s23 + $0xac] sm:$0xf]  ;;  %v6617_v14 = vld [vmem:[%s7778_s23 + $0xb0] sm:$0x1]  ;;  %v9078_v38 = vpop.f32.mrf.mxu1 }
 0x15e   : > { %v5379_v60 = vsel %vm7849_vm4, %v6726_v21, %v5378_v39  ;;  %v5380_v48 = vrot.slane %v5378_v39, 4  ;;  %v9070_v47 = vadd.f32 %v8922_v5, %v1430_v51  ;;  %v1433_v4 = vadd.f32 %v8927_v57, %v9594_v10  ;;  %v6703_v17 = vld [vmem:[%s7778_s23 + $0xa8] sm:$0xe]  ;;  %v6704_v30 = vld [vmem:[%s7778_s23 + $0xac] sm:$0xf]  ;;  %v9086_v57 = vpop.f32.mrf.mxu0 }
 0x15f   : > { %v4715_v32 = vrot.slane %v4714_v0, 4  ;;  %v1431_v18 = vadd.f32 %v8959_v42, %v9595_v63  ;;  %7522 = vmatprep.mubr.bf16.mxu1 %v6653_v35  ;;  %v4710_v25 = vsel %vm7868_vm5, %v4705_v61, %v4709_v16  ;;  %v4722_v5 = vshrl.u32 %v6615_v27, 16  ;;  %v6705_v16 = vld [vmem:[%s7778_s23 + $0xb0] sm:$0x1]  ;;  %v9097_v0 = vpop.f32.mrf.mxu1 }
 0x160   : > { %9593 = vst [vmem:[#allocation28_spill] sm:$0xff] %v9070_v47  ;;  %v5382_v53 = vsel %vm7849_vm4, %v5380_v48, %v5381_v20  ;;  %v4725_v28 = vshll.u32 %v6615_v27, 16  ;;  %v9091_v39 = vadd.f32 %v8929_v13, %v1433_v4  ;;  %v4731_v35 = vshll.u32 %v6616_v15, 16  ;;  %v9099_v61 = vpop.f32.mrf.mxu0 }
 0x161   : > { %v4720_v42 = vsel %vm7868_vm5, %v4715_v32, %v4719_v2  ;;  %v6758_v21 = vcombine.low %v5379_v60, %v5382_v53  ;;  %v9094_v33 = vadd.f32 %v8961_v3, %v1431_v18  ;;  %v4724_v51 = vrot.slane %v4722_v5, 4  ;;  %v6618_v32 = vld [vmem:[%s7778_s23 + $0xb4] sm:$0xf]  ;;  %v9102_v10 = vpop.f32.mrf.mxu1  ;;  %v6619_v53 = vld [vmem:[%s7778_s23 + $0xb8] sm:$0xf] }
 0x162   : > { %9596 = vst [vmem:[#allocation3_spill] sm:$0xff] %v9091_v39  ;;  %v6654_v20 = vcombine.low %v4710_v25, %v4720_v42  ;;  %v4727_v27 = vrot.slane %v4725_v28, 5  ;;  %v4735_v2 = vshrl.u32 %v6616_v15, 16  ;;  %v4741_v48 = vshll.u32 %v6617_v14, 16  ;;  %v9598_v18 = vld [vmem:[#allocation5_spill] sm:$0xff]  ;;  %v9107_v5 = vpop.f32.mrf.mxu0 }
 0x163   : > { %9597 = vst [vmem:[#allocation4_spill] sm:$0xff] %v9094_v33  ;;  %7571 = vmatmul.mubr.bf16.gmra.mxu0 %v6758_v21  ;;  %v6727_v60 = vrot.slane %v6703_v17, 9  ;;  %v5385_v13 = vrot.slane %v6704_v30, 5  ;;  %v4733_v4 = vrot.slane %v4731_v35, 5  ;;  %v5388_v63 = vrot.slane %v6705_v16, 5  ;;  %v9112_v42 = vpop.f32.mrf.mxu1 }
 0x164   : > { %7523 = vmatmul.mubr.bf16.gmra.mxu1 %v6654_v20  ;;  %v4728_v3 = vor.u32 %v4727_v27, %v4724_v51  ;;  %v1436_v25 = vadd.f32 %v8970_v31, %v9598_v18  ;;  %v4737_v28 = vrot.slane %v4735_v2, 4  ;;  %v4743_v15 = vrot.slane %v4741_v48, 5  ;;  %v6620_v30 = vld [vmem:[%s7778_s23 + $0xbc] sm:$0x1]  ;;  %v6706_v51 = vld [vmem:[%s7778_s23 + $0xb4] sm:$0xe]  ;;  %v9118_v27 = vpop.f32.mrf.mxu0 }
 0x165   : > { %v5386_v14 = vsel %vm7849_vm4, %v6727_v60, %v5385_v13  ;;  %v5387_v17 = vrot.slane %v5385_v13, 4  ;;  %v4746_v20 = vshrl.u32 %v6618_v32, 16  ;;  %v4749_v31 = vshll.u32 %v6618_v32, 16  ;;  %v6707_v60 = vld [vmem:[%s7778_s23 + $0xb8] sm:$0xf]  ;;  %v9124_v33 = vpop.f32.mrf.mxu1 }
 0x166   : > { %v4729_v21 = vrot.slane %v4728_v3, 4  ;;  %v9115_v16 = vadd.f32 %v8972_v23, %v1436_v25  ;;  %v4738_v35 = vor.u32 %v4737_v28, %v4733_v4  ;;  %v4755_v48 = vshll.u32 %v6619_v53, 16  ;;  %v6708_v13 = vld [vmem:[%s7778_s23 + $0xbc] sm:$0x1]  ;;  %v9130_v19 = vpop.f32.mrf.mxu0 }
 0x167   : > { %v5389_v2 = vsel %vm7849_vm4, %v5387_v17, %v5388_v63  ;;  %v4759_v18 = vshrl.u32 %v6619_v53, 16  ;;  %v4748_v25 = vrot.slane %v4746_v20, 4  ;;  %v4765_v28 = vshll.u32 %v6620_v30, 16  ;;  %v9128_v44 = vpop.f32.mrf.mxu1  ;;  %v9600_v20 = vld [vmem:[#allocation6_spill] sm:$0xff]  ;;  %v6621_v30 = vld [vmem:[%s7778_s23 + $0xc0] sm:$0xf] }
 0x168   : > { %9599 = vst [vmem:[#allocation5_spill] sm:$0xff] %v9115_v16  ;;  %v4734_v3 = vsel %vm7868_vm5, %v4729_v21, %v4733_v4  ;;  %v6759_v23 = vcombine.low %v5386_v14, %v5389_v2  ;;  %v4751_v16 = vrot.slane %v4749_v31, 5  ;;  %v4739_v32 = vrot.slane %v4738_v35, 4 }
 0x169   : > { %v4757_v39 = vrot.slane %v4755_v48, 5  ;;  %v4761_v47 = vrot.slane %v4759_v18, 4  ;;  %v6728_v53 = vrot.slane %v6706_v51, 9  ;;  %v5392_v17 = vrot.slane %v6707_v60, 5  ;;  %v9137_v35 = vpop.f32.mrf.mxu1  ;;  %v9141_v18 = vpop.f32.mrf.mxu0  ;;  %v9602_v60 = vld [vmem:[#allocation7_spill] sm:$0xff] }
 0x16a   : > { %7574 = vmatprep.mubr.bf16.mxu0 %v6759_v23  ;;  %v4752_v63 = vor.u32 %v4751_v16, %v4748_v25  ;;  %v5395_v29 = vrot.slane %v6708_v13, 5  ;;  %v4744_v4 = vsel %vm7868_vm5, %v4739_v32, %v4743_v15  ;;  %v4767_v21 = vrot.slane %v4765_v28, 5  ;;  %v9603_v13 = vld [vmem:[#allocation8_spill] sm:$0xff] }
 0x16b   : > { %v4762_v14 = vor.u32 %v4761_v47, %v4757_v39  ;;  %v1434_v31 = vadd.f32 %v8982_v59, %v9600_v20  ;;  %v6655_v2 = vcombine.low %v4734_v3, %v4744_v4  ;;  %v5393_v51 = vsel %vm7849_vm4, %v6728_v53, %v5392_v17  ;;  %v6622_v3 = vld [vmem:[%s7778_s23 + $0xc4] sm:$0xf]  ;;  %v6623_v25 = vld [vmem:[%s7778_s23 + $0xc8] sm:$0x1]  ;;  %v9152_v32 = vpop.f32.mrf.mxu1 }
 0x16c   : > { %v4753_v16 = vrot.slane %v4752_v63, 4  ;;  %v5394_v48 = vrot.slane %v5392_v17, 4  ;;  %v1437_v59 = vadd.f32 %v8988_v62, %v9602_v60  ;;  %v1435_v23 = vadd.f32 %v9008_v26, %v9603_v13  ;;  %v6709_v17 = vld [vmem:[%s7778_s23 + $0xc0] sm:$0xe]  ;;  %v6710_v4 = vld [vmem:[%s7778_s23 + $0xc4] sm:$0xf]  ;;  %v9160_v62 = vpop.f32.mrf.mxu0 }
 0x16d   : > { %v4763_v15 = vrot.slane %v4762_v14, 4  ;;  %v9144_v47 = vadd.f32 %v8984_v22, %v1434_v31  ;;  %7526 = vmatprep.mubr.bf16.mxu1 %v6655_v2  ;;  %v4770_v22 = vshrl.u32 %v6621_v30, 16  ;;  %v4773_v53 = vshll.u32 %v6621_v30, 16  ;;  %v9171_v2 = vpop.f32.mrf.mxu1 }
 0x16e   : > { %v4758_v28 = vsel %vm7868_vm5, %v4753_v16, %v4757_v39  ;;  %v5396_v63 = vsel %vm7849_vm4, %v5394_v48, %v5395_v29  ;;  %v9165_v20 = vadd.f32 %v8990_v43, %v1437_v59  ;;  %v9168_v31 = vadd.f32 %v9010_v54, %v1435_v23  ;;  %v6711_v39 = vld [vmem:[%s7778_s23 + $0xc8] sm:$0x1]  ;;  %v9173_v60 = vpop.f32.mrf.mxu0  ;;  %v6624_v59 = vld [vmem:[%s7778_s23 + $0xcc] sm:$0xf] }
 0x16f   : > { %9601 = vst [vmem:[#allocation6_spill] sm:$0xff] %v9144_v47  ;;  %v4768_v26 = vsel %vm7868_vm5, %v4763_v15, %v4767_v21  ;;  %v6760_v14 = vcombine.low %v5393_v51, %v5396_v63  ;;  %v4772_v30 = vrot.slane %v4770_v22, 4  ;;  %v4775_v16 = vrot.slane %v4773_v53, 5  ;;  %v9176_v13 = vpop.f32.mrf.mxu1  ;;  %v9607_v63 = vld [vmem:[#allocation9_spill] sm:$0xff] }
 0x170   : > { %9604 = vst [vmem:[#allocation7_spill] sm:$0xff] %v9165_v20  ;;  %9605 = vst [vmem:[#allocation8_spill] sm:$0xff] %v9168_v31  ;;  %v6656_v29 = vcombine.low %v4758_v28, %v4768_v26  ;;  %v4779_v48 = vshll.u32 %v6622_v3, 16  ;;  %v4783_v21 = vshrl.u32 %v6622_v3, 16  ;;  %v4789_v51 = vshll.u32 %v6623_v25, 16 }
 0x171   : > { %7575 = vmatmul.mubr.bf16.gmra.mxu0 %v6760_v14  ;;  %v6729_v15 = vrot.slane %v6709_v17, 9  ;;  %v5399_v43 = vrot.slane %v6710_v4, 5  ;;  %9606 = vst [vmem:[#allocation29_spill] sm:$0xff] %v9176_v13  ;;  %v4776_v54 = vor.u32 %v4775_v16, %v4772_v30  ;;  %v5402_v28 = vrot.slane %v6711_v39, 5  ;;  %v6625_v53 = vld [vmem:[%s7778_s23 + $0xd0] sm:$0xf]  ;;  %v9184_v4 = vpop.f32.mrf.mxu0 }
 0x172   : > { %7527 = vmatmul.mubr.bf16.gmra.mxu1 %v6656_v29  ;;  %v4781_v23 = vrot.slane %v4779_v48, 5  ;;  %v1440_v22 = vadd.f32 %v9028_v1, %v9607_v63  ;;  %v4785_v26 = vrot.slane %v4783_v21, 4  ;;  %v4791_v14 = vrot.slane %v4789_v51, 5  ;;  %v6626_v17 = vld [vmem:[%s7778_s23 + $0xd4] sm:$0x1]  ;;  %v9186_v29 = vpop.f32.mrf.mxu1 }
 0x173   : > { %v5400_v3 = vsel %vm7849_vm4, %v6729_v15, %v5399_v43  ;;  %v5401_v25 = vrot.slane %v5399_v43, 4  ;;  %9608 = vst [vmem:[#allocation9_spill] sm:$0xff] %v9186_v29  ;;  %v4777_v30 = vrot.slane %v4776_v54, 4  ;;  %v4794_v16 = vshrl.u32 %v6624_v59, 16  ;;  %v6712_v48 = vld [vmem:[%s7778_s23 + $0xcc] sm:$0xe]  ;;  %v9196_v20 = vpop.f32.mrf.mxu0 }
 0x174   : > { %v9189_v39 = vadd.f32 %v9030_v50, %v1440_v22  ;;  %v4797_v1 = vshll.u32 %v6624_v59, 16  ;;  %v4786_v21 = vor.u32 %v4785_v26, %v4781_v23  ;;  %v4803_v63 = vshll.u32 %v6625_v53, 16  ;;  %v6713_v15 = vld [vmem:[%s7778_s23 + $0xd0] sm:$0xf]  ;;  %v6714_v43 = vld [vmem:[%s7778_s23 + $0xd4] sm:$0x1]  ;;  %v9198_v47 = vpop.f32.mrf.mxu1 }
 0x175   : > { %v5403_v51 = vsel %vm7849_vm4, %v5401_v25, %v5402_v28  ;;  %v4807_v31 = vshrl.u32 %v6625_v53, 16  ;;  %9610 = vst [vmem:[#allocation31_spill] sm:$0xff] %v9198_v47  ;;  %v4782_v54 = vsel %vm7868_vm5, %v4777_v30, %v4781_v23  ;;  %v4796_v22 = vrot.slane %v4794_v16, 4  ;;  %v9202_v24 = vpop.f32.mrf.mxu0 }
 0x176   : > { %9609 = vst [vmem:[#allocation30_spill] sm:$0xff] %v9189_v39  ;;  %v6761_v50 = vcombine.low %v5400_v3, %v5403_v51  ;;  %v4799_v39 = vrot.slane %v4797_v1, 5  ;;  %v4787_v59 = vrot.slane %v4786_v21, 4  ;;  %v4805_v45 = vrot.slane %v4803_v63, 5  ;;  %v2379_v28 = vpop.f32.mrf.mxu1  ;;  %v9611_v3 = vld [vmem:[#allocation10_spill] sm:$0xff]  ;;  %v9612_v63 = vld [vmem:[#allocation11_spill] sm:$0xff] }
 0x177   : > { %v4809_v26 = vrot.slane %v4807_v31, 4  ;;  %v4813_v37 = vshll.u32 %v6626_v17, 16  ;;  %v6730_v25 = vrot.slane %v6712_v48, 9  ;;  %v5406_v29 = vrot.slane %v6713_v15, 5  ;;  %v3184_v16 = vpop.f32.mrf.mxu0  ;;  %v9613_v15 = vld [vmem:[#allocation12_spill] sm:$0xff] }
 0x178   : > { %7578 = vmatprep.mubr.bf16.mxu0 %v6761_v50  ;;  %v4800_v53 = vor.u32 %v4799_v39, %v4796_v22  ;;  %v5409_v9 = vrot.slane %v6714_v43, 5  ;;  %v4792_v47 = vsel %vm7868_vm5, %v4787_v59, %v4791_v14  ;;  %v1438_v30 = vadd.f32 %v9038_v55, %v9611_v3  ;;  %v7325_v1 = vpop.f32.mrf.mxu1 }
 0x179   : > { %v4810_v13 = vor.u32 %v4809_v26, %v4805_v45  ;;  %v4815_v23 = vrot.slane %v4813_v37, 5  ;;  %v6657_v31 = vcombine.low %v4782_v54, %v4792_v47  ;;  %v5407_v21 = vsel %vm7849_vm4, %v6730_v25, %v5406_v29  ;;  %v9614_v54 = vld [vmem:[#allocation13_spill] sm:$0xff]  ;;  %v9617_v26 = vld [vmem:[#allocation16_spill] sm:$0xff] }
 0x17a   : > { %v4801_v17 = vrot.slane %v4800_v53, 4  ;;  %v5408_v51 = vrot.slane %v5406_v29, 4  ;;  %v9211_v48 = vadd.f32 %v9040_v36, %v1438_v30  ;;  %v1441_v14 = vadd.f32 %v9050_v58, %v9612_v63  ;;  %v2382_v43 = vpop.f32.mrf.mxu1  ;;  %v9615_v29 = vld [vmem:[#allocation14_spill] sm:$0xff]  ;;  %v9618_v53 = vld [vmem:[#allocation17_spill] sm:$0xff]  ;;  %v9622_v30 = vld [vmem:[#allocation19_spill] sm:$0xff] }
 0x17b   : > { %v4811_v39 = vrot.slane %v4810_v13, 4  ;;  %v1439_v37 = vadd.f32 %v9056_v8, %v9613_v15  ;;  %7530 = vmatprep.mubr.bf16.mxu1 %v6657_v31  ;;  %v2460_v13 = vadd.f32 %v9065_v6, %v9614_v54  ;;  %v2458_v36 = vadd.f32 %v9078_v38, %v9615_v29  ;;  %v9616_v38 = vld [vmem:[#allocation15_spill] sm:$0xff] }
 0x17c   : > { %v4806_v55 = vsel %vm7868_vm5, %v4801_v17, %v4805_v45  ;;  %v5410_v47 = vsel %vm7849_vm4, %v5408_v51, %v5409_v9  ;;  %v9228_v8 = vadd.f32 %v9052_v12, %v1441_v14  ;;  %v7372_v45 = vpop.f32.mrf.mxu0  ;;  %v7328_v59 = vpop.f32.mrf.mxu1  ;;  %v2461_v56 = vadd.f32 %v9097_v0, %v9616_v38  ;;  %v9624_v17 = vld [vmem:[#allocation20_spill] sm:$0xff]  ;;  %v9625_v51 = vld [vmem:[#allocation21_spill] sm:$0xff]  ;;  %v9627_v15 = vld [vmem:[#allocation23_spill] sm:$0xff] }
 0x17d   : > { %v4816_v58 = vsel %vm7868_vm5, %v4811_v39, %v4815_v23  ;;  %v6762_v50 = vcombine.low %v5407_v21, %v5410_v47  ;;  %v9231_v22 = vadd.f32 %v9058_v41, %v1439_v37  ;;  %v9234_v9 = vadd.f32 %v9086_v57, %v2460_v13 }
 0x17e   : > { %v6658_v46 = vcombine.low %v4806_v55, %v4816_v58  ;;  %v9237_v6 = vadd.f32 %v9099_v61, %v2458_v36  ;;  %v2459_v12 = vadd.f32 %v9102_v10, %v9617_v26  ;;  %v2464_v41 = vadd.f32 %v9112_v42, %v9618_v53  ;;  %v3197_v23 = vpop.f32.mrf.mxu0  ;;  %v2395_v3 = vpop.f32.mrf.mxu1  ;;  %v9629_v36 = vld [vmem:[#allocation25_spill] sm:$0xff]  ;;  %v9630_v58 = vld [vmem:[#allocation26_spill] sm:$0xff] }
 0x17f   : > { %7579 = vmatmul.mubr.bf16.gmra.mxu0 %v6762_v50  ;;  %v2462_v25 = vadd.f32 %v9124_v33, %v8801_v49  ;;  %v2465_v57 = vadd.f32 %v9128_v44, %v8811_v7  ;;  %v9250_v61 = vadd.f32 %v9107_v5, %v2461_v56  ;;  %v2463_v0 = vadd.f32 %v9137_v35, %v8814_v52 }
 0x180   : > { %7531 = vmatmul.mubr.bf16.gmra.mxu1 %v6658_v46  ;;  %v2468_v10 = vadd.f32 %v9152_v32, %v8844_v34  ;;  %v2466_v42 = vadd.f32 %v9171_v2, %v8882_v40  ;;  %v9259_v49 = vadd.f32 %v9118_v27, %v2459_v12  ;;  %v9262_v7 = vadd.f32 %v9130_v19, %v2464_v41  ;;  %v7373_v5 = vpop.f32.mrf.mxu0  ;;  %v7329_v52 = vpop.f32.mrf.mxu1  ;;  %v9619_v19 = vld [vmem:[#allocation29_spill] sm:$0xff]  ;;  %v9620_v32 = vld [vmem:[#allocation18_spill] sm:$0xff]  ;;  %v9633_v41 = vld [vmem:[#allocation3_spill] sm:$0xff] }
 0x181   : > { %v9265_v44 = vadd.f32 %v9141_v18, %v2462_v25  ;;  %v9268_v33 = vadd.f32 %v9160_v62, %v2465_v57  ;;  %v9271_v35 = vadd.f32 %v9173_v60, %v2463_v0  ;;  %v2469_v27 = vadd.f32 %v9619_v19, %v8887_v11  ;;  %v9621_v18 = vld [vmem:[#allocation9_spill] sm:$0xff]  ;;  %v9623_v62 = vld [vmem:[#allocation31_spill] sm:$0xff]  ;;  %v9628_v11 = vld [vmem:[#allocation24_spill] sm:$0xff] }
 0x182   : > { %v9274_v34 = vadd.f32 %v9184_v4, %v2468_v10  ;;  %v9277_v40 = vadd.f32 %v9196_v20, %v2466_v42  ;;  %v2467_v2 = vadd.f32 %v9621_v18, %v9620_v32  ;;  %v2472_v31 = vadd.f32 %v9623_v62, %v9622_v30  ;;  %v3200_v39 = vpop.f32.mrf.mxu0  ;;  %v2398_v63 = vpop.f32.mrf.mxu1  ;;  %v9626_v20 = vld [vmem:[#allocation22_spill] sm:$0xff]  ;;  %v9634_v0 = vld [vmem:[#allocation4_spill] sm:$0xff]  ;;  %v9635_v19 = vld [vmem:[#allocation5_spill] sm:$0xff] }
 0x183   : > { %v2470_v21 = vadd.f32 %v2379_v28, %v9624_v17  ;;  %v2473_v60 = vadd.f32 %v7325_v1, %v9625_v51  ;;  %v9288_v4 = vadd.f32 %v9202_v24, %v2469_v27  ;;  %v2471_v14 = vadd.f32 %v2382_v43, %v9626_v20  ;;  %v9631_v43 = vld [vmem:[#allocation27_spill] sm:$0xff]  ;;  %v9638_v20 = vld [vmem:[#allocation8_spill] sm:$0xff] }
 0x184   : > { %v2476_v37 = vadd.f32 %v7328_v59, %v9627_v15  ;;  %v2474_v55 = vadd.f32 %v2395_v3, %v9628_v11  ;;  %v9293_v47 = vadd.f32 %v3184_v16, %v2467_v2  ;;  %v9295_v54 = vadd.f32 %v7372_v45, %v2472_v31  ;;  %v7332_v1 = vpop.f32.mrf.mxu1  ;;  %v7376_v59 = vpop.f32.mrf.mxu0  ;;  %v9632_v16 = vld [vmem:[#allocation28_spill] sm:$0xff]  ;;  %v9636_v2 = vld [vmem:[#allocation6_spill] sm:$0xff] }
 0x185   : > { %v9297_v13 = vadd.f32 %v3197_v23, %v2470_v21  ;;  %v9299_v28 = vadd.f32 %v7373_v5, %v2473_v60  ;;  %v9301_v29 = vadd.f32 %v3200_v39, %v2471_v14  ;;  %v2477_v24 = vadd.f32 %v7329_v52, %v9629_v36  ;;  %v9637_v21 = vld [vmem:[#allocation7_spill] sm:$0xff] }
 0x186   : > { %v2475_v50 = vadd.f32 %v2398_v63, %v9630_v58  ;;  %v2480_v46 = vadd.f32 %v7332_v1, %v9631_v43  ;;  %v2411_v38 = vpop.f32.mrf.mxu1  ;;  %v9306_v56 = vadd.f32 %v7376_v59, %v2476_v37  ;;  %v3213_v26 = vpop.f32.mrf.mxu0 }
 0x187   : > { %v2478_v45 = vadd.f32 %v2411_v38, %v9632_v16  ;;  %v9309_v53 = vadd.f32 %v3213_v26, %v2474_v55  ;;  %v9639_v55 = vld [vmem:[#allocation30_spill] sm:$0xff] }
 0x188   : > { %v7333_v12 = vpop.f32.mrf.mxu1  ;;  %v7377_v57 = vpop.f32.mrf.mxu0 }
 0x189   : > { %v2481_v25 = vadd.f32 %v7333_v12, %v9633_v41  ;;  %v9312_v3 = vadd.f32 %v7377_v57, %v2477_v24 }
 0x18a   : > { %v2414_v23 = vpop.f32.mrf.mxu1  ;;  %v3216_v42 = vpop.f32.mrf.mxu0 }
 0x18b   : > { %v2479_v10 = vadd.f32 %v2414_v23, %v9634_v0  ;;  %v9315_v52 = vadd.f32 %v3216_v42, %v2475_v50 }
 0x18c   : > { %v7336_v5 = vpop.f32.mrf.mxu1  ;;  %v7380_v18 = vpop.f32.mrf.mxu0 }
 0x18d   : > { %v2484_v27 = vadd.f32 %v7336_v5, %v9635_v19  ;;  %v9319_v62 = vadd.f32 %v7380_v18, %v2480_v46 }
 0x18e   : > { %v2427_v32 = vpop.f32.mrf.mxu1  ;;  %v3229_v17 = vpop.f32.mrf.mxu0 }
 0x18f   : > { %v2482_v30 = vadd.f32 %v2427_v32, %v9636_v2  ;;  %v9322_v60 = vadd.f32 %v3229_v17, %v2478_v45 }
 0x190   : > { %v7337_v31 = vpop.f32.mrf.mxu1  ;;  %v7381_v63 = vpop.f32.mrf.mxu0 }
 0x191   : > { %v2485_v51 = vadd.f32 %v7337_v31, %v9637_v21  ;;  %v9325_v15 = vadd.f32 %v7381_v63, %v2481_v25 }
 0x192   : > { %v2430_v39 = vpop.f32.mrf.mxu1  ;;  %v3232_v11 = vpop.f32.mrf.mxu0 }
 0x193   : > { %v2483_v14 = vadd.f32 %v2430_v39, %v9638_v20  ;;  %v9328_v36 = vadd.f32 %v3232_v11, %v2479_v10 }
 0x194   : > { %v7340_v37 = vpop.f32.mrf.mxu1  ;;  %v7384_v58 = vpop.f32.mrf.mxu0 }
 0x195   : > { %v2488_v1 = vadd.f32 %v7340_v37, %v9639_v55  ;;  %v9331_v43 = vadd.f32 %v7384_v58, %v2484_v27 }
 0x196   : > { %v2443_v24 = vpop.f32.mrf.mxu1  ;;  %v3245_v59 = vpop.f32.mrf.mxu0 }
 0x197   : > { %v2486_v50 = vadd.f32 %v2443_v24, %v9211_v48  ;;  %v9334_v16 = vadd.f32 %v3245_v59, %v2482_v30 }
 0x198   : > { %v7341_v46 = vpop.f32.mrf.mxu1  ;;  %v7385_v26 = vpop.f32.mrf.mxu0 }
 0x199   : > { %v2489_v38 = vadd.f32 %v7341_v46, %v9228_v8  ;;  %v9337_v41 = vadd.f32 %v7385_v26, %v2485_v51 }
 0x19a   : > { %v2446_v45 = vpop.f32.mrf.mxu1  ;;  %v3248_v25 = vpop.f32.mrf.mxu0 }
 0x19b   : > { %v2487_v12 = vadd.f32 %v2446_v45, %v9231_v22  ;;  %v9339_v57 = vadd.f32 %v3248_v25, %v2483_v14 }
 0x19c   : > { %v7388_v23 = vpop.f32.mrf.mxu0  ;;  %v7408_v42 = vpop.f32.mrf.mxu1 }
 0x19d   : > { %v9341_v0 = vadd.f32 %v7388_v23, %v2488_v1  ;;  %v3872_v8 = vadd.f32 %v7408_v42, %v9234_v9 }
 0x19e   : > { %v3261_v48 = vpop.f32.mrf.mxu0  ;;  %v3743_v27 = vpop.f32.mrf.mxu1 }
 0x19f   : > { %v9343_v10 = vadd.f32 %v3261_v48, %v2486_v50  ;;  %v3870_v22 = vadd.f32 %v3743_v27, %v9237_v6 }
 0x1a0   : > { %v7389_v5 = vpop.f32.mrf.mxu0  ;;  %v9351_v2 = vpop.f32.mrf.mxu1 }
 0x1a1   : > { %v9346_v19 = vadd.f32 %v7389_v5, %v2489_v38 }
 0x1a2   : > { %v3264_v32 = vpop.f32.mrf.mxu0  ;;  %v9355_v17 = vpop.f32.mrf.mxu1 }
 0x1a3   : > { %v9349_v18 = vadd.f32 %v3264_v32, %v2487_v12 }
 0x1a4   : > { %v7456_v30 = vpop.f32.mrf.mxu0  ;;  %v7412_v39 = vpop.f32.mrf.mxu1 }
 0x1a5   : > { %v9353_v31 = vadd.f32 %v7456_v30, %v3872_v8  ;;  %v3876_v63 = vadd.f32 %v7412_v39, %v9262_v7 }
 0x1a6   : > { %v4194_v21 = vpop.f32.mrf.mxu0  ;;  %v3759_v20 = vpop.f32.mrf.mxu1 }
 0x1a7   : > { %v9357_v51 = vadd.f32 %v4194_v21, %v3870_v22  ;;  %v3874_v6 = vadd.f32 %v3759_v20, %v9265_v44 }
 0x1a8   : > { %v9359_v9 = vpop.f32.mrf.mxu0  ;;  %v9365_v37 = vpop.f32.mrf.mxu1 }
 0x1aa   : > { %v9362_v14 = vpop.f32.mrf.mxu0  ;;  %v9369_v1 = vpop.f32.mrf.mxu1 }
 0x1ac   : > { %v7460_v11 = vpop.f32.mrf.mxu0  ;;  %v7416_v50 = vpop.f32.mrf.mxu1 }
 0x1ad   : > { %v9367_v55 = vadd.f32 %v7460_v11, %v3876_v63  ;;  %v3880_v7 = vadd.f32 %v7416_v50, %v9274_v34 }
 0x1ae   : > { %v4210_v24 = vpop.f32.mrf.mxu0  ;;  %v3775_v59 = vpop.f32.mrf.mxu1 }
 0x1af   : > { %v9371_v58 = vadd.f32 %v4210_v24, %v3874_v6  ;;  %v3878_v44 = vadd.f32 %v3775_v59, %v9277_v40 }
 0x1b0   : > { %v9373_v46 = vpop.f32.mrf.mxu0  ;;  %v9379_v45 = vpop.f32.mrf.mxu1 }
 0x1b2   : > { %v9376_v38 = vpop.f32.mrf.mxu0  ;;  %v9383_v25 = vpop.f32.mrf.mxu1 }
 0x1b4   : > { %v7464_v26 = vpop.f32.mrf.mxu0  ;;  %v7420_v42 = vpop.f32.mrf.mxu1 }
 0x1b5   : > { %v9381_v12 = vadd.f32 %v7464_v26, %v3880_v7  ;;  %v3884_v34 = vadd.f32 %v7420_v42, %v9295_v54 }
 0x1b6   : > { %v4226_v23 = vpop.f32.mrf.mxu0  ;;  %v3791_v8 = vpop.f32.mrf.mxu1 }
 0x1b7   : > { %v9385_v48 = vadd.f32 %v4226_v23, %v3878_v44  ;;  %v3882_v40 = vadd.f32 %v3791_v8, %v9297_v13 }
 0x1b8   : > { %v9387_v5 = vpop.f32.mrf.mxu0  ;;  %v7421_v32 = vpop.f32.mrf.mxu1 }
 0x1b9   : > { %v3885_v30 = vadd.f32 %v7421_v32, %v9299_v28 }
 0x1ba   : > { %v9390_v27 = vpop.f32.mrf.mxu0  ;;  %v3794_v39 = vpop.f32.mrf.mxu1 }
 0x1bb   : > { %v3883_v20 = vadd.f32 %v3794_v39, %v9301_v29 }
 0x1bc   : > { %v7468_v22 = vpop.f32.mrf.mxu0  ;;  %v7424_v11 = vpop.f32.mrf.mxu1 }
 0x1bd   : > { %v9394_v21 = vadd.f32 %v7468_v22, %v3884_v34  ;;  %v3888_v54 = vadd.f32 %v7424_v11, %v9306_v56 }
 0x1be   : > { %v4242_v63 = vpop.f32.mrf.mxu0  ;;  %v3807_v7 = vpop.f32.mrf.mxu1 }
 0x1bf   : > { %v9397_v6 = vadd.f32 %v4242_v63, %v3882_v40  ;;  %v3886_v59 = vadd.f32 %v3807_v7, %v9309_v53 }
 0x1c0   : > { %v7469_v24 = vpop.f32.mrf.mxu0  ;;  %v7425_v28 = vpop.f32.mrf.mxu1 }
 0x1c1   : > { %v9400_v50 = vadd.f32 %v7469_v24, %v3885_v30  ;;  %v3889_v23 = vadd.f32 %v7425_v28, %v9312_v3 }
 0x1c2   : > { %v4245_v13 = vpop.f32.mrf.mxu0  ;;  %v3810_v29 = vpop.f32.mrf.mxu1 }
 0x1c3   : > { %v9403_v44 = vadd.f32 %v4245_v13, %v3883_v20  ;;  %v3887_v8 = vadd.f32 %v3810_v29, %v9315_v52 }
 0x1c4   : > { %v7472_v26 = vpop.f32.mrf.mxu0  ;;  %v7428_v56 = vpop.f32.mrf.mxu1 }
 0x1c5   : > { %v9406_v42 = vadd.f32 %v7472_v26, %v3888_v54  ;;  %v3892_v22 = vadd.f32 %v7428_v56, %v9319_v62 }
 0x1c6   : > { %v4258_v34 = vpop.f32.mrf.mxu0  ;;  %v3823_v53 = vpop.f32.mrf.mxu1 }
 0x1c7   : > { %v9409_v40 = vadd.f32 %v4258_v34, %v3886_v59  ;;  %v3890_v63 = vadd.f32 %v3823_v53, %v9322_v60 }
 0x1c8   : > { %v7473_v32 = vpop.f32.mrf.mxu0  ;;  %v7429_v3 = vpop.f32.mrf.mxu1 }
 0x1c9   : > { %v9412_v30 = vadd.f32 %v7473_v32, %v3889_v23  ;;  %v3893_v24 = vadd.f32 %v7429_v3, %v9325_v15 }
 0x1ca   : > { %v4261_v39 = vpop.f32.mrf.mxu0  ;;  %v3826_v52 = vpop.f32.mrf.mxu1 }
 0x1cb   : > { %v9415_v20 = vadd.f32 %v4261_v39, %v3887_v8  ;;  %v3891_v13 = vadd.f32 %v3826_v52, %v9328_v36 }
 0x1cc   : > { %v7476_v11 = vpop.f32.mrf.mxu0 }
 0x1cd   : > { %v9418_v54 = vadd.f32 %v7476_v11, %v3892_v22 }
 0x1ce   : > { %v4274_v7 = vpop.f32.mrf.mxu0 }
 0x1cf   : > { %v9421_v59 = vadd.f32 %v4274_v7, %v3890_v63  ;;  %v7432_v62 = vpop.f32.mrf.mxu1 }
 0x1d0   : > { %v7477_v28 = vpop.f32.mrf.mxu0  ;;  %v3896_v26 = vadd.f32 %v7432_v62, %v9331_v43 }
 0x1d1   : > { %v9424_v23 = vadd.f32 %v7477_v28, %v3893_v24  ;;  %v3839_v60 = vpop.f32.mrf.mxu1 }
 0x1d2   : > { %v4277_v29 = vpop.f32.mrf.mxu0  ;;  %v3894_v34 = vadd.f32 %v3839_v60, %v9334_v16 }
 0x1d3   : > { %v9427_v8 = vadd.f32 %v4277_v29, %v3891_v13  ;;  %v7433_v15 = vpop.f32.mrf.mxu1 }
 0x1d4   : > { %v3897_v32 = vadd.f32 %v7433_v15, %v9337_v41 }
 0x1d5   : > { %v7480_v56 = vpop.f32.mrf.mxu0  ;;  %v3842_v36 = vpop.f32.mrf.mxu1 }
 0x1d6   : > { %v9430_v22 = vadd.f32 %v7480_v56, %v3896_v26  ;;  %v3895_v39 = vadd.f32 %v3842_v36, %v9339_v57 }
 0x1d7   : > { %v4290_v53 = vpop.f32.mrf.mxu0 }
 0x1d8   : > { %v9433_v63 = vadd.f32 %v4290_v53, %v3894_v34 }
 0x1d9   : > { %v7481_v3 = vpop.f32.mrf.mxu0 }
 0x1da   : > { %v9436_v24 = vadd.f32 %v7481_v3, %v3897_v32 }
 0x1db   : > { %v4293_v52 = vpop.f32.mrf.mxu0 }
 0x1dc   : > { %v9439_v13 = vadd.f32 %v4293_v52, %v3895_v39 }
 0x1dd   : > { %v7436_v43 = vpop.f32.mrf.mxu1  ;;  %v7484_v62 = vpop.f32.mrf.mxu0 }
 0x1de   : > { %v3900_v11 = vadd.f32 %v7436_v43, %v9341_v0  ;;  %v3873_v0 = vadd.f32 %v9351_v2, %v9250_v61 }
 0x1df   : > { %v3855_v16 = vpop.f32.mrf.mxu1  ;;  %v4306_v60 = vpop.f32.mrf.mxu0 }
 0x1e0   : > { %v3898_v7 = vadd.f32 %v3855_v16, %v9343_v10  ;;  %v9442_v26 = vadd.f32 %v7484_v62, %v3900_v11  ;;  %v3871_v10 = vadd.f32 %v9355_v17, %v9259_v49  ;;  %v4324_v39 = vadd.f32 %v9359_v9, %v3873_v0  ;;  %v9462_v49 = vld [vmem:[%s9559_s2] ss:$0 sm:$0xff] }
 0x1e1   : > { %v7437_v41 = vpop.f32.mrf.mxu1  ;;  %v7485_v56 = vpop.f32.mrf.mxu0  ;;  %v3877_v9 = vadd.f32 %v9365_v37, %v9268_v33 }
 0x1e2   : > { %v3901_v28 = vadd.f32 %v7437_v41, %v9346_v19  ;;  %v9447_v34 = vadd.f32 %v4306_v60, %v3898_v7  ;;  %v4322_v3 = vadd.f32 %v9362_v14, %v3871_v10  ;;  %v3875_v41 = vadd.f32 %v9369_v1, %v9271_v35 }
 0x1e3   : > { %v3858_v57 = vpop.f32.mrf.mxu1  ;;  %v4309_v53 = vpop.f32.mrf.mxu0 }
 0x1e4   : > { %v3899_v29 = vadd.f32 %v3858_v57, %v9349_v18  ;;  %v9451_v32 = vadd.f32 %v7485_v56, %v3901_v28  ;;  %v4326_v35 = vadd.f32 %v9376_v38, %v3875_v41  ;;  %v3881_v41 = vadd.f32 %v9379_v45, %v9288_v4 }
 0x1e5   : > { %v7504_v15 = vpop.f32.mrf.mxu1 }
 0x1e6   : > { %v5141_v19 = vadd.f32 %v7504_v15, %v9353_v31  ;;  %v9455_v43 = vadd.f32 %v4309_v53, %v3899_v29  ;;  %v4328_v15 = vadd.f32 %v9373_v46, %v3877_v9  ;;  %v4332_v4 = vadd.f32 %v9387_v5, %v3881_v41 }
 0x1e7   : > { %v5012_v36 = vpop.f32.mrf.mxu1 }
 0x1e8   : > { %v5139_v18 = vadd.f32 %v5012_v36, %v9357_v51 }
 0x1e9   : > { %v7505_v61 = vpop.f32.mrf.mxu1 }
 0x1ea   : > { %v5142_v17 = vadd.f32 %v7505_v61, %v4324_v39 }
 0x1eb   : > { %v7552_v2 = vpop.f32.mrf.mxu0  ;;  %v5015_v31 = vpop.f32.mrf.mxu1 }
 0x1ec   : > { %v5735_v11 = vadd.f32 %v7552_v2, %v5141_v19  ;;  %v5140_v7 = vadd.f32 %v5015_v31, %v4322_v3 }
 0x1ed   : > { %v5606_v16 = vpop.f32.mrf.mxu0  ;;  %v7508_v51 = vpop.f32.mrf.mxu1 }
 0x1ee   : > { %v5733_v52 = vadd.f32 %v5606_v16, %v5139_v18  ;;  %v5838_v14 = vadd.f32 %v9462_v49, %v5735_v11  ;;  %v5145_v57 = vadd.f32 %v7508_v51, %v9367_v55 }
 0x1ef   : > { %v7553_v62 = vpop.f32.mrf.mxu0  ;;  %v5028_v60 = vpop.f32.mrf.mxu1 }
 0x1f0   : > { %v5736_v28 = vadd.f32 %v7553_v62, %v5142_v17  ;;  %v5836_v29 = vadd.f32 %v9462_v49, %v5733_v52  ;;  %v5143_v56 = vadd.f32 %v5028_v60, %v9371_v58  ;;  %v5870_v1 = vmax.f32 %v5838_v14, 0.0 }
 0x1f1   : > { %v5609_v0 = vpop.f32.mrf.mxu0  ;;  %v7509_v10 = vpop.f32.mrf.mxu1 }
 0x1f2   : > { %v5839_v33 = vadd.f32 %v9462_v49, %v5736_v28  ;;  %v5734_v37 = vadd.f32 %v5609_v0, %v5140_v7  ;;  %v5146_v39 = vadd.f32 %v7509_v10, %v4328_v15  ;;  %v5868_v61 = vmax.f32 %v5836_v29, 0.0 }
 0x1f3   : > { %v7556_v19 = vpop.f32.mrf.mxu0  ;;  %v5031_v18 = vpop.f32.mrf.mxu1  ;;  %v3879_v29 = vadd.f32 %v9383_v25, %v9293_v47 }
 0x1f4   : > { %v5871_v36 = vmax.f32 %v5839_v33, 0.0  ;;  %v5837_v55 = vadd.f32 %v9462_v49, %v5734_v37  ;;  %v5739_v53 = vadd.f32 %v7556_v19, %v5145_v57  ;;  %v5144_v3 = vadd.f32 %v5031_v18, %v4326_v35 }
 0x1f5   : > { %v5622_v58 = vpop.f32.mrf.mxu0 }
 0x1f6   : > { %v6847_v46 = vpack.c.bf16 %v5871_v36, %v5870_v1  ;;  %v5869_v2 = vmax.f32 %v5837_v55, 0.0  ;;  %v5737_v38 = vadd.f32 %v5622_v58, %v5143_v56  ;;  %v5842_v31 = vadd.f32 %v9462_v49, %v5739_v53 }
 0x1f7   : > { %v7557_v11 = vpop.f32.mrf.mxu0  ;;  %v4330_v55 = vadd.f32 %v9390_v27, %v3879_v29 }
 0x1f8   : > { %6919 = vst [vmem:[%s9480_s13 + $0x8] sm:$0xff] %v6847_v46   ;;  %v6842_v17 = vpack.c.bf16 %v5869_v2, %v5868_v61  ;;  %v5740_v16 = vadd.f32 %v7557_v11, %v5146_v39  ;;  %v5840_v52 = vadd.f32 %v9462_v49, %v5737_v38  ;;  %v5874_v62 = vmax.f32 %v5842_v31, 0.0 }
 0x1f9   : > { %v5625_v9 = vpop.f32.mrf.mxu0 }
 0x1fa   : > { %6843 = vst [vmem:[%s9480_s13] sm:$0xff] %v6842_v17   ;;  %v5843_v7 = vadd.f32 %v9462_v49, %v5740_v16  ;;  %v5738_v51 = vadd.f32 %v5625_v9, %v5144_v3  ;;  %v7512_v60 = vpop.f32.mrf.mxu1  ;;  %v5872_v33 = vmax.f32 %v5840_v52, 0.0 }
 0x1fb   : > { %v7560_v14 = vpop.f32.mrf.mxu0  ;;  %v5149_v0 = vadd.f32 %v7512_v60, %v9381_v12 }
 0x1fc   : > { %v5875_v28 = vmax.f32 %v5843_v7, 0.0  ;;  %v5841_v57 = vadd.f32 %v9462_v49, %v5738_v51  ;;  %v5044_v10 = vpop.f32.mrf.mxu1 }
 0x1fd   : > { %v5638_v15 = vpop.f32.mrf.mxu0  ;;  %v5743_v45 = vadd.f32 %v7560_v14, %v5149_v0  ;;  %v5147_v35 = vadd.f32 %v5044_v10, %v9385_v48 }
 0x1fe   : > { %v6857_v37 = vpack.c.bf16 %v5875_v28, %v5874_v62  ;;  %v5873_v56 = vmax.f32 %v5841_v57, 0.0  ;;  %v7513_v19 = vpop.f32.mrf.mxu1 }
 0x1ff   : > { %v7561_v36 = vpop.f32.mrf.mxu0  ;;  %v5741_v47 = vadd.f32 %v5638_v15, %v5147_v35  ;;  %v5150_v25 = vadd.f32 %v7513_v19, %v4332_v4  ;;  %v5846_v53 = vadd.f32 %v9462_v49, %v5743_v45 }
 0x200   : > { %6921 = vst [vmem:[%s9480_s13 + $0x18] sm:$0xff] %v6857_v37   ;;  %v6852_v1 = vpack.c.bf16 %v5873_v56, %v5872_v33  ;;  %v5047_v12 = vpop.f32.mrf.mxu1 }
 0x201   : > { %v5744_v39 = vadd.f32 %v7561_v36, %v5150_v25  ;;  %v5148_v18 = vadd.f32 %v5047_v12, %v4330_v55  ;;  %v5641_v61 = vpop.f32.mrf.mxu0  ;;  %v5844_v5 = vadd.f32 %v9462_v49, %v5741_v47  ;;  %v5878_v46 = vmax.f32 %v5846_v53, 0.0 }
 0x202   : > { %6920 = vst [vmem:[%s9480_s13 + $0x10] sm:$0xff] %v6852_v1  }
 0x203   : > { %v5847_v48 = vadd.f32 %v9462_v49, %v5744_v39  ;;  %v5742_v58 = vadd.f32 %v5641_v61, %v5148_v18  ;;  %v5876_v3 = vmax.f32 %v5844_v5, 0.0 }
 0x205   : > { %v5879_v2 = vmax.f32 %v5847_v48, 0.0  ;;  %v5845_v27 = vadd.f32 %v9462_v49, %v5742_v58 }
 0x207   : > { %v7564_v38 = vpop.f32.mrf.mxu0  ;;  %v6867_v11 = vpack.c.bf16 %v5879_v2, %v5878_v46  ;;  %v5877_v17 = vmax.f32 %v5845_v27, 0.0 }
 0x208   : > { %v7516_v31 = vpop.f32.mrf.mxu1 }
 0x209   : > { %v5153_v16 = vadd.f32 %v7516_v31, %v9394_v21  ;;  %v5654_v9 = vpop.f32.mrf.mxu0  ;;  %6923 = vst [vmem:[%s9480_s13 + $0x28] sm:$0xff] %v6867_v11   ;;  %v6862_v52 = vpack.c.bf16 %v5877_v17, %v5876_v3 }
 0x20a   : > { %v5060_v7 = vpop.f32.mrf.mxu1 }
 0x20b   : > { %v5747_v51 = vadd.f32 %v7564_v38, %v5153_v16  ;;  %v5151_v41 = vadd.f32 %v5060_v7, %v9397_v6  ;;  %6922 = vst [vmem:[%s9480_s13 + $0x20] sm:$0xff] %v6862_v52   ;;  %v7565_v62 = vpop.f32.mrf.mxu0 }
 0x20c   : > { %v7517_v14 = vpop.f32.mrf.mxu1 }
 0x20d   : > { %v5745_v28 = vadd.f32 %v5654_v9, %v5151_v41  ;;  %v5154_v57 = vadd.f32 %v7517_v14, %v9400_v50  ;;  %v5850_v29 = vadd.f32 %v9462_v49, %v5747_v51  ;;  %v5657_v15 = vpop.f32.mrf.mxu0 }
 0x20e   : > { %v5063_v60 = vpop.f32.mrf.mxu1 }
 0x20f   : > { %v5748_v0 = vadd.f32 %v7565_v62, %v5154_v57  ;;  %v5152_v21 = vadd.f32 %v5063_v60, %v9403_v44  ;;  %v5848_v33 = vadd.f32 %v9462_v49, %v5745_v28  ;;  %v5882_v56 = vmax.f32 %v5850_v29, 0.0 }
 0x211   : > { %v5851_v37 = vadd.f32 %v9462_v49, %v5748_v0  ;;  %v5746_v6 = vadd.f32 %v5657_v15, %v5152_v21  ;;  %v5880_v45 = vmax.f32 %v5848_v33, 0.0 }
 0x213   : > { %v5883_v10 = vmax.f32 %v5851_v37, 0.0  ;;  %v5849_v4 = vadd.f32 %v9462_v49, %v5746_v6 }
 0x215   : > { %v6877_v50 = vpack.c.bf16 %v5883_v10, %v5882_v56  ;;  %v5881_v35 = vmax.f32 %v5849_v4, 0.0  ;;  %v7568_v1 = vpop.f32.mrf.mxu0 }
 0x216   : > { %v7520_v19 = vpop.f32.mrf.mxu1 }
 0x217   : > { %6925 = vst [vmem:[%s9480_s13 + $0x38] sm:$0xff] %v6877_v50   ;;  %v6872_v36 = vpack.c.bf16 %v5881_v35, %v5880_v45  ;;  %v5157_v44 = vadd.f32 %v7520_v19, %v9406_v42  ;;  %v5670_v55 = vpop.f32.mrf.mxu0 }
 0x218   : > { %v5076_v47 = vpop.f32.mrf.mxu1 }
 0x219   : > { %6924 = vst [vmem:[%s9480_s13 + $0x30] sm:$0xff] %v6872_v36   ;;  %v5751_v25 = vadd.f32 %v7568_v1, %v5157_v44  ;;  %v5155_v12 = vadd.f32 %v5076_v47, %v9409_v40  ;;  %v7569_v39 = vpop.f32.mrf.mxu0 }
 0x21a   : > { %v7521_v53 = vpop.f32.mrf.mxu1 }
 0x21b   : > { %v5749_v18 = vadd.f32 %v5670_v55, %v5155_v12  ;;  %v5158_v61 = vadd.f32 %v7521_v53, %v9412_v30  ;;  %v5854_v48 = vadd.f32 %v9462_v49, %v5751_v25  ;;  %v5673_v2 = vpop.f32.mrf.mxu0 }
 0x21c   : > { %v5079_v5 = vpop.f32.mrf.mxu1 }
 0x21d   : > { %v5752_v58 = vadd.f32 %v7569_v39, %v5158_v61  ;;  %v5156_v46 = vadd.f32 %v5079_v5, %v9415_v20  ;;  %v5852_v42 = vadd.f32 %v9462_v49, %v5749_v18  ;;  %v5886_v40 = vmax.f32 %v5854_v48, 0.0 }
 0x21f   : > { %v5855_v27 = vadd.f32 %v9462_v49, %v5752_v58  ;;  %v5750_v38 = vadd.f32 %v5673_v2, %v5156_v46  ;;  %v5884_v17 = vmax.f32 %v5852_v42, 0.0 }
 0x221   : > { %v5887_v3 = vmax.f32 %v5855_v27, 0.0  ;;  %v5853_v11 = vadd.f32 %v9462_v49, %v5750_v38 }
 0x223   : > { %v6887_v30 = vpack.c.bf16 %v5887_v3, %v5886_v40  ;;  %v5885_v31 = vmax.f32 %v5853_v11, 0.0  ;;  %v7572_v16 = vpop.f32.mrf.mxu0 }
 0x224   : > { %v7524_v9 = vpop.f32.mrf.mxu1 }
 0x225   : > { %6927 = vst [vmem:[%s9480_s13 + $0x48] sm:$0xff] %v6887_v30   ;;  %v6882_v52 = vpack.c.bf16 %v5885_v31, %v5884_v17  ;;  %v5161_v20 = vadd.f32 %v7524_v9, %v9418_v54  ;;  %v5686_v7 = vpop.f32.mrf.mxu0 }
 0x226   : > { %v5092_v51 = vpop.f32.mrf.mxu1 }
 0x227   : > { %6926 = vst [vmem:[%s9480_s13 + $0x40] sm:$0xff] %v6882_v52   ;;  %v5755_v41 = vadd.f32 %v7572_v16, %v5161_v20  ;;  %v5159_v14 = vadd.f32 %v5092_v51, %v9421_v59  ;;  %v7573_v28 = vpop.f32.mrf.mxu0 }
 0x228   : > { %v7525_v62 = vpop.f32.mrf.mxu1 }
 0x229   : > { %v5753_v57 = vadd.f32 %v5686_v7, %v5159_v14  ;;  %v5162_v60 = vadd.f32 %v7525_v62, %v9424_v23  ;;  %v5858_v0 = vadd.f32 %v9462_v49, %v5755_v41  ;;  %v5689_v33 = vpop.f32.mrf.mxu0 }
 0x22a   : > { %v5095_v29 = vpop.f32.mrf.mxu1 }
 0x22b   : > { %v5756_v21 = vadd.f32 %v7573_v28, %v5162_v60  ;;  %v5160_v15 = vadd.f32 %v5095_v29, %v9427_v8  ;;  %v5856_v54 = vadd.f32 %v9462_v49, %v5753_v57  ;;  %v5890_v59 = vmax.f32 %v5858_v0, 0.0 }
 0x22d   : > { %v5859_v37 = vadd.f32 %v9462_v49, %v5756_v21  ;;  %v5754_v6 = vadd.f32 %v5689_v33, %v5160_v15  ;;  %v5888_v4 = vmax.f32 %v5856_v54, 0.0 }
 0x22f   : > { %v5891_v56 = vmax.f32 %v5859_v37, 0.0  ;;  %v5857_v10 = vadd.f32 %v9462_v49, %v5754_v6 }
 0x231   : > { %v6897_v23 = vpack.c.bf16 %v5891_v56, %v5890_v59  ;;  %v5889_v45 = vmax.f32 %v5857_v10, 0.0  ;;  %v7576_v50 = vpop.f32.mrf.mxu0 }
 0x232   : > { %v7528_v35 = vpop.f32.mrf.mxu1 }
 0x233   : > { %6929 = vst [vmem:[%s9480_s13 + $0x58] sm:$0xff] %v6897_v23   ;;  %v6892_v1 = vpack.c.bf16 %v5889_v45, %v5888_v4  ;;  %v5165_v8 = vadd.f32 %v7528_v35, %v9430_v22  ;;  %v5702_v19 = vpop.f32.mrf.mxu0 }
 0x234   : > { %v5108_v36 = vpop.f32.mrf.mxu1 }
 0x235   : > { %6928 = vst [vmem:[%s9480_s13 + $0x50] sm:$0xff] %v6892_v1   ;;  %v5759_v44 = vadd.f32 %v7576_v50, %v5165_v8  ;;  %v5163_v55 = vadd.f32 %v5108_v36, %v9433_v63  ;;  %v7577_v25 = vpop.f32.mrf.mxu0 }
 0x236   : > { %v7529_v47 = vpop.f32.mrf.mxu1 }
 0x237   : > { %v5757_v12 = vadd.f32 %v5702_v19, %v5163_v55  ;;  %v5166_v53 = vadd.f32 %v7529_v47, %v9436_v24  ;;  %v5862_v18 = vadd.f32 %v9462_v49, %v5759_v44  ;;  %v5705_v48 = vpop.f32.mrf.mxu0 }
 0x238   : > { %v5111_v39 = vpop.f32.mrf.mxu1 }
 0x239   : > { %v5760_v61 = vadd.f32 %v7577_v25, %v5166_v53  ;;  %v5164_v5 = vadd.f32 %v5111_v39, %v9439_v13  ;;  %v5860_v22 = vadd.f32 %v9462_v49, %v5757_v12  ;;  %v5894_v63 = vmax.f32 %v5862_v18, 0.0 }
 0x23b   : > { %v5863_v58 = vadd.f32 %v9462_v49, %v5760_v61  ;;  %v5758_v46 = vadd.f32 %v5705_v48, %v5164_v5  ;;  %v5892_v27 = vmax.f32 %v5860_v22, 0.0 }
 0x23d   : > { %v5895_v2 = vmax.f32 %v5863_v58, 0.0  ;;  %v5861_v42 = vadd.f32 %v9462_v49, %v5758_v46 }
 0x23f   : > { %v6907_v24 = vpack.c.bf16 %v5895_v2, %v5894_v63  ;;  %v5893_v38 = vmax.f32 %v5861_v42, 0.0  ;;  %v7580_v40 = vpop.f32.mrf.mxu0 }
 0x240   : > { %v7532_v3 = vpop.f32.mrf.mxu1 }
 0x241   : > { %6931 = vst [vmem:[%s9480_s13 + $0x68] sm:$0xff] %v6907_v24   ;;  %v6902_v11 = vpack.c.bf16 %v5893_v38, %v5892_v27  ;;  %v5169_v13 = vadd.f32 %v7532_v3, %v9442_v26  ;;  %v5718_v17 = vpop.f32.mrf.mxu0 }
 0x242   : > { %v5124_v30 = vpop.f32.mrf.mxu1 }
 0x243   : > { %6930 = vst [vmem:[%s9480_s13 + $0x60] sm:$0xff] %v6902_v11   ;;  %v5763_v31 = vadd.f32 %v7580_v40, %v5169_v13  ;;  %v5167_v16 = vadd.f32 %v5124_v30, %v9447_v34  ;;  %v7581_v52 = vpop.f32.mrf.mxu0 }
 0x244   : > { %v7533_v9 = vpop.f32.mrf.mxu1 }
 0x245   : > { %v5761_v20 = vadd.f32 %v5718_v17, %v5167_v16  ;;  %v5170_v7 = vadd.f32 %v7533_v9, %v9451_v32  ;;  %v5866_v41 = vadd.f32 %v9462_v49, %v5763_v31  ;;  %v5721_v26 = vpop.f32.mrf.mxu0 }
 0x246   : > { %v5127_v51 = vpop.f32.mrf.mxu1 }
 0x247   : > { %v5764_v14 = vadd.f32 %v7581_v52, %v5170_v7  ;;  %v5168_v62 = vadd.f32 %v5127_v51, %v9455_v43  ;;  %v5864_v28 = vadd.f32 %v9462_v49, %v5761_v20  ;;  %v5898_v34 = vmax.f32 %v5866_v41, 0.0 }
 0x249   : > { %v5867_v57 = vadd.f32 %v9462_v49, %v5764_v14  ;;  %v5762_v60 = vadd.f32 %v5721_v26, %v5168_v62  ;;  %v5896_v21 = vmax.f32 %v5864_v28, 0.0 }
 0x24b   : > { %v5899_v29 = vmax.f32 %v5867_v57, 0.0  ;;  %v5865_v0 = vadd.f32 %v9462_v49, %v5762_v60 }
 0x24d   : > { %v6917_v15 = vpack.c.bf16 %v5899_v29, %v5898_v34  ;;  %v5897_v32 = vmax.f32 %v5865_v0, 0.0 }
 0x24f   : > { %6933 = vst [vmem:[%s9480_s13 + $0x78] sm:$0xff] %v6917_v15   ;;  %v6912_v33 = vpack.c.bf16 %v5897_v32, %v5896_v21 }
 0x251   : > { %6932 = vst [vmem:[%s9480_s13 + $0x70] sm:$0xff] %v6912_v33  }
 0x252 PF: > { %s13_s12 = sadd.s32 1, %s7733_s12  }
 0x253   : > { %p10_p4 = scmp.ge.s32.totalorder %s13_s12, 4  }
 0x255   :  { %12 = sbr.rel (!%p10_p4) target bundleno = 1 (0x1), region = 72 }

</bundles_post_ra>
